<compile_context>
chip_gen: v5e
topology: v5e:2x2
jax: 0.10.0
libtpu: 0.0.40
codegen_flags: <defaults>
</compile_context>

<pallas_src>
import math
import functools

import jax
import jax.numpy as jnp
from jax.experimental import pallas as pl
from jax.experimental.pallas import tpu as pltpu


# -----------------------------------------------------------------------------
# Fused whole-model kernel (one image per grid step, everything in VMEM)
# -----------------------------------------------------------------------------
def _fused_model_kernel(*refs, n_layers, n_resblocks, H, W, Cpad, Cout_end,
                        res_scale, xoff):
    """refs = (x_ref, w0, b0, ..., w_{L-1}, b_{L-1}, o_ref, buf_ref)

    Layout: channels on sublanes, pixels (P = H*W) on lanes.
      x_ref : (1, Cpad, P)      channel-padded, flattened NCHW input block
      w_l   : (cout_l, 9*Cpad)  im2col weight matrix (tap-major along K)
      b_l   : (cout_l, 1)       bias
      o_ref : (1, Cout_end, P)  lane-dense softmax output block
      buf   : (Cpad, PB)        flat activation scratch with zero halo; the
                                current activation lives at lanes [xoff, xoff+P)
    """
    x_ref = refs[0]
    wb = refs[1:1 + 2 * n_layers]
    o_ref = refs[1 + 2 * n_layers]
    buf = refs[2 + 2 * n_layers]

    P = H * W
    PB = buf.shape[1]

    # Zero only the halo, once per image.  The interior [xoff, xoff+P) is fully
    # rewritten before each conv; lanes [xoff-W-1, xoff) and [xoff+P, xoff+P+W]
    # provide the "same" zero padding (top/bottom rows) for every layer.
    buf[:, 0:xoff] = jnp.zeros((Cpad, xoff), jnp.float32)
    buf[:, xoff + P:] = jnp.zeros((Cpad, PB - xoff - P), jnp.float32)

    # Horizontal edge masks (left / right image border), hoisted & broadcast
    # once (JAX does not CSE broadcast_in_dim).
    xpos = jax.lax.broadcasted_iota(jnp.int32, (1, P), 1) % W
    not_left = jnp.broadcast_to((xpos != 0).astype(jnp.float32), (Cpad, P))
    not_right = jnp.broadcast_to((xpos != W - 1).astype(jnp.float32), (Cpad, P))

    def conv(act, layer):
        """3x3 'same' conv via a single im2col matmul.  act: (Cpad, P)."""
        w_ref, b_ref = wb[2 * layer], wb[2 * layer + 1]
        buf[:, xoff:xoff + P] = act                       # lane-aligned store
        wins = []
        for k in range(9):                                # 9 static window reads
            kh, kw = divmod(k, 3)
            dy, dx = kh - 1, kw - 1
            start = xoff + dy * W + dx
            win = buf[:, start:start + P]
            if dx == -1:
                win = win * not_left                      # kill wrapped left edge
            elif dx == 1:
                win = win * not_right                     # kill wrapped right edge
            wins.append(win)
        xcol = jnp.concatenate(wins, axis=0)              # (9*Cpad, P)
        y = jnp.dot(w_ref[...], xcol, preferred_element_type=jnp.float32)
        return y + b_ref[...]                             # (cout, P)

    # --- start conv ----------------------------------------------------------
    h = conv(x_ref[0], 0)
    layer = 1

    # --- residual blocks: x + res_scale * conv(relu(conv(x))) ----------------
    for _ in range(n_resblocks):
        t = jnp.maximum(conv(h, layer), 0.0)
        layer += 1
        h = conv(t, layer) * res_scale + h
        layer += 1

    # --- tail conv (last module of the `resblocks` Sequential) ---------------
    h = conv(h, layer)
    layer += 1

    # --- end conv + Softmax2d (softmax over the channel/sublane axis) --------
    y = conv(h, layer)                                    # (Cout_end, P)
    m = jnp.max(y, axis=0, keepdims=True)
    e = jnp.exp(y - m)
    s = jnp.sum(e, axis=0, keepdims=True)
    o_ref[0] = (e * pl.reciprocal(s, approx=False)).astype(o_ref.dtype)


# -----------------------------------------------------------------------------
# Parameter init (mirrors the PyTorch __init__: weight ~ N(0, sqrt(2/n)), bias=0)
# -----------------------------------------------------------------------------
def init_conv(key, cin, cout, k=3):
    n = k * k * cout
    std = math.sqrt(2.0 / n)
    w_oihw = std * jax.random.normal(key, (cout, cin, k, k), jnp.float32)
    b = jnp.zeros((cout,), jnp.float32)
    return w_oihw, b


def init_model_params(key, n_features, n_resblocks, in_channels, out_channels):
    keys = jax.random.split(key, 2 * n_resblocks + 3)
    params = {"start": init_conv(keys[0], in_channels, n_features),
              "resblocks": []}
    for i in range(n_resblocks):
        w1, b1 = init_conv(keys[1 + 2 * i], n_features, n_features)
        w2, b2 = init_conv(keys[2 + 2 * i], n_features, n_features)
        params["resblocks"].append((w1, b1, w2, b2))
    params["tail"] = init_conv(keys[2 * n_resblocks + 1], n_features, n_features)
    params["end"] = init_conv(keys[2 * n_resblocks + 2], n_features, out_channels)
    return params


# -----------------------------------------------------------------------------
# One-time weight re-layout (done at init, not per forward call)
# -----------------------------------------------------------------------------
def _prep_conv(w_oihw, b, cpad_in, cout_pad=None):
    """OIHW conv weight -> (cout[_pad], 9*cpad_in) im2col matrix + (cout[_pad],1) bias."""
    cout, cin, kh, kw = w_oihw.shape
    w = jnp.transpose(w_oihw, (0, 2, 3, 1))               # (cout, kh, kw, cin)
    w = jnp.pad(w, ((0, 0), (0, 0), (0, 0), (0, cpad_in - cin)))
    w = w.reshape(cout, kh * kw * cpad_in)                # K = (kh*3+kw)*cpad + c
    if cout_pad is not None and cout_pad > cout:
        w = jnp.pad(w, ((0, cout_pad - cout), (0, 0)))
        b = jnp.pad(b, (0, cout_pad - cout))
    return w.astype(jnp.float32), b.reshape(-1, 1).astype(jnp.float32)


def prepare_model(params, n_features, n_resblocks, in_channels, out_channels,
                  res_scale=0.15):
    """Returns (jitted forward(x_nchw, layers) -> NCHW softmax, prepared layers)."""
    cpad = max(8, -(-max(n_features, in_channels) // 8) * 8)

    layers = [_prep_conv(*params["start"], cpad, cpad)]
    for (w1, b1, w2, b2) in params["resblocks"]:
        layers.append(_prep_conv(w1, b1, cpad, cpad))
        layers.append(_prep_conv(w2, b2, cpad, cpad))
    layers.append(_prep_conv(*params["tail"], cpad, cpad))
    layers.append(_prep_conv(*params["end"], cpad, None))   # softmax head: no cout pad
    layers = tuple(layers)

    @jax.jit
    def forward(x_nchw, layer_params):
        N, Cin, H, W = x_nchw.shape
        P = H * W
        n_layers = len(layer_params)

        # Free reshape NCHW -> (N, C, H*W); tiny channel zero-pad to cpad.
        x = x_nchw.reshape(N, Cin, P).astype(jnp.float32)
        if Cin < cpad:
            x = jnp.pad(x, ((0, 0), (0, cpad - Cin), (0, 0)))

        # Lane offset of the activation inside the flat scratch buffer: must be
        # >= W+1 (halo depth) and lane-tile aligned so interior stores are
        # unmasked.  Same for the trailing halo.
        xoff = -(-(W + 1) // 128) * 128
        trail = -(-(W + 1) // 128) * 128
        PB = xoff + P + trail

        kernel = functools.partial(
            _fused_model_kernel, n_layers=n_layers, n_resblocks=n_resblocks,
            H=H, W=W, Cpad=cpad, Cout_end=out_channels, res_scale=res_scale,
            xoff=xoff)

        in_specs = [pl.BlockSpec((1, cpad, P), lambda n: (n, 0, 0))]
        flat_args = [x]
        for (w, b) in layer_params:
            in_specs.append(pl.BlockSpec(w.shape, lambda n: (0, 0)))
            in_specs.append(pl.BlockSpec(b.shape, lambda n: (0, 0)))
            flat_args += [w, b]

        out = pl.pallas_call(
            kernel,
            out_shape=jax.ShapeDtypeStruct((N, out_channels, P), jnp.float32),
            grid_spec=pltpu.PrefetchScalarGridSpec(
                num_scalar_prefetch=0,
                grid=(N,),
                in_specs=in_specs,
                out_specs=pl.BlockSpec((1, out_channels, P),
                                       lambda n: (n, 0, 0)),
                scratch_shapes=[pltpu.VMEM((cpad, PB), jnp.float32)]),
            compiler_params=pltpu.CompilerParams(
                dimension_semantics=("parallel",),
                vmem_limit_bytes=32 * 1024 * 1024),
        )(*flat_args)

        # Lane-dense (N, C, H*W) output -> NCHW is a free reshape (no transpose).
        return out.reshape(N, out_channels, H, W)

    return forward, layers


# -----------------------------------------------------------------------------
# Pure-JAX reference (same math, NCHW) for correctness checking
# -----------------------------------------------------------------------------
def _ref_conv(x, w_oihw, b):
    y = jax.lax.conv_general_dilated(
        x, w_oihw, window_strides=(1, 1), padding="SAME",
        dimension_numbers=("NCHW", "OIHW", "NCHW"),
        precision=jax.lax.Precision.HIGHEST)
    return y + b[None, :, None, None]


def model_forward_ref(x_nchw, params, res_scale=0.15):
    h = _ref_conv(x_nchw, *params["start"])
    for (w1, b1, w2, b2) in params["resblocks"]:
        t = jnp.maximum(_ref_conv(h, w1, b1), 0.0)
        h = _ref_conv(t, w2, b2) * res_scale + h
    h = _ref_conv(h, *params["tail"])
    y = _ref_conv(h, *params["end"])
    return jax.nn.softmax(y, axis=1)


# -----------------------------------------------------------------------------
if __name__ == "__main__":
    # Shapes consistent with the module: Model(n_features=8, n_resblocks=2,
    # in_channels=1, out_channels=10), input (batch=2, 1, 16, 16).
    batch, in_channels, H, W = 2, 1, 16, 16
    n_features, n_resblocks, out_channels = 8, 2, 10

    key = jax.random.PRNGKey(0)
    kx, kp = jax.random.split(key)
    x = jax.random.normal(kx, (batch, in_channels, H, W), jnp.float32)
    params = init_model_params(kp, n_features, n_resblocks, in_channels,
                               out_channels)

    forward, layers = prepare_model(params, n_features, n_resblocks,
                                    in_channels, out_channels, res_scale=0.15)

    out = jax.block_until_ready(forward(x, layers))

    ref = jax.block_until_ready(model_forward_ref(x, params, res_scale=0.15))
    assert out.shape == (batch, out_channels, H, W), out.shape
    err = float(jnp.max(jnp.abs(out - ref)))
    assert err < 1e-4, f"max abs err {err}"

    print("KERNEL_OK")
</pallas_src>

<mosaic_0001>
module attributes {stable_mosaic.version = 11 : i64} {
  func.func @_fused_model_kernel(%arg0: i32, %arg1: memref<1x8x256xf32, #tpu.memory_space<vmem>>, %arg2: memref<8x72xf32, #tpu.memory_space<vmem>>, %arg3: memref<8x1xf32, #tpu.memory_space<vmem>>, %arg4: memref<8x72xf32, #tpu.memory_space<vmem>>, %arg5: memref<8x1xf32, #tpu.memory_space<vmem>>, %arg6: memref<8x72xf32, #tpu.memory_space<vmem>>, %arg7: memref<8x1xf32, #tpu.memory_space<vmem>>, %arg8: memref<8x72xf32, #tpu.memory_space<vmem>>, %arg9: memref<8x1xf32, #tpu.memory_space<vmem>>, %arg10: memref<8x72xf32, #tpu.memory_space<vmem>>, %arg11: memref<8x1xf32, #tpu.memory_space<vmem>>, %arg12: memref<8x72xf32, #tpu.memory_space<vmem>>, %arg13: memref<8x1xf32, #tpu.memory_space<vmem>>, %arg14: memref<10x72xf32, #tpu.memory_space<vmem>>, %arg15: memref<10x1xf32, #tpu.memory_space<vmem>>, %arg16: memref<1x10x256xf32, #tpu.memory_space<vmem>>, %arg17: memref<8x512xf32, #tpu.memory_space<vmem>>) attributes {dimension_semantics = [#tpu.dimension_semantics<parallel>], iteration_bounds = array<i64: 2>, scalar_prefetch = 0 : i64, scratch_operands = 1 : i64, tpu.core_type = #tpu.core_type<tc>, window_params = [{transform_indices = @transform_0, window_bounds = array<i64: 1, 8, 256>}, {pipeline_mode = #tpu.pipeline_mode<synchronous>, transform_indices = @transform_1, window_bounds = array<i64: 8, 72>}, {pipeline_mode = #tpu.pipeline_mode<synchronous>, transform_indices = @transform_2, window_bounds = array<i64: 8, 1>}, {pipeline_mode = #tpu.pipeline_mode<synchronous>, transform_indices = @transform_3, window_bounds = array<i64: 8, 72>}, {pipeline_mode = #tpu.pipeline_mode<synchronous>, transform_indices = @transform_4, window_bounds = array<i64: 8, 1>}, {pipeline_mode = #tpu.pipeline_mode<synchronous>, transform_indices = @transform_5, window_bounds = array<i64: 8, 72>}, {pipeline_mode = #tpu.pipeline_mode<synchronous>, transform_indices = @transform_6, window_bounds = array<i64: 8, 1>}, {pipeline_mode = #tpu.pipeline_mode<synchronous>, transform_indices = @transform_7, window_bounds = array<i64: 8, 72>}, {pipeline_mode = #tpu.pipeline_mode<synchronous>, transform_indices = @transform_8, window_bounds = array<i64: 8, 1>}, {pipeline_mode = #tpu.pipeline_mode<synchronous>, transform_indices = @transform_9, window_bounds = array<i64: 8, 72>}, {pipeline_mode = #tpu.pipeline_mode<synchronous>, transform_indices = @transform_10, window_bounds = array<i64: 8, 1>}, {pipeline_mode = #tpu.pipeline_mode<synchronous>, transform_indices = @transform_11, window_bounds = array<i64: 8, 72>}, {pipeline_mode = #tpu.pipeline_mode<synchronous>, transform_indices = @transform_12, window_bounds = array<i64: 8, 1>}, {pipeline_mode = #tpu.pipeline_mode<synchronous>, transform_indices = @transform_13, window_bounds = array<i64: 10, 72>}, {pipeline_mode = #tpu.pipeline_mode<synchronous>, transform_indices = @transform_14, window_bounds = array<i64: 10, 1>}, {transform_indices = @transform_15, window_bounds = array<i64: 1, 10, 256>}]} {
    %cst = arith.constant 0.000000e+00 : f32
    %0 = vector.broadcast %cst : f32 to vector<8x128xf32>
    %c0 = arith.constant 0 : index
    %c0_0 = arith.constant 0 : index
    %1 = vector.load %arg17[%c0, %c0_0] : memref<8x512xf32, #tpu.memory_space<vmem>>, vector<8x128xf32>
    tpu.vector_store %arg17[%c0, %c0_0], %0 {strides = array<i32>} : memref<8x512xf32, #tpu.memory_space<vmem>>, vector<8x128xf32>,
    %cst_1 = arith.constant 0.000000e+00 : f32
    %2 = vector.broadcast %cst_1 : f32 to vector<8x128xf32>
    %c0_2 = arith.constant 0 : index
    %c384 = arith.constant 384 : index
    %3 = vector.load %arg17[%c0_2, %c384] : memref<8x512xf32, #tpu.memory_space<vmem>>, vector<8x128xf32>
    tpu.vector_store %arg17[%c0_2, %c384], %2 {strides = array<i32>} : memref<8x512xf32, #tpu.memory_space<vmem>>, vector<8x128xf32>,
    %4 = tpu.iota {dimensions = array<i32: 1>} : vector<1x256xi32>
    %c16_i32 = arith.constant 16 : i32
    %c0_i32 = arith.constant 0 : i32
    %5 = arith.cmpi eq, %c16_i32, %c0_i32 : i32
    %c1_i32 = arith.constant 1 : i32
    %6 = arith.select %5, %c1_i32, %c16_i32 : i32
    %7 = vector.broadcast %6 : i32 to vector<1x256xi32>
    %8 = arith.remsi %4, %7 : vector<1x256xi32>
    %c0_i32_3 = arith.constant 0 : i32
    %9 = vector.broadcast %c0_i32_3 : i32 to vector<1x256xi32>
    %10 = arith.cmpi ne, %8, %9 : vector<1x256xi32>
    %c0_i32_4 = arith.constant 0 : i32
    %11 = vector.broadcast %c0_i32_4 : i32 to vector<1x256xi32>
    %12 = arith.cmpi slt, %8, %11 : vector<1x256xi32>
    %c0_i32_5 = arith.constant 0 : i32
    %13 = arith.cmpi slt, %6, %c0_i32_5 : i32
    %14 = vector.broadcast %13 : i1 to vector<1x256xi1>
    %15 = vector.broadcast %14 : vector<1x256xi1> to vector<1x256xi1>
    %16 = arith.xori %12, %15 : vector<1x256xi1>
    %17 = arith.andi %16, %10 : vector<1x256xi1>
    %18 = vector.broadcast %6 : i32 to vector<1x256xi32>
    %19 = arith.addi %8, %18 : vector<1x256xi32>
    %20 = arith.select %17, %19, %8 : vector<1x256xi1>, vector<1x256xi32>
    %c0_i32_6 = arith.constant 0 : i32
    %21 = vector.broadcast %c0_i32_6 : i32 to vector<1x256xi32>
    %22 = arith.cmpi ne, %20, %21 : vector<1x256xi32>
    %23 = arith.extui %22 : vector<1x256xi1> to vector<1x256xi32>
    %24 = arith.sitofp %23 : vector<1x256xi32> to vector<1x256xf32>
    %25 = vector.shape_cast %24 : vector<1x256xf32> to vector<1x256xf32>
    %26 = vector.broadcast %25 : vector<1x256xf32> to vector<8x256xf32>
    %c15_i32 = arith.constant 15 : i32
    %27 = vector.broadcast %c15_i32 : i32 to vector<1x256xi32>
    %28 = arith.cmpi ne, %20, %27 : vector<1x256xi32>
    %29 = arith.extui %28 : vector<1x256xi1> to vector<1x256xi32>
    %30 = arith.sitofp %29 : vector<1x256xi32> to vector<1x256xf32>
    %31 = vector.shape_cast %30 : vector<1x256xf32> to vector<1x256xf32>
    %32 = vector.broadcast %31 : vector<1x256xf32> to vector<8x256xf32>
    %c0_7 = arith.constant 0 : index
    %c0_8 = arith.constant 0 : index
    %c0_9 = arith.constant 0 : index
    %33 = vector.load %arg1[%c0_7, %c0_8, %c0_9] : memref<1x8x256xf32, #tpu.memory_space<vmem>>, vector<1x8x256xf32>
    %34 = vector.shape_cast %33 : vector<1x8x256xf32> to vector<8x256xf32>
    %c0_10 = arith.constant 0 : index
    %c128 = arith.constant 128 : index
    %35 = vector.load %arg17[%c0_10, %c128] : memref<8x512xf32, #tpu.memory_space<vmem>>, vector<8x256xf32>
    tpu.vector_store %arg17[%c0_10, %c128], %34 {strides = array<i32>} : memref<8x512xf32, #tpu.memory_space<vmem>>, vector<8x256xf32>,
    %c0_11 = arith.constant 0 : index
    %c111 = arith.constant 111 : index
    %36 = vector.load %arg17[%c0_11, %c111] : memref<8x512xf32, #tpu.memory_space<vmem>>, vector<8x256xf32>
    %37 = arith.mulf %36, %26 : vector<8x256xf32>
    %c0_12 = arith.constant 0 : index
    %c112 = arith.constant 112 : index
    %38 = vector.load %arg17[%c0_12, %c112] : memref<8x512xf32, #tpu.memory_space<vmem>>, vector<8x256xf32>
    %c0_13 = arith.constant 0 : index
    %c113 = arith.constant 113 : index
    %39 = vector.load %arg17[%c0_13, %c113] : memref<8x512xf32, #tpu.memory_space<vmem>>, vector<8x256xf32>
    %40 = arith.mulf %39, %32 : vector<8x256xf32>
    %c0_14 = arith.constant 0 : index
    %c127 = arith.constant 127 : index
    %41 = vector.load %arg17[%c0_14, %c127] : memref<8x512xf32, #tpu.memory_space<vmem>>, vector<8x256xf32>
    %42 = arith.mulf %41, %26 : vector<8x256xf32>
    %c0_15 = arith.constant 0 : index
    %c128_16 = arith.constant 128 : index
    %43 = vector.load %arg17[%c0_15, %c128_16] : memref<8x512xf32, #tpu.memory_space<vmem>>, vector<8x256xf32>
    %c0_17 = arith.constant 0 : index
    %c129 = arith.constant 129 : index
    %44 = vector.load %arg17[%c0_17, %c129] : memref<8x512xf32, #tpu.memory_space<vmem>>, vector<8x256xf32>
    %45 = arith.mulf %44, %32 : vector<8x256xf32>
    %c0_18 = arith.constant 0 : index
    %c143 = arith.constant 143 : index
    %46 = vector.load %arg17[%c0_18, %c143] : memref<8x512xf32, #tpu.memory_space<vmem>>, vector<8x256xf32>
    %47 = arith.mulf %46, %26 : vector<8x256xf32>
    %c0_19 = arith.constant 0 : index
    %c144 = arith.constant 144 : index
    %48 = vector.load %arg17[%c0_19, %c144] : memref<8x512xf32, #tpu.memory_space<vmem>>, vector<8x256xf32>
    %c0_20 = arith.constant 0 : index
    %c145 = arith.constant 145 : index
    %49 = vector.load %arg17[%c0_20, %c145] : memref<8x512xf32, #tpu.memory_space<vmem>>, vector<8x256xf32>
    %50 = arith.mulf %49, %32 : vector<8x256xf32>
    %51 = tpu.concatenate %37, %38, %40, %42, %43, %45, %47, %48, %50 in 0 : vector<8x256xf32>, vector<8x256xf32>, vector<8x256xf32>, vector<8x256xf32>, vector<8x256xf32>, vector<8x256xf32>, vector<8x256xf32>, vector<8x256xf32>, vector<8x256xf32> -> vector<72x256xf32>
    %c0_21 = arith.constant 0 : index
    %c0_22 = arith.constant 0 : index
    %52 = vector.load %arg2[%c0_21, %c0_22] : memref<8x72xf32, #tpu.memory_space<vmem>>, vector<8x72xf32>
    %cst_23 = arith.constant dense<0.000000e+00> : vector<8x256xf32>
    %53 = tpu.matmul %52, %51, %cst_23 {dimension_numbers = #tpu.dot_dimension_numbers<[1], [0], [0], [1], [0, 0, 1, 1], [], []>} : vector<8x72xf32>, vector<72x256xf32>, vector<8x256xf32> -> vector<8x256xf32>
    %c0_24 = arith.constant 0 : index
    %c0_25 = arith.constant 0 : index
    %54 = vector.load %arg3[%c0_24, %c0_25] : memref<8x1xf32, #tpu.memory_space<vmem>>, vector<8x1xf32>
    %55 = vector.broadcast %54 : vector<8x1xf32> to vector<8x256xf32>
    %56 = arith.addf %53, %55 : vector<8x256xf32>
    %c0_26 = arith.constant 0 : index
    %c128_27 = arith.constant 128 : index
    %57 = vector.load %arg17[%c0_26, %c128_27] : memref<8x512xf32, #tpu.memory_space<vmem>>, vector<8x256xf32>
    tpu.vector_store %arg17[%c0_26, %c128_27], %56 {strides = array<i32>} : memref<8x512xf32, #tpu.memory_space<vmem>>, vector<8x256xf32>,
    %c0_28 = arith.constant 0 : index
    %c111_29 = arith.constant 111 : index
    %58 = vector.load %arg17[%c0_28, %c111_29] : memref<8x512xf32, #tpu.memory_space<vmem>>, vector<8x256xf32>
    %59 = arith.mulf %58, %26 : vector<8x256xf32>
    %c0_30 = arith.constant 0 : index
    %c112_31 = arith.constant 112 : index
    %60 = vector.load %arg17[%c0_30, %c112_31] : memref<8x512xf32, #tpu.memory_space<vmem>>, vector<8x256xf32>
    %c0_32 = arith.constant 0 : index
    %c113_33 = arith.constant 113 : index
    %61 = vector.load %arg17[%c0_32, %c113_33] : memref<8x512xf32, #tpu.memory_space<vmem>>, vector<8x256xf32>
    %62 = arith.mulf %61, %32 : vector<8x256xf32>
    %c0_34 = arith.constant 0 : index
    %c127_35 = arith.constant 127 : index
    %63 = vector.load %arg17[%c0_34, %c127_35] : memref<8x512xf32, #tpu.memory_space<vmem>>, vector<8x256xf32>
    %64 = arith.mulf %63, %26 : vector<8x256xf32>
    %c0_36 = arith.constant 0 : index
    %c128_37 = arith.constant 128 : index
    %65 = vector.load %arg17[%c0_36, %c128_37] : memref<8x512xf32, #tpu.memory_space<vmem>>, vector<8x256xf32>
    %c0_38 = arith.constant 0 : index
    %c129_39 = arith.constant 129 : index
    %66 = vector.load %arg17[%c0_38, %c129_39] : memref<8x512xf32, #tpu.memory_space<vmem>>, vector<8x256xf32>
    %67 = arith.mulf %66, %32 : vector<8x256xf32>
    %c0_40 = arith.constant 0 : index
    %c143_41 = arith.constant 143 : index
    %68 = vector.load %arg17[%c0_40, %c143_41] : memref<8x512xf32, #tpu.memory_space<vmem>>, vector<8x256xf32>
    %69 = arith.mulf %68, %26 : vector<8x256xf32>
    %c0_42 = arith.constant 0 : index
    %c144_43 = arith.constant 144 : index
    %70 = vector.load %arg17[%c0_42, %c144_43] : memref<8x512xf32, #tpu.memory_space<vmem>>, vector<8x256xf32>
    %c0_44 = arith.constant 0 : index
    %c145_45 = arith.constant 145 : index
    %71 = vector.load %arg17[%c0_44, %c145_45] : memref<8x512xf32, #tpu.memory_space<vmem>>, vector<8x256xf32>
    %72 = arith.mulf %71, %32 : vector<8x256xf32>
    %73 = tpu.concatenate %59, %60, %62, %64, %65, %67, %69, %70, %72 in 0 : vector<8x256xf32>, vector<8x256xf32>, vector<8x256xf32>, vector<8x256xf32>, vector<8x256xf32>, vector<8x256xf32>, vector<8x256xf32>, vector<8x256xf32>, vector<8x256xf32> -> vector<72x256xf32>
    %c0_46 = arith.constant 0 : index
    %c0_47 = arith.constant 0 : index
    %74 = vector.load %arg4[%c0_46, %c0_47] : memref<8x72xf32, #tpu.memory_space<vmem>>, vector<8x72xf32>
    %cst_48 = arith.constant dense<0.000000e+00> : vector<8x256xf32>
    %75 = tpu.matmul %74, %73, %cst_48 {dimension_numbers = #tpu.dot_dimension_numbers<[1], [0], [0], [1], [0, 0, 1, 1], [], []>} : vector<8x72xf32>, vector<72x256xf32>, vector<8x256xf32> -> vector<8x256xf32>
    %c0_49 = arith.constant 0 : index
    %c0_50 = arith.constant 0 : index
    %76 = vector.load %arg5[%c0_49, %c0_50] : memref<8x1xf32, #tpu.memory_space<vmem>>, vector<8x1xf32>
    %77 = vector.broadcast %76 : vector<8x1xf32> to vector<8x256xf32>
    %78 = arith.addf %75, %77 : vector<8x256xf32>
    %cst_51 = arith.constant 0.000000e+00 : f32
    %79 = vector.broadcast %cst_51 : f32 to vector<8x256xf32>
    %80 = arith.maximumf %78, %79 : vector<8x256xf32>
    %c0_52 = arith.constant 0 : index
    %c128_53 = arith.constant 128 : index
    %81 = vector.load %arg17[%c0_52, %c128_53] : memref<8x512xf32, #tpu.memory_space<vmem>>, vector<8x256xf32>
    tpu.vector_store %arg17[%c0_52, %c128_53], %80 {strides = array<i32>} : memref<8x512xf32, #tpu.memory_space<vmem>>, vector<8x256xf32>,
    %c0_54 = arith.constant 0 : index
    %c111_55 = arith.constant 111 : index
    %82 = vector.load %arg17[%c0_54, %c111_55] : memref<8x512xf32, #tpu.memory_space<vmem>>, vector<8x256xf32>
    %83 = arith.mulf %82, %26 : vector<8x256xf32>
    %c0_56 = arith.constant 0 : index
    %c112_57 = arith.constant 112 : index
    %84 = vector.load %arg17[%c0_56, %c112_57] : memref<8x512xf32, #tpu.memory_space<vmem>>, vector<8x256xf32>
    %c0_58 = arith.constant 0 : index
    %c113_59 = arith.constant 113 : index
    %85 = vector.load %arg17[%c0_58, %c113_59] : memref<8x512xf32, #tpu.memory_space<vmem>>, vector<8x256xf32>
    %86 = arith.mulf %85, %32 : vector<8x256xf32>
    %c0_60 = arith.constant 0 : index
    %c127_61 = arith.constant 127 : index
    %87 = vector.load %arg17[%c0_60, %c127_61] : memref<8x512xf32, #tpu.memory_space<vmem>>, vector<8x256xf32>
    %88 = arith.mulf %87, %26 : vector<8x256xf32>
    %c0_62 = arith.constant 0 : index
    %c128_63 = arith.constant 128 : index
    %89 = vector.load %arg17[%c0_62, %c128_63] : memref<8x512xf32, #tpu.memory_space<vmem>>, vector<8x256xf32>
    %c0_64 = arith.constant 0 : index
    %c129_65 = arith.constant 129 : index
    %90 = vector.load %arg17[%c0_64, %c129_65] : memref<8x512xf32, #tpu.memory_space<vmem>>, vector<8x256xf32>
    %91 = arith.mulf %90, %32 : vector<8x256xf32>
    %c0_66 = arith.constant 0 : index
    %c143_67 = arith.constant 143 : index
    %92 = vector.load %arg17[%c0_66, %c143_67] : memref<8x512xf32, #tpu.memory_space<vmem>>, vector<8x256xf32>
    %93 = arith.mulf %92, %26 : vector<8x256xf32>
    %c0_68 = arith.constant 0 : index
    %c144_69 = arith.constant 144 : index
    %94 = vector.load %arg17[%c0_68, %c144_69] : memref<8x512xf32, #tpu.memory_space<vmem>>, vector<8x256xf32>
    %c0_70 = arith.constant 0 : index
    %c145_71 = arith.constant 145 : index
    %95 = vector.load %arg17[%c0_70, %c145_71] : memref<8x512xf32, #tpu.memory_space<vmem>>, vector<8x256xf32>
    %96 = arith.mulf %95, %32 : vector<8x256xf32>
    %97 = tpu.concatenate %83, %84, %86, %88, %89, %91, %93, %94, %96 in 0 : vector<8x256xf32>, vector<8x256xf32>, vector<8x256xf32>, vector<8x256xf32>, vector<8x256xf32>, vector<8x256xf32>, vector<8x256xf32>, vector<8x256xf32>, vector<8x256xf32> -> vector<72x256xf32>
    %c0_72 = arith.constant 0 : index
    %c0_73 = arith.constant 0 : index
    %98 = vector.load %arg6[%c0_72, %c0_73] : memref<8x72xf32, #tpu.memory_space<vmem>>, vector<8x72xf32>
    %cst_74 = arith.constant dense<0.000000e+00> : vector<8x256xf32>
    %99 = tpu.matmul %98, %97, %cst_74 {dimension_numbers = #tpu.dot_dimension_numbers<[1], [0], [0], [1], [0, 0, 1, 1], [], []>} : vector<8x72xf32>, vector<72x256xf32>, vector<8x256xf32> -> vector<8x256xf32>
    %c0_75 = arith.constant 0 : index
    %c0_76 = arith.constant 0 : index
    %100 = vector.load %arg7[%c0_75, %c0_76] : memref<8x1xf32, #tpu.memory_space<vmem>>, vector<8x1xf32>
    %101 = vector.broadcast %100 : vector<8x1xf32> to vector<8x256xf32>
    %102 = arith.addf %99, %101 : vector<8x256xf32>
    %cst_77 = arith.constant 1.500000e-01 : f32
    %103 = vector.broadcast %cst_77 : f32 to vector<8x256xf32>
    %104 = arith.mulf %102, %103 : vector<8x256xf32>
    %105 = arith.addf %104, %56 : vector<8x256xf32>
    %c0_78 = arith.constant 0 : index
    %c128_79 = arith.constant 128 : index
    %106 = vector.load %arg17[%c0_78, %c128_79] : memref<8x512xf32, #tpu.memory_space<vmem>>, vector<8x256xf32>
    tpu.vector_store %arg17[%c0_78, %c128_79], %105 {strides = array<i32>} : memref<8x512xf32, #tpu.memory_space<vmem>>, vector<8x256xf32>,
    %c0_80 = arith.constant 0 : index
    %c111_81 = arith.constant 111 : index
    %107 = vector.load %arg17[%c0_80, %c111_81] : memref<8x512xf32, #tpu.memory_space<vmem>>, vector<8x256xf32>
    %108 = arith.mulf %107, %26 : vector<8x256xf32>
    %c0_82 = arith.constant 0 : index
    %c112_83 = arith.constant 112 : index
    %109 = vector.load %arg17[%c0_82, %c112_83] : memref<8x512xf32, #tpu.memory_space<vmem>>, vector<8x256xf32>
    %c0_84 = arith.constant 0 : index
    %c113_85 = arith.constant 113 : index
    %110 = vector.load %arg17[%c0_84, %c113_85] : memref<8x512xf32, #tpu.memory_space<vmem>>, vector<8x256xf32>
    %111 = arith.mulf %110, %32 : vector<8x256xf32>
    %c0_86 = arith.constant 0 : index
    %c127_87 = arith.constant 127 : index
    %112 = vector.load %arg17[%c0_86, %c127_87] : memref<8x512xf32, #tpu.memory_space<vmem>>, vector<8x256xf32>
    %113 = arith.mulf %112, %26 : vector<8x256xf32>
    %c0_88 = arith.constant 0 : index
    %c128_89 = arith.constant 128 : index
    %114 = vector.load %arg17[%c0_88, %c128_89] : memref<8x512xf32, #tpu.memory_space<vmem>>, vector<8x256xf32>
    %c0_90 = arith.constant 0 : index
    %c129_91 = arith.constant 129 : index
    %115 = vector.load %arg17[%c0_90, %c129_91] : memref<8x512xf32, #tpu.memory_space<vmem>>, vector<8x256xf32>
    %116 = arith.mulf %115, %32 : vector<8x256xf32>
    %c0_92 = arith.constant 0 : index
    %c143_93 = arith.constant 143 : index
    %117 = vector.load %arg17[%c0_92, %c143_93] : memref<8x512xf32, #tpu.memory_space<vmem>>, vector<8x256xf32>
    %118 = arith.mulf %117, %26 : vector<8x256xf32>
    %c0_94 = arith.constant 0 : index
    %c144_95 = arith.constant 144 : index
    %119 = vector.load %arg17[%c0_94, %c144_95] : memref<8x512xf32, #tpu.memory_space<vmem>>, vector<8x256xf32>
    %c0_96 = arith.constant 0 : index
    %c145_97 = arith.constant 145 : index
    %120 = vector.load %arg17[%c0_96, %c145_97] : memref<8x512xf32, #tpu.memory_space<vmem>>, vector<8x256xf32>
    %121 = arith.mulf %120, %32 : vector<8x256xf32>
    %122 = tpu.concatenate %108, %109, %111, %113, %114, %116, %118, %119, %121 in 0 : vector<8x256xf32>, vector<8x256xf32>, vector<8x256xf32>, vector<8x256xf32>, vector<8x256xf32>, vector<8x256xf32>, vector<8x256xf32>, vector<8x256xf32>, vector<8x256xf32> -> vector<72x256xf32>
    %c0_98 = arith.constant 0 : index
    %c0_99 = arith.constant 0 : index
    %123 = vector.load %arg8[%c0_98, %c0_99] : memref<8x72xf32, #tpu.memory_space<vmem>>, vector<8x72xf32>
    %cst_100 = arith.constant dense<0.000000e+00> : vector<8x256xf32>
    %124 = tpu.matmul %123, %122, %cst_100 {dimension_numbers = #tpu.dot_dimension_numbers<[1], [0], [0], [1], [0, 0, 1, 1], [], []>} : vector<8x72xf32>, vector<72x256xf32>, vector<8x256xf32> -> vector<8x256xf32>
    %c0_101 = arith.constant 0 : index
    %c0_102 = arith.constant 0 : index
    %125 = vector.load %arg9[%c0_101, %c0_102] : memref<8x1xf32, #tpu.memory_space<vmem>>, vector<8x1xf32>
    %126 = vector.broadcast %125 : vector<8x1xf32> to vector<8x256xf32>
    %127 = arith.addf %124, %126 : vector<8x256xf32>
    %cst_103 = arith.constant 0.000000e+00 : f32
    %128 = vector.broadcast %cst_103 : f32 to vector<8x256xf32>
    %129 = arith.maximumf %127, %128 : vector<8x256xf32>
    %c0_104 = arith.constant 0 : index
    %c128_105 = arith.constant 128 : index
    %130 = vector.load %arg17[%c0_104, %c128_105] : memref<8x512xf32, #tpu.memory_space<vmem>>, vector<8x256xf32>
    tpu.vector_store %arg17[%c0_104, %c128_105], %129 {strides = array<i32>} : memref<8x512xf32, #tpu.memory_space<vmem>>, vector<8x256xf32>,
    %c0_106 = arith.constant 0 : index
    %c111_107 = arith.constant 111 : index
    %131 = vector.load %arg17[%c0_106, %c111_107] : memref<8x512xf32, #tpu.memory_space<vmem>>, vector<8x256xf32>
    %132 = arith.mulf %131, %26 : vector<8x256xf32>
    %c0_108 = arith.constant 0 : index
    %c112_109 = arith.constant 112 : index
    %133 = vector.load %arg17[%c0_108, %c112_109] : memref<8x512xf32, #tpu.memory_space<vmem>>, vector<8x256xf32>
    %c0_110 = arith.constant 0 : index
    %c113_111 = arith.constant 113 : index
    %134 = vector.load %arg17[%c0_110, %c113_111] : memref<8x512xf32, #tpu.memory_space<vmem>>, vector<8x256xf32>
    %135 = arith.mulf %134, %32 : vector<8x256xf32>
    %c0_112 = arith.constant 0 : index
    %c127_113 = arith.constant 127 : index
    %136 = vector.load %arg17[%c0_112, %c127_113] : memref<8x512xf32, #tpu.memory_space<vmem>>, vector<8x256xf32>
    %137 = arith.mulf %136, %26 : vector<8x256xf32>
    %c0_114 = arith.constant 0 : index
    %c128_115 = arith.constant 128 : index
    %138 = vector.load %arg17[%c0_114, %c128_115] : memref<8x512xf32, #tpu.memory_space<vmem>>, vector<8x256xf32>
    %c0_116 = arith.constant 0 : index
    %c129_117 = arith.constant 129 : index
    %139 = vector.load %arg17[%c0_116, %c129_117] : memref<8x512xf32, #tpu.memory_space<vmem>>, vector<8x256xf32>
    %140 = arith.mulf %139, %32 : vector<8x256xf32>
    %c0_118 = arith.constant 0 : index
    %c143_119 = arith.constant 143 : index
    %141 = vector.load %arg17[%c0_118, %c143_119] : memref<8x512xf32, #tpu.memory_space<vmem>>, vector<8x256xf32>
    %142 = arith.mulf %141, %26 : vector<8x256xf32>
    %c0_120 = arith.constant 0 : index
    %c144_121 = arith.constant 144 : index
    %143 = vector.load %arg17[%c0_120, %c144_121] : memref<8x512xf32, #tpu.memory_space<vmem>>, vector<8x256xf32>
    %c0_122 = arith.constant 0 : index
    %c145_123 = arith.constant 145 : index
    %144 = vector.load %arg17[%c0_122, %c145_123] : memref<8x512xf32, #tpu.memory_space<vmem>>, vector<8x256xf32>
    %145 = arith.mulf %144, %32 : vector<8x256xf32>
    %146 = tpu.concatenate %132, %133, %135, %137, %138, %140, %142, %143, %145 in 0 : vector<8x256xf32>, vector<8x256xf32>, vector<8x256xf32>, vector<8x256xf32>, vector<8x256xf32>, vector<8x256xf32>, vector<8x256xf32>, vector<8x256xf32>, vector<8x256xf32> -> vector<72x256xf32>
    %c0_124 = arith.constant 0 : index
    %c0_125 = arith.constant 0 : index
    %147 = vector.load %arg10[%c0_124, %c0_125] : memref<8x72xf32, #tpu.memory_space<vmem>>, vector<8x72xf32>
    %cst_126 = arith.constant dense<0.000000e+00> : vector<8x256xf32>
    %148 = tpu.matmul %147, %146, %cst_126 {dimension_numbers = #tpu.dot_dimension_numbers<[1], [0], [0], [1], [0, 0, 1, 1], [], []>} : vector<8x72xf32>, vector<72x256xf32>, vector<8x256xf32> -> vector<8x256xf32>
    %c0_127 = arith.constant 0 : index
    %c0_128 = arith.constant 0 : index
    %149 = vector.load %arg11[%c0_127, %c0_128] : memref<8x1xf32, #tpu.memory_space<vmem>>, vector<8x1xf32>
    %150 = vector.broadcast %149 : vector<8x1xf32> to vector<8x256xf32>
    %151 = arith.addf %148, %150 : vector<8x256xf32>
    %cst_129 = arith.constant 1.500000e-01 : f32
    %152 = vector.broadcast %cst_129 : f32 to vector<8x256xf32>
    %153 = arith.mulf %151, %152 : vector<8x256xf32>
    %154 = arith.addf %153, %105 : vector<8x256xf32>
    %c0_130 = arith.constant 0 : index
    %c128_131 = arith.constant 128 : index
    %155 = vector.load %arg17[%c0_130, %c128_131] : memref<8x512xf32, #tpu.memory_space<vmem>>, vector<8x256xf32>
    tpu.vector_store %arg17[%c0_130, %c128_131], %154 {strides = array<i32>} : memref<8x512xf32, #tpu.memory_space<vmem>>, vector<8x256xf32>,
    %c0_132 = arith.constant 0 : index
    %c111_133 = arith.constant 111 : index
    %156 = vector.load %arg17[%c0_132, %c111_133] : memref<8x512xf32, #tpu.memory_space<vmem>>, vector<8x256xf32>
    %157 = arith.mulf %156, %26 : vector<8x256xf32>
    %c0_134 = arith.constant 0 : index
    %c112_135 = arith.constant 112 : index
    %158 = vector.load %arg17[%c0_134, %c112_135] : memref<8x512xf32, #tpu.memory_space<vmem>>, vector<8x256xf32>
    %c0_136 = arith.constant 0 : index
    %c113_137 = arith.constant 113 : index
    %159 = vector.load %arg17[%c0_136, %c113_137] : memref<8x512xf32, #tpu.memory_space<vmem>>, vector<8x256xf32>
    %160 = arith.mulf %159, %32 : vector<8x256xf32>
    %c0_138 = arith.constant 0 : index
    %c127_139 = arith.constant 127 : index
    %161 = vector.load %arg17[%c0_138, %c127_139] : memref<8x512xf32, #tpu.memory_space<vmem>>, vector<8x256xf32>
    %162 = arith.mulf %161, %26 : vector<8x256xf32>
    %c0_140 = arith.constant 0 : index
    %c128_141 = arith.constant 128 : index
    %163 = vector.load %arg17[%c0_140, %c128_141] : memref<8x512xf32, #tpu.memory_space<vmem>>, vector<8x256xf32>
    %c0_142 = arith.constant 0 : index
    %c129_143 = arith.constant 129 : index
    %164 = vector.load %arg17[%c0_142, %c129_143] : memref<8x512xf32, #tpu.memory_space<vmem>>, vector<8x256xf32>
    %165 = arith.mulf %164, %32 : vector<8x256xf32>
    %c0_144 = arith.constant 0 : index
    %c143_145 = arith.constant 143 : index
    %166 = vector.load %arg17[%c0_144, %c143_145] : memref<8x512xf32, #tpu.memory_space<vmem>>, vector<8x256xf32>
    %167 = arith.mulf %166, %26 : vector<8x256xf32>
    %c0_146 = arith.constant 0 : index
    %c144_147 = arith.constant 144 : index
    %168 = vector.load %arg17[%c0_146, %c144_147] : memref<8x512xf32, #tpu.memory_space<vmem>>, vector<8x256xf32>
    %c0_148 = arith.constant 0 : index
    %c145_149 = arith.constant 145 : index
    %169 = vector.load %arg17[%c0_148, %c145_149] : memref<8x512xf32, #tpu.memory_space<vmem>>, vector<8x256xf32>
    %170 = arith.mulf %169, %32 : vector<8x256xf32>
    %171 = tpu.concatenate %157, %158, %160, %162, %163, %165, %167, %168, %170 in 0 : vector<8x256xf32>, vector<8x256xf32>, vector<8x256xf32>, vector<8x256xf32>, vector<8x256xf32>, vector<8x256xf32>, vector<8x256xf32>, vector<8x256xf32>, vector<8x256xf32> -> vector<72x256xf32>
    %c0_150 = arith.constant 0 : index
    %c0_151 = arith.constant 0 : index
    %172 = vector.load %arg12[%c0_150, %c0_151] : memref<8x72xf32, #tpu.memory_space<vmem>>, vector<8x72xf32>
    %cst_152 = arith.constant dense<0.000000e+00> : vector<8x256xf32>
    %173 = tpu.matmul %172, %171, %cst_152 {dimension_numbers = #tpu.dot_dimension_numbers<[1], [0], [0], [1], [0, 0, 1, 1], [], []>} : vector<8x72xf32>, vector<72x256xf32>, vector<8x256xf32> -> vector<8x256xf32>
    %c0_153 = arith.constant 0 : index
    %c0_154 = arith.constant 0 : index
    %174 = vector.load %arg13[%c0_153, %c0_154] : memref<8x1xf32, #tpu.memory_space<vmem>>, vector<8x1xf32>
    %175 = vector.broadcast %174 : vector<8x1xf32> to vector<8x256xf32>
    %176 = arith.addf %173, %175 : vector<8x256xf32>
    %c0_155 = arith.constant 0 : index
    %c128_156 = arith.constant 128 : index
    %177 = vector.load %arg17[%c0_155, %c128_156] : memref<8x512xf32, #tpu.memory_space<vmem>>, vector<8x256xf32>
    tpu.vector_store %arg17[%c0_155, %c128_156], %176 {strides = array<i32>} : memref<8x512xf32, #tpu.memory_space<vmem>>, vector<8x256xf32>,
    %c0_157 = arith.constant 0 : index
    %c111_158 = arith.constant 111 : index
    %178 = vector.load %arg17[%c0_157, %c111_158] : memref<8x512xf32, #tpu.memory_space<vmem>>, vector<8x256xf32>
    %179 = arith.mulf %178, %26 : vector<8x256xf32>
    %c0_159 = arith.constant 0 : index
    %c112_160 = arith.constant 112 : index
    %180 = vector.load %arg17[%c0_159, %c112_160] : memref<8x512xf32, #tpu.memory_space<vmem>>, vector<8x256xf32>
    %c0_161 = arith.constant 0 : index
    %c113_162 = arith.constant 113 : index
    %181 = vector.load %arg17[%c0_161, %c113_162] : memref<8x512xf32, #tpu.memory_space<vmem>>, vector<8x256xf32>
    %182 = arith.mulf %181, %32 : vector<8x256xf32>
    %c0_163 = arith.constant 0 : index
    %c127_164 = arith.constant 127 : index
    %183 = vector.load %arg17[%c0_163, %c127_164] : memref<8x512xf32, #tpu.memory_space<vmem>>, vector<8x256xf32>
    %184 = arith.mulf %183, %26 : vector<8x256xf32>
    %c0_165 = arith.constant 0 : index
    %c128_166 = arith.constant 128 : index
    %185 = vector.load %arg17[%c0_165, %c128_166] : memref<8x512xf32, #tpu.memory_space<vmem>>, vector<8x256xf32>
    %c0_167 = arith.constant 0 : index
    %c129_168 = arith.constant 129 : index
    %186 = vector.load %arg17[%c0_167, %c129_168] : memref<8x512xf32, #tpu.memory_space<vmem>>, vector<8x256xf32>
    %187 = arith.mulf %186, %32 : vector<8x256xf32>
    %c0_169 = arith.constant 0 : index
    %c143_170 = arith.constant 143 : index
    %188 = vector.load %arg17[%c0_169, %c143_170] : memref<8x512xf32, #tpu.memory_space<vmem>>, vector<8x256xf32>
    %189 = arith.mulf %188, %26 : vector<8x256xf32>
    %c0_171 = arith.constant 0 : index
    %c144_172 = arith.constant 144 : index
    %190 = vector.load %arg17[%c0_171, %c144_172] : memref<8x512xf32, #tpu.memory_space<vmem>>, vector<8x256xf32>
    %c0_173 = arith.constant 0 : index
    %c145_174 = arith.constant 145 : index
    %191 = vector.load %arg17[%c0_173, %c145_174] : memref<8x512xf32, #tpu.memory_space<vmem>>, vector<8x256xf32>
    %192 = arith.mulf %191, %32 : vector<8x256xf32>
    %193 = tpu.concatenate %179, %180, %182, %184, %185, %187, %189, %190, %192 in 0 : vector<8x256xf32>, vector<8x256xf32>, vector<8x256xf32>, vector<8x256xf32>, vector<8x256xf32>, vector<8x256xf32>, vector<8x256xf32>, vector<8x256xf32>, vector<8x256xf32> -> vector<72x256xf32>
    %c0_175 = arith.constant 0 : index
    %c0_176 = arith.constant 0 : index
    %194 = vector.load %arg14[%c0_175, %c0_176] : memref<10x72xf32, #tpu.memory_space<vmem>>, vector<10x72xf32>
    %cst_177 = arith.constant dense<0.000000e+00> : vector<10x256xf32>
    %195 = tpu.matmul %194, %193, %cst_177 {dimension_numbers = #tpu.dot_dimension_numbers<[1], [0], [0], [1], [0, 0, 1, 1], [], []>} : vector<10x72xf32>, vector<72x256xf32>, vector<10x256xf32> -> vector<10x256xf32>
    %c0_178 = arith.constant 0 : index
    %c0_179 = arith.constant 0 : index
    %196 = vector.load %arg15[%c0_178, %c0_179] : memref<10x1xf32, #tpu.memory_space<vmem>>, vector<10x1xf32>
    %197 = vector.broadcast %196 : vector<10x1xf32> to vector<10x256xf32>
    %198 = arith.addf %195, %197 : vector<10x256xf32>
    %cst_180 = arith.constant dense<0xFF800000> : vector<256xf32>
    %199 = vector.multi_reduction <maximumf>, %198, %cst_180 [0] : vector<10x256xf32> to vector<256xf32>
    %200 = vector.shape_cast %199 : vector<256xf32> to vector<1x256xf32>
    %201 = vector.broadcast %200 : vector<1x256xf32> to vector<10x256xf32>
    %202 = arith.subf %198, %201 : vector<10x256xf32>
    %203 = math.exp %202 : vector<10x256xf32>
    %cst_181 = arith.constant dense<0.000000e+00> : vector<256xf32>
    %204 = vector.multi_reduction <add>, %203, %cst_181 [0] : vector<10x256xf32> to vector<256xf32>
    %205 = vector.shape_cast %204 : vector<256xf32> to vector<1x256xf32>
    %206 = tpu.reciprocal %205 : vector<1x256xf32> -> vector<1x256xf32>
    %207 = vector.broadcast %206 : vector<1x256xf32> to vector<10x256xf32>
    %208 = arith.mulf %203, %207 : vector<10x256xf32>
    %c0_182 = arith.constant 0 : index
    %c0_183 = arith.constant 0 : index
    %c0_184 = arith.constant 0 : index
    %209 = vector.load %arg16[%c0_182, %c0_183, %c0_184] : memref<1x10x256xf32, #tpu.memory_space<vmem>>, vector<1x10x256xf32>
    %210 = vector.shape_cast %209 : vector<1x10x256xf32> to vector<10x256xf32>
    %211 = vector.shape_cast %208 : vector<10x256xf32> to vector<1x10x256xf32>
    tpu.vector_store %arg16[%c0_182, %c0_183, %c0_184], %211 {strides = array<i32>} : memref<1x10x256xf32, #tpu.memory_space<vmem>>, vector<1x10x256xf32>,
    return
  }
  func.func @transform_0(%arg0: i32) -> (i32, i32, i32) {
    %c0_i32 = arith.constant 0 : i32
    %c0_i32_0 = arith.constant 0 : i32
    %c0_i32_1 = arith.constant 0 : i32
    return %arg0, %c0_i32, %c0_i32_0 : i32, i32, i32
  }
  func.func @transform_1(%arg0: i32) -> (i32, i32) {
    %c0_i32 = arith.constant 0 : i32
    %c0_i32_0 = arith.constant 0 : i32
    %c0_i32_1 = arith.constant 0 : i32
    return %c0_i32, %c0_i32_0 : i32, i32
  }
  func.func @transform_2(%arg0: i32) -> (i32, i32) {
    %c0_i32 = arith.constant 0 : i32
    %c0_i32_0 = arith.constant 0 : i32
    %c0_i32_1 = arith.constant 0 : i32
    return %c0_i32, %c0_i32_0 : i32, i32
  }
  func.func @transform_3(%arg0: i32) -> (i32, i32) {
    %c0_i32 = arith.constant 0 : i32
    %c0_i32_0 = arith.constant 0 : i32
    %c0_i32_1 = arith.constant 0 : i32
    return %c0_i32, %c0_i32_0 : i32, i32
  }
  func.func @transform_4(%arg0: i32) -> (i32, i32) {
    %c0_i32 = arith.constant 0 : i32
    %c0_i32_0 = arith.constant 0 : i32
    %c0_i32_1 = arith.constant 0 : i32
    return %c0_i32, %c0_i32_0 : i32, i32
  }
  func.func @transform_5(%arg0: i32) -> (i32, i32) {
    %c0_i32 = arith.constant 0 : i32
    %c0_i32_0 = arith.constant 0 : i32
    %c0_i32_1 = arith.constant 0 : i32
    return %c0_i32, %c0_i32_0 : i32, i32
  }
  func.func @transform_6(%arg0: i32) -> (i32, i32) {
    %c0_i32 = arith.constant 0 : i32
    %c0_i32_0 = arith.constant 0 : i32
    %c0_i32_1 = arith.constant 0 : i32
    return %c0_i32, %c0_i32_0 : i32, i32
  }
  func.func @transform_7(%arg0: i32) -> (i32, i32) {
    %c0_i32 = arith.constant 0 : i32
    %c0_i32_0 = arith.constant 0 : i32
    %c0_i32_1 = arith.constant 0 : i32
    return %c0_i32, %c0_i32_0 : i32, i32
  }
  func.func @transform_8(%arg0: i32) -> (i32, i32) {
    %c0_i32 = arith.constant 0 : i32
    %c0_i32_0 = arith.constant 0 : i32
    %c0_i32_1 = arith.constant 0 : i32
    return %c0_i32, %c0_i32_0 : i32, i32
  }
  func.func @transform_9(%arg0: i32) -> (i32, i32) {
    %c0_i32 = arith.constant 0 : i32
    %c0_i32_0 = arith.constant 0 : i32
    %c0_i32_1 = arith.constant 0 : i32
    return %c0_i32, %c0_i32_0 : i32, i32
  }
  func.func @transform_10(%arg0: i32) -> (i32, i32) {
    %c0_i32 = arith.constant 0 : i32
    %c0_i32_0 = arith.constant 0 : i32
    %c0_i32_1 = arith.constant 0 : i32
    return %c0_i32, %c0_i32_0 : i32, i32
  }
  func.func @transform_11(%arg0: i32) -> (i32, i32) {
    %c0_i32 = arith.constant 0 : i32
    %c0_i32_0 = arith.constant 0 : i32
    %c0_i32_1 = arith.constant 0 : i32
    return %c0_i32, %c0_i32_0 : i32, i32
  }
  func.func @transform_12(%arg0: i32) -> (i32, i32) {
    %c0_i32 = arith.constant 0 : i32
    %c0_i32_0 = arith.constant 0 : i32
    %c0_i32_1 = arith.constant 0 : i32
    return %c0_i32, %c0_i32_0 : i32, i32
  }
  func.func @transform_13(%arg0: i32) -> (i32, i32) {
    %c0_i32 = arith.constant 0 : i32
    %c0_i32_0 = arith.constant 0 : i32
    %c0_i32_1 = arith.constant 0 : i32
    return %c0_i32, %c0_i32_0 : i32, i32
  }
  func.func @transform_14(%arg0: i32) -> (i32, i32) {
    %c0_i32 = arith.constant 0 : i32
    %c0_i32_0 = arith.constant 0 : i32
    %c0_i32_1 = arith.constant 0 : i32
    return %c0_i32, %c0_i32_0 : i32, i32
  }
  func.func @transform_15(%arg0: i32) -> (i32, i32, i32) {
    %c0_i32 = arith.constant 0 : i32
    %c0_i32_0 = arith.constant 0 : i32
    %c0_i32_1 = arith.constant 0 : i32
    return %arg0, %c0_i32, %c0_i32_0 : i32, i32, i32
  }
}

</mosaic_0001>

<bundles_post_ra>
// kernel: forward.1
= control target key start
LH: loop header
LB: loop body
LE: loop exit
PB: predicated region body
PF: predicated region fallthrough
CT: control target
= control target key end

     0   :  { %s3460_s18 = smov 0   ;;  %s4410_s0 = inlined_call_operand.vmem [shape: f32[2,8,256], index: 0, kind: input, shape index: {}]   ;;  %s4411_s1 = inlined_call_operand.vmem [shape: f32[8,72], index: 1, kind: input, shape index: {}]   ;;  %s4412_s2 = inlined_call_operand.vmem [shape: f32[8,1], index: 2, kind: input, shape index: {}]   ;;  %s4413_s3 = inlined_call_operand.vmem [shape: f32[8,72], index: 3, kind: input, shape index: {}]   ;;  %s4414_s4 = inlined_call_operand.vmem [shape: f32[8,1], index: 4, kind: input, shape index: {}]   ;;  %s4415_s5 = inlined_call_operand.vmem [shape: f32[8,72], index: 5, kind: input, shape index: {}]   ;;  %s4416_s6 = inlined_call_operand.vmem [shape: f32[8,1], index: 6, kind: input, shape index: {}]   ;;  %s4417_s7 = inlined_call_operand.vmem [shape: f32[8,72], index: 7, kind: input, shape index: {}]   ;;  %s4418_s8 = inlined_call_operand.vmem [shape: f32[8,1], index: 8, kind: input, shape index: {}]   ;;  %s4419_s9 = inlined_call_operand.vmem [shape: f32[8,72], index: 9, kind: input, shape index: {}]   ;;  %s4420_s10 = inlined_call_operand.vmem [shape: f32[8,1], index: 10, kind: input, shape index: {}]   ;;  %s4421_s11 = inlined_call_operand.vmem [shape: f32[8,72], index: 11, kind: input, shape index: {}]   ;;  %s4422_s12 = inlined_call_operand.vmem [shape: f32[8,1], index: 12, kind: input, shape index: {}]   ;;  %s4423_s13 = inlined_call_operand.vmem [shape: f32[10,72], index: 13, kind: input, shape index: {}]   ;;  %s4424_s14 = inlined_call_operand.vmem [shape: f32[10,1], index: 14, kind: input, shape index: {}]   ;;  %s4425_s15 = inlined_call_operand.vmem [shape: f32[2,10,256], index: 15, kind: output, shape index: {}]  }
   0x1 LB: > { %s2524_s19 = sadd.s32 4294967295, %s3364_s18   ;;  %p2528_p0 = scmp.ge.s32.totalorder %s3364_s18, 1  ;;  %s3364_s18 = sphi %s3460_s18, %s25_s18  }
   0x2   : > { %p437_p1 = scmp.lt.s32.totalorder %s3364_s18, 3 }
   0x4   : > { %p438_p2 = pnand %p2528_p0, %p437_p1 }
   0x5   : > { %p485_p3 = scmp.lt.s32.totalorder (!%p438_p2), %s2524_s19, 1  ;;  %s3367_s20 = smov (!%p438_p2), 17  }
   0x6   : > { %441 = sbr.rel (%p438_p2) target bundleno = 3216 (0xc90), region = 80  ;;  %s3368_s21 = smov (!%p438_p2), 1  }
   0x7   : > { %s3369_s22 = smov (!%p438_p2), 113   ;;  %s3370_s27 = smov (!%p438_p2), 15  }
   0x8   : > { %s3371_s28 = smov (!%p438_p2), 127   ;;  %s3372_s29 = smov (!%p438_p2), 95  }
   0x9   : > { %s3373_s30 = smov (!%p438_p2), 111   ;;  %s3374_s16 = smov (!%p438_p2), 94  }
   0xa   : > { %s3375_s17 = smov (!%p438_p2), 110  }
   0xb   : > { %v497_v0 = vlaneseq  ;;  %v3366_v5 = vmov 0.0   ;;  %s4427_s19 = smov (!%p485_p3, %s2524_s19), 1  ;;  %vm614_vm4 = vcmask 138240   ;;  %vm563_vm5 = vcmask 924672  }
   0xc   : > { %s2555_s23 = sshll.u32 %s4427_s19, 4  ;;  %vm602_vm6 = vcmask 121856   ;;  %vm590_vm7 = vcmask 7168   ;;  %vm575_vm8 = vcmask 1039360   ;;  %vm549_vm9 = vcmask 908288  }
   0xd   : > { %v498_v1 = vand.u32 127, %v497_v0  ;;  %s489_s26 = scalar_lea.vmem %s4410_s0, %s2555_s23  ;;  %s3378_s23 = smov 112   ;;  %vm695_vm10 = vcmask 777216   ;;  %vm707_vm11 = vcmask 769024   ;;  %vm671_vm12 = vcmask 900096  }
   0xe   : > { %v3484_v12 = vld [vmem:[%s489_s26] sm:$0xff]  ;;  %v3486_v13 = vld [vmem:[%s489_s26 + $0x8] sm:$0xff]  ;;  %vm683_vm13 = vcmask 785408   ;;  %vm642_vm14 = vcmask 1031168   ;;  %vm654_vm15 = vcmask 916480  }
   0xf   : > { %v499_v2 = vadd.s32 128, %v498_v1  ;;  %v504_v3 = vand.u32 15, %v498_v1  ;;  %v2599_v14 = vpack.i.bf16 %v3486_v13, %v3484_v12  ;;  %v2644_v55 = vpack.i.bf16 %v3484_v12, %v3366_v5 }
  0x11   : > { %v511_v4 = vand.u32 15, %v499_v2  ;;  %vm530_vm0 = vcmp.ne.s32.totalorder %v504_v3, 15  ;;  %vm524_vm2 = vcmp.ne.s32.totalorder %v504_v3, 0 }
  0x12   : > { %v2535_v6 = vsel %vm530_vm0, 1.0, %v3366_v5  ;;  %v2533_v9 = vsel %vm524_vm2, 1.0, %v3366_v5  ;;  %vm810_vm0 = vcmask 588800  }
  0x13   : > { %vm531_vm1 = vcmp.ne.s32.totalorder %v511_v4, 15  ;;  %vm525_vm3 = vcmp.ne.s32.totalorder %v511_v4, 0 }
  0x14   : > { %v2536_v7 = vsel %vm531_vm1, 1.0, %v3366_v5  ;;  %v2534_v10 = vsel %vm525_vm3, 1.0, %v3366_v5  ;;  %vm2388_vm1 = vcmask 1041408  }
  0x15   : > { %v2579_v8 = vpack.i.bf16 %v2536_v7, %v2535_v6  ;;  %v3476_v11 = vpack.i.bf16 %v2534_v10, %v2533_v9 }
  0x17   : > { %2580 = vrot.lane.b32.xlu0 %v2579_v8, %s3367_s20  ;;  %2590 = vrot.lane.b32.xlu1 %v2579_v8, %s3368_s21  ;;  %s3376_s21 = smov 96  }
  0x18   : > { %2605 = vrot.lane.b32.xlu2 %v2579_v8, %s3369_s22  ;;  %s3377_s22 = smov 126  }
  0x1f   : > { %2585 = vrot.lane.b32.xlu0 %v3476_v11, %s3370_s27  ;;  %2595 = vrot.lane.b32.xlu1 %v3476_v11, %s3371_s28 }
  0x20   : > { %693 = vrot.lane.b32.xlu2 %v3366_v5, %s3372_s29 }
  0x27   : > { %2600 = vrot.lane.b32.xlu1 %v2599_v14, %s3372_s29 }
  0x2f   : > { %2610 = vrot.lane.b32.xlu1 %v2599_v14, %s3373_s30 }
  0x72   : > { %v2606_v21 = vpop.permute.xlu2 %2605 }
  0x73   : > { %v3508_v26 = vunpack.i.h.bf16 %v2606_v21  ;;  %v2607_v27 = vunpack.i.l.bf16 %v2606_v21  ;;  %v3379_v21 = vmov 0  }
  0x74   : > { %2714 = vset.pattern.permute.xlu2 %v3379_v21  ;;  %3345 = vset.pattern.permute.xlu0 %v3379_v21 }
  0x75   : > { %v3518_v33 = vsel %vm563_vm5, %v2607_v27, %v3508_v26  ;;  %v570_v36 = vmul.f32 %v3508_v26, %v3486_v13  ;;  %v3530_v38 = vmul.f32 0.0, %v2607_v27 }
  0x76   : > { %v569_v39 = vmul.f32 %v3518_v33, %v3484_v12 }
  0x78   : > { %v2639_v45 = vpack.i.bf16 %v569_v39, %v3530_v38 }
  0x7a   : > { %v694_v63 = vpop.permute.xlu2 %693 }
  0x89   : > { %v2581_v15 = vpop.permute.xlu0 %2580  ;;  %v2591_v18 = vpop.permute.xlu1 %2590 }
  0x8a   : > { %v2583_v16 = vunpack.i.h.bf16 %v2581_v15  ;;  %v3494_v17 = vunpack.i.l.bf16 %v2581_v15  ;;  %v2593_v24 = vunpack.i.h.bf16 %v2591_v18  ;;  %v3513_v30 = vunpack.i.l.bf16 %v2591_v18 }
  0x8c   : > { %v3496_v19 = vmul.f32 0.0, %v2583_v16  ;;  %v3500_v20 = vsel %vm614_vm4, %v3494_v17, %v2583_v16  ;;  %v619_v22 = vmul.f32 %v3494_v17, %v3484_v12  ;;  %v3511_v29 = vmul.f32 0.0, %v2593_v24 }
  0x8d   : > { %v620_v23 = vmul.f32 %v3500_v20, %v3486_v13  ;;  %v3528_v37 = vsel %vm590_vm7, %v3513_v30, %v2593_v24  ;;  %v595_v43 = vmul.f32 %v3513_v30, %v3484_v12 }
  0x8e   : > { %705 = vrot.lane.b32.xlu0 %v3496_v19, %s3374_s16  ;;  %v596_v44 = vmul.f32 %v3528_v37, %v3486_v13 }
  0x8f   : > { %v2614_v25 = vpack.i.bf16 %v620_v23, %v619_v22 }
  0x90   : > { %v2629_v49 = vpack.i.bf16 %v596_v44, %v595_v43 }
  0x91   : > { %v2586_v28 = vpop.permute.xlu0 %2585  ;;  %2615 = vrot.lane.b32.xlu2 %v2614_v25, %s3374_s16  ;;  %v2596_v40 = vpop.permute.xlu1 %2595 }
  0x92   : > { %v2588_v31 = vunpack.i.h.bf16 %v2586_v28  ;;  %v3515_v32 = vunpack.i.l.bf16 %v2586_v28  ;;  %v3548_v46 = vunpack.i.h.bf16 %v2596_v40  ;;  %v2597_v47 = vunpack.i.l.bf16 %v2596_v40 }
  0x94   : > { %v3520_v34 = vmul.f32 0.0, %v2588_v31  ;;  %v3523_v35 = vsel %vm602_vm6, %v3515_v32, %v2588_v31  ;;  %v607_v41 = vmul.f32 %v3515_v32, %v3484_v12  ;;  %v3554_v50 = vsel %vm575_vm8, %v2597_v47, %v3548_v46 }
  0x95   : > { %v608_v42 = vmul.f32 %v3523_v35, %v3486_v13  ;;  %v3558_v52 = vmul.f32 0.0, %v2597_v47  ;;  %v581_v53 = vmul.f32 %v3554_v50, %v3484_v12  ;;  %v582_v54 = vmul.f32 %v3548_v46, %v3486_v13 }
  0x96   : > { %669 = vrot.lane.b32.xlu0 %v3511_v29, %s3375_s17  ;;  %681 = vrot.lane.b32.xlu1 %v3520_v34, %s3376_s21 }
  0x97   : > { %v2619_v48 = vpack.i.bf16 %v608_v42, %v607_v41  ;;  %v2634_v56 = vpack.i.bf16 %v581_v53, %v3558_v52 }
  0x99   : > { %640 = vrot.lane.b32.xlu2 %v570_v36, %s3377_s22  ;;  %v3556_v51 = vpop.permute.xlu1 %2600 }
  0x9a   : > { %v2603_v60 = vunpack.i.h.bf16 %v3556_v51  ;;  %v2602_v61 = vunpack.i.l.bf16 %v3556_v51 }
  0x9c   : > { %v696_v0 = vsel %vm695_vm10, %v2602_v61, %v2603_v60  ;;  %v697_v1 = vsel %vm695_vm10, %v2603_v60, %v694_v63 }
  0x9d   : > { %v2649_v3 = vpack.i.bf16 %v697_v1, %v696_v0 }
  0x9e   : > { %2620 = vrot.lane.b32.xlu0 %v2619_v48, %s3376_s21  ;;  %2640 = vrot.lane.b32.xlu1 %v2639_v45, %s3377_s22 }
  0xa1   : > { %2630 = vrot.lane.b32.xlu2 %v2629_v49, %s3375_s17  ;;  %v3570_v57 = vpop.permute.xlu1 %2610 }
  0xa2   : > { %v2613_v58 = vunpack.i.h.bf16 %v3570_v57  ;;  %v2612_v59 = vunpack.i.l.bf16 %v3570_v57 }
  0xa4   : > { %v661_v62 = vsel %vm549_vm9, %v2612_v59, %v2613_v58 }
  0xa5   : > { %v2654_v2 = vpack.i.bf16 %v661_v62, %v2612_v59 }
  0xa6   : > { %652 = vrot.lane.b32.xlu0 %v582_v54, %s3378_s23  ;;  %2645 = vrot.lane.b32.xlu1 %v2644_v55, %s3371_s28 }
  0xa9   : > { %2635 = vrot.lane.b32.xlu2 %v2634_v56, %s3378_s23 }
  0xae   : > { %2625 = vrot.lane.b32.xlu0 %v3476_v11, %s3373_s30 }
  0xb1   : > { %629 = vrot.lane.b32.xlu2 %v3486_v13, %s3371_s28 }
  0xb6   : > { %2655 = vrot.lane.b32.xlu0 %v2654_v2, %s3367_s20 }
  0xb9   : > { %2650 = vrot.lane.b32.xlu2 %v2649_v3, %s3367_s20 }
  0xeb   : > { %v2616_v4 = vpop.permute.xlu2 %2615 }
  0xec   : > { %v2618_v6 = vunpack.i.h.bf16 %v2616_v4  ;;  %v2617_v7 = vunpack.i.l.bf16 %v2616_v4 }
  0xee   : > { %v708_v8 = vsel %vm707_vm11, %v2617_v7, %v2618_v6 }
  0xef   : > { %v2664_v9 = vpack.i.bf16 %v708_v8, %v2617_v7 }
  0xf1   : > { %2665 = vrot.lane.b32.xlu0 %v2664_v9, %s3367_s20 }
  0xf3   : > { %v641_v10 = vpop.permute.xlu2 %640 }
  0xfb   : > { %v2631_v14 = vpop.permute.xlu2 %2630 }
  0xfc   : > { %v2633_v15 = vunpack.i.h.bf16 %v2631_v14  ;;  %v2632_v16 = vunpack.i.l.bf16 %v2631_v14 }
  0xfe   : > { %v672_v18 = vsel %vm671_vm12, %v2632_v16, %v2633_v15 }
 0x100   : > { %v706_v11 = vpop.permute.xlu0 %705 }
 0x101   : > { %v709_v2 = vsel %vm707_vm11, %v2618_v6, %v706_v11  ;;  %v711_v11 = vld [vmem:[%s4412_s2] sm:$0xff] }
 0x103   : > { %v2636_v40 = vpop.permute.xlu2 %2635 }
 0x104   : > { %v2638_v44 = vunpack.i.h.bf16 %v2636_v40 }
 0x108   : > { %v670_v22 = vpop.permute.xlu0 %669  ;;  %v682_v23 = vpop.permute.xlu1 %681 }
 0x109   : > { %v673_v24 = vsel %vm671_vm12, %v2633_v15, %v670_v22 }
 0x10a   : > { %v2684_v25 = vpack.i.bf16 %v673_v24, %v672_v18 }
 0x10b   : > { %v630_v60 = vpop.permute.xlu2 %629 }
 0x10c   : > { %2685 = vrot.lane.b32.xlu2 %v2684_v25, %s3367_s20 }
 0x110   : > { %v2621_v27 = vpop.permute.xlu0 %2620  ;;  %v2641_v28 = vpop.permute.xlu1 %2640 }
 0x111   : > { %v2623_v31 = vunpack.i.h.bf16 %v2621_v27  ;;  %v2622_v36 = vunpack.i.l.bf16 %v2621_v27  ;;  %v2643_v41 = vunpack.i.h.bf16 %v2641_v28  ;;  %v2642_v42 = vunpack.i.l.bf16 %v2641_v28 }
 0x113   : > { %v684_v39 = vsel %vm683_vm13, %v2622_v36, %v2623_v31  ;;  %v643_v48 = vsel %vm642_vm14, %v2642_v42, %v2643_v41  ;;  %v644_v55 = vsel %vm642_vm14, %v2643_v41, %v641_v10  ;;  %v685_v15 = vsel %vm683_vm13, %v2623_v31, %v682_v23 }
 0x114   : > { %v2674_v43 = vpack.i.bf16 %v684_v39, %v2622_v36  ;;  %v2704_v63 = vpack.i.bf16 %v644_v55, %v643_v48  ;;  %v2679_v51 = vpack.i.bf16 %v2632_v16, %v685_v15 }
 0x116   : > { %2675 = vrot.lane.b32.xlu0 %v2674_v43, %s3367_s20 }
 0x118   : > { %v653_v45 = vpop.permute.xlu0 %652  ;;  %v2646_v47 = vpop.permute.xlu1 %2645 }
 0x119   : > { %v656_v49 = vsel %vm654_vm15, %v2638_v44, %v653_v45  ;;  %v2648_v53 = vunpack.i.h.bf16 %v2646_v47  ;;  %v2647_v54 = vunpack.i.l.bf16 %v2646_v47 }
 0x11a   : > { %v2694_v56 = vpack.i.bf16 %v653_v45, %v656_v49 }
 0x11b   : > { %v631_v59 = vsel %vm575_vm8, %v2647_v54, %v2648_v53  ;;  %v632_v0 = vsel %vm575_vm8, %v2648_v53, %v630_v60 }
 0x11c   : > { %2695 = vrot.lane.b32.xlu2 %v2694_v56, %s3367_s20  ;;  %v2659_v62 = vpack.i.bf16 %v631_v59, %v641_v10  ;;  %v2699_v7 = vpack.i.bf16 %v630_v60, %v632_v0  ;;  %v2669_v10 = vpack.i.bf16 %v2602_v61, %v709_v2  ;;  %v2637_v61 = vunpack.i.l.bf16 %v2636_v40 }
 0x11e   : > { %2660 = vrot.lane.b32.xlu1 %v2659_v62, %s3367_s20  ;;  %2705 = vrot.lane.b32.xlu0 %v2704_v63, %s3367_s20 }
 0x120   : > { %v2626_v1 = vpop.permute.xlu0 %2625 }
 0x121   : > { %v3606_v3 = vunpack.i.h.bf16 %v2626_v1  ;;  %v2627_v4 = vunpack.i.l.bf16 %v2626_v1 }
 0x123   : > { %v3610_v8 = vsel %vm549_vm9, %v2627_v4, %v3606_v3  ;;  %v3612_v9 = vmul.f32 0.0, %v2627_v4  ;;  %v556_v21 = vmul.f32 %v3606_v3, %v3486_v13 }
 0x124   : > { %2700 = vrot.lane.b32.xlu2 %v2699_v7, %s3367_s20  ;;  %v555_v14 = vmul.f32 %v3610_v8, %v3484_v12  ;;  %v655_v12 = vsel %vm654_vm15, %v2637_v61, %v2638_v44 }
 0x125   : > { %v2689_v18 = vpack.i.bf16 %v655_v12, %v2613_v58  ;;  %v2651_v58 = vpop.permute.xlu2 %2650 }
 0x126   : > { %2670 = vrot.lane.b32.xlu1 %v2669_v10, %s3367_s20  ;;  %v2709_v6 = vpack.i.bf16 %v555_v14, %v3612_v9  ;;  %v2653_v13 = vunpack.i.h.bf16 %v2651_v58  ;;  %v2652_v31 = vunpack.i.l.bf16 %v2651_v58 }
 0x128   : > { %2710 = vrot.lane.b32.xlu0 %v2709_v6, %s3367_s20  ;;  %v2656_v16 = vpop.permute.xlu0 %2655  ;;  %v789_v47 = vsel %vm614_vm4, %v2652_v31, %v2653_v13 }
 0x129   : > { %v2658_v49 = vunpack.i.h.bf16 %v2656_v16  ;;  %v2657_v53 = vunpack.i.l.bf16 %v2656_v16 }
 0x12b   : > { %v782_v1 = vsel %vm614_vm4, %v2657_v53, %v2658_v49 }
 0x12c   : > { %714 = vperm.xlu2 %2714, %v711_v11  }
 0x12e   : > { %2680 = vrot.lane.b32.xlu1 %v2679_v51, %s3367_s20 }
 0x130   : > { %947 = vrot.lane.b32.xlu0 %v3366_v5, %s3372_s29 }
 0x134   : > { %936 = vrot.lane.b32.xlu2 %v3520_v34, %s3376_s21 }
 0x136   : > { %2690 = vrot.lane.b32.xlu1 %v2689_v18, %s3367_s20 }
 0x13e   : > { %724 = vrot.lane.b32.xlu1 %v556_v21, %s3367_s20 }
 0x146   : > { %958 = vrot.lane.b32.xlu1 %v3496_v19, %s3374_s16 }
 0x14e   : > { %925 = vrot.lane.b32.xlu1 %v3511_v29, %s3375_s17 }
 0x163   : > { %v2666_v22 = vpop.permute.xlu0 %2665 }
 0x164   : > { %v2668_v23 = vunpack.i.h.bf16 %v2666_v22  ;;  %v2667_v24 = vunpack.i.l.bf16 %v2666_v22 }
 0x166   : > { %v790_v57 = vsel %vm614_vm4, %v2667_v24, %v2668_v23  ;;  %v2686_v28 = vpop.permute.xlu2 %2685 }
 0x167   : > { %821 = vmatpush.msra.mxu2 %v790_v57  ;;  %v2688_v56 = vunpack.i.h.bf16 %v2686_v28  ;;  %v2687_v59 = vunpack.i.l.bf16 %v2686_v28 }
 0x169   : > { %v785_v2 = vsel %vm614_vm4, %v2687_v59, %v2688_v56 }
 0x176   : > { %v2696_v48 = vpop.permute.xlu2 %2695 }
 0x177   : > { %v2698_v4 = vunpack.i.h.bf16 %v2696_v48  ;;  %v2697_v7 = vunpack.i.l.bf16 %v2696_v48 }
 0x179   : > { %v781_v58 = vsel %vm614_vm4, %v2697_v7, %v2698_v4 }
 0x17e   : > { %v2701_v61 = vpop.permute.xlu2 %2700 }
 0x17f   : > { %v2703_v24 = vunpack.i.h.bf16 %v2701_v61  ;;  %v2702_v57 = vunpack.i.l.bf16 %v2701_v61 }
 0x188   : > { %v2676_v27 = vpop.permute.xlu0 %2675 }
 0x189   : > { %v2678_v39 = vunpack.i.h.bf16 %v2676_v27  ;;  %v2677_v40 = vunpack.i.l.bf16 %v2676_v27 }
 0x18b   : > { %v786_v45 = vsel %vm614_vm4, %v2677_v40, %v2678_v39 }
 0x190   : > { %v2661_v25 = vpop.permute.xlu1 %2660  ;;  %v2706_v54 = vpop.permute.xlu0 %2705 }
 0x191   : > { %v2708_v6 = vunpack.i.h.bf16 %v2706_v54  ;;  %v2707_v11 = vunpack.i.l.bf16 %v2706_v54  ;;  %v2663_v12 = vunpack.i.h.bf16 %v2661_v25  ;;  %v2662_v18 = vunpack.i.l.bf16 %v2661_v25 }
 0x193   : > { %v778_v27 = vsel %vm614_vm4, %v2707_v11, %v2708_v6  ;;  %v776_v28 = vsel %vm614_vm4, %v2663_v12, %v2702_v57  ;;  %v779_v25 = vsel %vm614_vm4, %v2708_v6, %v2662_v18 }
 0x198   : > { %v2671_v36 = vpop.permute.xlu1 %2670 }
 0x199   : > { %v2673_v41 = vunpack.i.h.bf16 %v2671_v36  ;;  %v2672_v42 = vunpack.i.l.bf16 %v2671_v36  ;;  %v710_v36 = vld [vmem:[%s4411_s1] sm:$0xff] }
 0x19a   : > { %v2711_v14 = vpop.permute.xlu0 %2710 }
 0x19b   : > { %v788_v43 = vsel %vm614_vm4, %v2673_v41, %v2652_v31  ;;  %v791_v44 = vsel %vm614_vm4, %v2668_v23, %v2672_v42  ;;  %v2713_v22 = vunpack.i.h.bf16 %v2711_v14  ;;  %v2712_v23 = vunpack.i.l.bf16 %v2711_v14  ;;  %v715_v41 = vpop.permute.xlu2 %714 }
 0x19c   : > { %822 = vmatpush.msra.mxu2 %v788_v43  ;;  %841 = vmatpush.msra.mxu3 %v791_v44 }
 0x19d   : > { %v774_v13 = vsel %vm614_vm4, %v2712_v23, %v2713_v22 }
 0x19e   : > { %823 = vmatpush.msra.mxu2 %v786_v45  ;;  %842 = vmatpush.msra.mxu3 %v789_v47 }
 0x1a0   : > { %v2681_v55 = vpop.permute.xlu1 %2680 }
 0x1a1   : > { %v2683_v60 = vunpack.i.h.bf16 %v2681_v55  ;;  %v2682_v62 = vunpack.i.l.bf16 %v2681_v55 }
 0x1a2   : > { %v948_v11 = vpop.permute.xlu0 %947 }
 0x1a3   : > { %v784_v63 = vsel %vm614_vm4, %v2683_v60, %v2687_v59  ;;  %v787_v0 = vsel %vm614_vm4, %v2678_v39, %v2682_v62  ;;  %v777_v39 = vsel %vm614_vm4, %v2702_v57, %v2703_v24  ;;  %v3707_v14 = vpop.permute.xlu2 %936 }
 0x1a4   : > { %824 = vmatpush.msra.mxu2 %v784_v63  ;;  %843 = vmatpush.msra.mxu3 %v787_v0 }
 0x1a6   : > { %825 = vmatpush.msra.mxu2 %v782_v1  ;;  %844 = vmatpush.msra.mxu3 %v785_v2 }
 0x1a8   : > { %v2691_v10 = vpop.permute.xlu1 %2690 }
 0x1a9   : > { %v2693_v15 = vunpack.i.h.bf16 %v2691_v10  ;;  %v2692_v51 = vunpack.i.l.bf16 %v2691_v10 }
 0x1ab   : > { %v780_v21 = vsel %vm614_vm4, %v2693_v15, %v2697_v7  ;;  %v783_v16 = vsel %vm614_vm4, %v2658_v49, %v2692_v51 }
 0x1ac   : > { %826 = vmatpush.msra.mxu2 %v780_v21  ;;  %845 = vmatpush.msra.mxu3 %v783_v16 }
 0x1ae   : > { %846 = vmatpush.msra.mxu3 %v781_v58  ;;  %827 = vmatpush.msra.mxu2 %v778_v27 }
 0x1b0   : > { %v725_v31 = vpop.permute.xlu1 %724  ;;  %828 = vmatpush.msra.mxu2 %v776_v28  ;;  %847 = vmatpush.msra.mxu3 %v779_v25 }
 0x1b1   : > { %v775_v40 = vsel %vm614_vm4, %v2713_v22, %v725_v31 }
 0x1b2   : > { %829 = vmatpush.msra.mxu2 %v774_v13  ;;  %848 = vmatpush.msra.mxu3 %v777_v39 }
 0x1b3   : > { %2537 = vmatmul.msk.f32.vlgmr.msra.gmra.mxu2 %vm810_vm0, %v710_v36 }
 0x1b4   : > { %849 = vmatpush.msra.mxu3 %v775_v40 }
 0x1b5   : > { %2538 = vmatmul.msk.f32.vlgmr.msra.gmra.mxu3 %vm810_vm0, %v710_v36 }
 0x1b8   : > { %v959_v21 = vpop.permute.xlu1 %958 }
 0x1c0   : > { %v926_v58 = vpop.permute.xlu1 %925 }
 0x236   : > { %v831_v42 = vpop.f32.mrf.mxu2 }
 0x237   : > { %v3665_v43 = vadd.f32 %v831_v42, %v715_v41 }
 0x238   : > { %v851_v44 = vpop.f32.mrf.mxu3 }
 0x239   : > { %v3667_v45 = vadd.f32 %v851_v44, %v715_v41  ;;  %v877_v47 = vmul.f32 %v3494_v17, %v3665_v43  ;;  %v874_v53 = vmul.f32 %v3515_v32, %v3665_v43  ;;  %v871_v60 = vmul.f32 %v3513_v30, %v3665_v43 }
 0x23a   : > { %v863_v0 = vmul.f32 %v3665_v43, %v3518_v33  ;;  %v866_v1 = vmul.f32 %v3665_v43, %v3554_v50  ;;  %v2750_v4 = vpack.i.bf16 %v3665_v43, %v3366_v5 }
 0x23b   : > { %v2715_v48 = vpack.i.bf16 %v3667_v45, %v3665_v43  ;;  %v878_v49 = vmul.f32 %v3667_v45, %v3500_v20  ;;  %v875_v54 = vmul.f32 %v3667_v45, %v3523_v35  ;;  %v872_v59 = vmul.f32 %v3667_v45, %v3528_v37 }
 0x23c   : > { %v867_v62 = vmul.f32 %v3548_v46, %v3667_v45  ;;  %v2745_v2 = vpack.i.bf16 %v863_v0, %v3530_v38  ;;  %v2740_v7 = vpack.i.bf16 %v866_v1, %v3558_v52  ;;  %v864_v10 = vmul.f32 %v3508_v26, %v3667_v45 }
 0x23d   : > { %2716 = vrot.lane.b32.xlu2 %v2715_v48, %s3372_s29  ;;  %v2725_v55 = vpack.i.bf16 %v878_v49, %v877_v47  ;;  %v2730_v56 = vpack.i.bf16 %v875_v54, %v874_v53  ;;  %v2735_v63 = vpack.i.bf16 %v872_v59, %v871_v60 }
 0x23f   : > { %2726 = vrot.lane.b32.xlu0 %v2725_v55, %s3374_s16  ;;  %2731 = vrot.lane.b32.xlu1 %v2730_v56, %s3376_s21 }
 0x245   : > { %2721 = vrot.lane.b32.xlu2 %v2715_v48, %s3373_s30 }
 0x247   : > { %909 = vrot.lane.b32.xlu1 %v867_v62, %s3378_s23  ;;  %2736 = vrot.lane.b32.xlu0 %v2735_v63, %s3375_s17 }
 0x24d   : > { %2746 = vrot.lane.b32.xlu2 %v2745_v2, %s3377_s22 }
 0x24f   : > { %2751 = vrot.lane.b32.xlu1 %v2750_v4, %s3371_s28  ;;  %2741 = vrot.lane.b32.xlu0 %v2740_v7, %s3378_s23 }
 0x255   : > { %887 = vrot.lane.b32.xlu2 %v3667_v45, %s3371_s28 }
 0x257   : > { %898 = vrot.lane.b32.xlu0 %v864_v10, %s3377_s22 }
 0x297   : > { %v2717_v6 = vpop.permute.xlu2 %2716 }
 0x298   : > { %v2719_v15 = vunpack.i.h.bf16 %v2717_v6  ;;  %v2718_v51 = vunpack.i.l.bf16 %v2717_v6 }
 0x29a   : > { %v949_v61 = vsel %vm695_vm10, %v2718_v51, %v2719_v15  ;;  %v950_v12 = vsel %vm695_vm10, %v2719_v15, %v948_v11 }
 0x29b   : > { %v2755_v18 = vpack.i.bf16 %v950_v12, %v949_v61 }
 0x29d   : > { %2756 = vrot.lane.b32.xlu2 %v2755_v18, %s3367_s20 }
 0x29f   : > { %v3712_v16 = vpop.permute.xlu2 %2721 }
 0x2a0   : > { %v2724_v22 = vunpack.i.h.bf16 %v3712_v16  ;;  %v2723_v23 = vunpack.i.l.bf16 %v3712_v16 }
 0x2a2   : > { %v917_v24 = vsel %vm549_vm9, %v2723_v23, %v2724_v22 }
 0x2a3   : > { %v2760_v57 = vpack.i.bf16 %v917_v24, %v2723_v23 }
 0x2a5   : > { %2761 = vrot.lane.b32.xlu0 %v2760_v57, %s3367_s20 }
 0x2a7   : > { %v2747_v56 = vpop.permute.xlu2 %2746 }
 0x2a8   : > { %v2749_v4 = vunpack.i.h.bf16 %v2747_v56  ;;  %v2748_v7 = vunpack.i.l.bf16 %v2747_v56 }
 0x2aa   : > { %v900_v12 = vsel %vm642_vm14, %v2748_v7, %v2749_v4 }
 0x2af   : > { %v888_v10 = vpop.permute.xlu2 %887 }
 0x2b1   : > { %v2727_v27 = vpop.permute.xlu0 %2726  ;;  %v2732_v28 = vpop.permute.xlu1 %2731 }
 0x2b2   : > { %v2729_v25 = vunpack.i.h.bf16 %v2727_v27  ;;  %v2728_v13 = vunpack.i.l.bf16 %v2727_v27  ;;  %v2734_v39 = vunpack.i.h.bf16 %v2732_v28  ;;  %v2733_v40 = vunpack.i.l.bf16 %v2732_v28 }
 0x2b4   : > { %v960_v31 = vsel %vm707_vm11, %v2728_v13, %v2729_v25  ;;  %v938_v48 = vsel %vm683_vm13, %v2733_v40, %v2734_v39  ;;  %v961_v57 = vsel %vm707_vm11, %v2729_v25, %v959_v21 }
 0x2b5   : > { %v2770_v36 = vpack.i.bf16 %v960_v31, %v2728_v13  ;;  %v2780_v54 = vpack.i.bf16 %v938_v48, %v2733_v40  ;;  %v2775_v27 = vpack.i.bf16 %v2718_v51, %v961_v57  ;;  %v963_v13 = vld [vmem:[%s4414_s4] sm:$0xff]  ;;  %v939_v31 = vsel %vm683_vm13, %v2734_v39, %v3707_v14 }
 0x2b6   : > { %v861_v14 = vmul.f32 %v3606_v3, %v3667_v45 }
 0x2b7   : > { %2771 = vrot.lane.b32.xlu0 %v2770_v36, %s3367_s20 }
 0x2b9   : > { %v910_v41 = vpop.permute.xlu1 %909  ;;  %v2737_v42 = vpop.permute.xlu0 %2736 }
 0x2ba   : > { %v2739_v44 = vunpack.i.h.bf16 %v2737_v42  ;;  %v2738_v47 = vunpack.i.l.bf16 %v2737_v42 }
 0x2bc   : > { %v927_v49 = vsel %vm671_vm12, %v2738_v47, %v2739_v44  ;;  %v928_v53 = vsel %vm671_vm12, %v2739_v44, %v926_v58  ;;  %v860_v58 = vmul.f32 %v3665_v43, %v3610_v8  ;;  %v2785_v36 = vpack.i.bf16 %v2738_v47, %v939_v31 }
 0x2bd   : > { %v2790_v55 = vpack.i.bf16 %v928_v53, %v927_v49 }
 0x2be   : > { %v2815_v28 = vpack.i.bf16 %v860_v58, %v3612_v9 }
 0x2bf   : > { %2781 = vrot.lane.b32.xlu0 %v2780_v54, %s3367_s20  ;;  %2791 = vrot.lane.b32.xlu2 %v2790_v55, %s3367_s20 }
 0x2c1   : > { %v2742_v59 = vpop.permute.xlu0 %2741  ;;  %v2752_v60 = vpop.permute.xlu1 %2751 }
 0x2c2   : > { %v2744_v62 = vunpack.i.h.bf16 %v2742_v59  ;;  %v2754_v0 = vunpack.i.h.bf16 %v2752_v60  ;;  %v2753_v1 = vunpack.i.l.bf16 %v2752_v60  ;;  %v2743_v21 = vunpack.i.l.bf16 %v2742_v59 }
 0x2c4   : > { %v912_v63 = vsel %vm654_vm15, %v2744_v62, %v910_v41  ;;  %v889_v6 = vsel %vm575_vm8, %v2753_v1, %v2754_v0  ;;  %v890_v18 = vsel %vm575_vm8, %v2754_v0, %v888_v10  ;;  %v911_v51 = vsel %vm654_vm15, %v2743_v21, %v2744_v62 }
 0x2c5   : > { %v2800_v2 = vpack.i.bf16 %v910_v41, %v912_v63  ;;  %v2805_v24 = vpack.i.bf16 %v888_v10, %v890_v18  ;;  %v2795_v25 = vpack.i.bf16 %v911_v51, %v2724_v22 }
 0x2c7   : > { %2801 = vrot.lane.b32.xlu2 %v2800_v2, %s3367_s20 }
 0x2c9   : > { %v899_v11 = vpop.permute.xlu0 %898 }
 0x2ca   : > { %v2765_v15 = vpack.i.bf16 %v889_v6, %v899_v11  ;;  %v901_v61 = vsel %vm642_vm14, %v2749_v4, %v899_v11 }
 0x2cb   : > { %v2810_v23 = vpack.i.bf16 %v901_v61, %v900_v12 }
 0x2cc   : > { %2766 = vrot.lane.b32.xlu1 %v2765_v15, %s3367_s20 }
 0x2cd   : > { %2811 = vrot.lane.b32.xlu0 %v2810_v23, %s3367_s20 }
 0x2cf   : > { %2806 = vrot.lane.b32.xlu2 %v2805_v24, %s3367_s20 }
 0x2d4   : > { %2776 = vrot.lane.b32.xlu1 %v2775_v27, %s3367_s20 }
 0x2d5   : > { %2816 = vrot.lane.b32.xlu0 %v2815_v28, %s3367_s20 }
 0x2d7   : > { %966 = vperm.xlu2 %2714, %v963_v13  }
 0x2dc   : > { %2786 = vrot.lane.b32.xlu1 %v2785_v36, %s3367_s20 }
 0x2dd   : > { %1200 = vrot.lane.b32.xlu0 %v3366_v5, %s3372_s29 }
 0x2df   : > { %1189 = vrot.lane.b32.xlu2 %v3520_v34, %s3376_s21 }
 0x2e4   : > { %2796 = vrot.lane.b32.xlu1 %v2795_v25, %s3367_s20 }
 0x2ec   : > { %976 = vrot.lane.b32.xlu1 %v861_v14, %s3367_s20 }
 0x2f4   : > { %1211 = vrot.lane.b32.xlu1 %v3496_v19, %s3374_s16 }
 0x2f7   : > { %v2757_v22 = vpop.permute.xlu2 %2756 }
 0x2f8   : > { %v2759_v49 = vunpack.i.h.bf16 %v2757_v22  ;;  %v2758_v53 = vunpack.i.l.bf16 %v2757_v22 }
 0x2fa   : > { %v1041_v1 = vsel %vm614_vm4, %v2758_v53, %v2759_v49 }
 0x2fc   : > { %1178 = vrot.lane.b32.xlu1 %v3511_v29, %s3375_s17 }
 0x317   : > { %v2762_v39 = vpop.permute.xlu0 %2761 }
 0x318   : > { %v2764_v4 = vunpack.i.h.bf16 %v2762_v39  ;;  %v2763_v7 = vunpack.i.l.bf16 %v2762_v39 }
 0x319   : > { %v2792_v47 = vpop.permute.xlu2 %2791 }
 0x31a   : > { %v2794_v11 = vunpack.i.h.bf16 %v2792_v47  ;;  %v2793_v15 = vunpack.i.l.bf16 %v2792_v47  ;;  %v1034_v24 = vsel %vm614_vm4, %v2763_v7, %v2764_v4 }
 0x31c   : > { %v1037_v57 = vsel %vm614_vm4, %v2793_v15, %v2794_v11 }
 0x321   : > { %v2802_v2 = vpop.permute.xlu2 %2801 }
 0x322   : > { %v2804_v58 = vunpack.i.h.bf16 %v2802_v2  ;;  %v2803_v27 = vunpack.i.l.bf16 %v2802_v2 }
 0x329   : > { %v2772_v40 = vpop.permute.xlu0 %2771  ;;  %v2807_v13 = vpop.permute.xlu2 %2806 }
 0x32a   : > { %v2774_v41 = vunpack.i.h.bf16 %v2772_v40  ;;  %v2773_v42 = vunpack.i.l.bf16 %v2772_v40  ;;  %v2808_v22 = vunpack.i.l.bf16 %v2807_v13 }
 0x32c   : > { %v1042_v16 = vsel %vm614_vm4, %v2773_v42, %v2774_v41  ;;  %v2809_v42 = vunpack.i.h.bf16 %v2807_v13 }
 0x32d   : > { %1072 = vmatpush.msrb.mxu2 %v1042_v16  ;;  %v1033_v16 = vsel %vm614_vm4, %v2803_v27, %v2804_v58 }
 0x331   : > { %v2782_v48 = vpop.permute.xlu0 %2781 }
 0x332   : > { %v2784_v55 = vunpack.i.h.bf16 %v2782_v48  ;;  %v2783_v56 = vunpack.i.l.bf16 %v2782_v48 }
 0x334   : > { %v1038_v0 = vsel %vm614_vm4, %v2783_v56, %v2784_v55 }
 0x33e   : > { %v2767_v44 = vpop.permute.xlu1 %2766 }
 0x33f   : > { %v2812_v10 = vpop.permute.xlu0 %2811  ;;  %v2769_v14 = vunpack.i.h.bf16 %v2767_v44  ;;  %v2768_v39 = vunpack.i.l.bf16 %v2767_v44 }
 0x340   : > { %v2814_v31 = vunpack.i.h.bf16 %v2812_v10  ;;  %v2813_v36 = vunpack.i.l.bf16 %v2812_v10 }
 0x342   : > { %v1030_v49 = vsel %vm614_vm4, %v2813_v36, %v2814_v31  ;;  %v1031_v44 = vsel %vm614_vm4, %v2814_v31, %v2768_v39 }
 0x346   : > { %v2777_v54 = vpop.permute.xlu1 %2776 }
 0x347   : > { %v2779_v59 = vunpack.i.h.bf16 %v2777_v54  ;;  %v2778_v60 = vunpack.i.l.bf16 %v2777_v54  ;;  %v2817_v25 = vpop.permute.xlu0 %2816 }
 0x348   : > { %v2819_v47 = vunpack.i.h.bf16 %v2817_v25  ;;  %v2818_v48 = vunpack.i.l.bf16 %v2817_v25 }
 0x349   : > { %v1040_v62 = vsel %vm614_vm4, %v2779_v59, %v2758_v53  ;;  %v1043_v63 = vsel %vm614_vm4, %v2774_v41, %v2778_v60  ;;  %v1028_v53 = vsel %vm614_vm4, %v2769_v14, %v2808_v22  ;;  %v1029_v59 = vsel %vm614_vm4, %v2808_v22, %v2809_v42 }
 0x34a   : > { %1073 = vmatpush.msrb.mxu2 %v1040_v62  ;;  %1092 = vmatpush.msrb.mxu3 %v1043_v63  ;;  %v1026_v56 = vsel %vm614_vm4, %v2818_v48, %v2819_v47  ;;  %v967_v62 = vpop.permute.xlu2 %966 }
 0x34c   : > { %1074 = vmatpush.msrb.mxu2 %v1038_v0  ;;  %1093 = vmatpush.msrb.mxu3 %v1041_v1 }
 0x34e   : > { %v2787_v6 = vpop.permute.xlu1 %2786 }
 0x34f   : > { %v2789_v61 = vunpack.i.h.bf16 %v2787_v6  ;;  %v2788_v12 = vunpack.i.l.bf16 %v2787_v6  ;;  %v1201_v14 = vpop.permute.xlu0 %1200 }
 0x351   : > { %v1036_v18 = vsel %vm614_vm4, %v2789_v61, %v2793_v15  ;;  %v1039_v23 = vsel %vm614_vm4, %v2784_v55, %v2788_v12  ;;  %v962_v55 = vld [vmem:[%s4413_s3] sm:$0xff] }
 0x352   : > { %1075 = vmatpush.msrb.mxu2 %v1036_v18  ;;  %1094 = vmatpush.msrb.mxu3 %v1039_v23 }
 0x354   : > { %1076 = vmatpush.msrb.mxu2 %v1034_v24  ;;  %1095 = vmatpush.msrb.mxu3 %v1037_v57 }
 0x356   : > { %v2797_v28 = vpop.permute.xlu1 %2796 }
 0x357   : > { %v2799_v21 = vunpack.i.h.bf16 %v2797_v28  ;;  %v2798_v51 = vunpack.i.l.bf16 %v2797_v28 }
 0x359   : > { %v1032_v40 = vsel %vm614_vm4, %v2799_v21, %v2803_v27  ;;  %v1035_v41 = vsel %vm614_vm4, %v2764_v4, %v2798_v51  ;;  %v3828_v51 = vpop.permute.xlu2 %1189 }
 0x35a   : > { %1077 = vmatpush.msrb.mxu2 %v1032_v40  ;;  %1096 = vmatpush.msrb.mxu3 %v1035_v41 }
 0x35c   : > { %1078 = vmatpush.msrb.mxu2 %v1030_v49  ;;  %1097 = vmatpush.msrb.mxu3 %v1033_v16 }
 0x35e   : > { %v977_v54 = vpop.permute.xlu1 %976  ;;  %1079 = vmatpush.msrb.mxu2 %v1028_v53  ;;  %1098 = vmatpush.msrb.mxu3 %v1031_v44 }
 0x35f   : > { %v1027_v60 = vsel %vm614_vm4, %v2819_v47, %v977_v54 }
 0x360   : > { %1080 = vmatpush.msrb.mxu2 %v1026_v56  ;;  %1099 = vmatpush.msrb.mxu3 %v1029_v59 }
 0x361   : > { %2539 = vmatmul.msk.f32.vlgmr.msrb.gmra.mxu2 %vm810_vm0, %v962_v55 }
 0x362   : > { %1100 = vmatpush.msrb.mxu3 %v1027_v60 }
 0x363   : > { %2540 = vmatmul.msk.f32.vlgmr.msrb.gmra.mxu3 %vm810_vm0, %v962_v55 }
 0x366   : > { %v1212_v22 = vpop.permute.xlu1 %1211 }
 0x36e   : > { %v1179_v54 = vpop.permute.xlu1 %1178 }
 0x3e4   : > { %v1082_v63 = vpop.f32.mrf.mxu2 }
 0x3e5   : > { %v1083_v0 = vadd.f32 %v1082_v63, %v967_v62 }
 0x3e6   : > { %v1102_v1 = vpop.f32.mrf.mxu3 }
 0x3e7   : > { %v3786_v2 = vmax.f32 %v1083_v0, 0.0  ;;  %v1103_v4 = vadd.f32 %v1102_v1, %v967_v62 }
 0x3e9   : > { %v3788_v7 = vmax.f32 %v1103_v4, 0.0  ;;  %v1130_v10 = vmul.f32 %v3494_v17, %v3786_v2  ;;  %v1127_v15 = vmul.f32 %v3515_v32, %v3786_v2  ;;  %v1124_v24 = vmul.f32 %v3513_v30, %v3786_v2 }
 0x3ea   : > { %v1116_v27 = vmul.f32 %v3786_v2, %v3518_v33  ;;  %v1119_v28 = vmul.f32 %v3786_v2, %v3554_v50  ;;  %v2855_v31 = vpack.i.bf16 %v3786_v2, %v3366_v5 }
 0x3eb   : > { %v2820_v6 = vpack.i.bf16 %v3788_v7, %v3786_v2  ;;  %v1131_v11 = vmul.f32 %v3788_v7, %v3500_v20  ;;  %v1128_v61 = vmul.f32 %v3788_v7, %v3523_v35  ;;  %v1125_v23 = vmul.f32 %v3788_v7, %v3528_v37 }
 0x3ec   : > { %v1120_v57 = vmul.f32 %v3548_v46, %v3788_v7  ;;  %v2850_v13 = vpack.i.bf16 %v1116_v27, %v3530_v38  ;;  %v2845_v36 = vpack.i.bf16 %v1119_v28, %v3558_v52  ;;  %v1117_v21 = vmul.f32 %v3508_v26, %v3788_v7 }
 0x3ed   : > { %2821 = vrot.lane.b32.xlu2 %v2820_v6, %s3372_s29  ;;  %v2830_v12 = vpack.i.bf16 %v1131_v11, %v1130_v10  ;;  %v2835_v18 = vpack.i.bf16 %v1128_v61, %v1127_v15  ;;  %v2840_v58 = vpack.i.bf16 %v1125_v23, %v1124_v24 }
 0x3ef   : > { %2831 = vrot.lane.b32.xlu0 %v2830_v12, %s3374_s16  ;;  %2836 = vrot.lane.b32.xlu1 %v2835_v18, %s3376_s21 }
 0x3f5   : > { %2826 = vrot.lane.b32.xlu2 %v2820_v6, %s3373_s30 }
 0x3f7   : > { %1162 = vrot.lane.b32.xlu1 %v1120_v57, %s3378_s23  ;;  %2841 = vrot.lane.b32.xlu0 %v2840_v58, %s3375_s17 }
 0x3fd   : > { %2851 = vrot.lane.b32.xlu2 %v2850_v13, %s3377_s22 }
 0x3ff   : > { %2856 = vrot.lane.b32.xlu1 %v2855_v31, %s3371_s28  ;;  %2846 = vrot.lane.b32.xlu0 %v2845_v36, %s3378_s23 }
 0x405   : > { %1140 = vrot.lane.b32.xlu2 %v3788_v7, %s3371_s28 }
 0x407   : > { %1151 = vrot.lane.b32.xlu0 %v1117_v21, %s3377_s22 }
 0x447   : > { %v2822_v25 = vpop.permute.xlu2 %2821 }
 0x448   : > { %v2824_v39 = vunpack.i.h.bf16 %v2822_v25  ;;  %v2823_v40 = vunpack.i.l.bf16 %v2822_v25 }
 0x44a   : > { %v1202_v41 = vsel %vm695_vm10, %v2823_v40, %v2824_v39  ;;  %v1203_v42 = vsel %vm695_vm10, %v2824_v39, %v1201_v14 }
 0x44b   : > { %v2860_v16 = vpack.i.bf16 %v1203_v42, %v1202_v41 }
 0x44d   : > { %2861 = vrot.lane.b32.xlu2 %v2860_v16, %s3367_s20 }
 0x44f   : > { %v3833_v47 = vpop.permute.xlu2 %2826 }
 0x450   : > { %v2829_v48 = vunpack.i.h.bf16 %v3833_v47  ;;  %v2828_v49 = vunpack.i.l.bf16 %v3833_v47 }
 0x452   : > { %v1170_v53 = vsel %vm549_vm9, %v2828_v49, %v2829_v48 }
 0x453   : > { %v2865_v44 = vpack.i.bf16 %v1170_v53, %v2828_v49 }
 0x455   : > { %2866 = vrot.lane.b32.xlu0 %v2865_v44, %s3367_s20 }
 0x457   : > { %v2852_v24 = vpop.permute.xlu2 %2851 }
 0x458   : > { %v2854_v21 = vunpack.i.h.bf16 %v2852_v24  ;;  %v2853_v25 = vunpack.i.l.bf16 %v2852_v24 }
 0x45a   : > { %v1153_v16 = vsel %vm642_vm14, %v2853_v25, %v2854_v21 }
 0x45f   : > { %v1141_v14 = vpop.permute.xlu2 %1140 }
 0x461   : > { %v2832_v55 = vpop.permute.xlu0 %2831  ;;  %v2837_v56 = vpop.permute.xlu1 %2836 }
 0x462   : > { %v2834_v59 = vunpack.i.h.bf16 %v2832_v55  ;;  %v2833_v60 = vunpack.i.l.bf16 %v2832_v55  ;;  %v2839_v0 = vunpack.i.h.bf16 %v2837_v56  ;;  %v2838_v1 = vunpack.i.l.bf16 %v2837_v56 }
 0x463   : > { %v1113_v56 = vmul.f32 %v3786_v2, %v3610_v8 }
 0x464   : > { %v1213_v62 = vsel %vm707_vm11, %v2833_v60, %v2834_v59  ;;  %v1191_v6 = vsel %vm683_vm13, %v2838_v1, %v2839_v0  ;;  %v1214_v55 = vsel %vm707_vm11, %v2834_v59, %v1212_v22 }
 0x465   : > { %v2875_v63 = vpack.i.bf16 %v1213_v62, %v2833_v60  ;;  %v2885_v18 = vpack.i.bf16 %v1191_v6, %v2838_v1  ;;  %v2880_v60 = vpack.i.bf16 %v2823_v40, %v1214_v55  ;;  %v2920_v62 = vpack.i.bf16 %v1113_v56, %v3612_v9 }
 0x466   : > { %v1192_v1 = vsel %vm683_vm13, %v2839_v0, %v3828_v51  ;;  %v1114_v51 = vmul.f32 %v3606_v3, %v3788_v7 }
 0x467   : > { %2876 = vrot.lane.b32.xlu0 %v2875_v63, %s3367_s20  ;;  %v1216_v63 = vld [vmem:[%s4416_s6] sm:$0xff] }
 0x469   : > { %v1163_v4 = vpop.permute.xlu1 %1162  ;;  %v2842_v10 = vpop.permute.xlu0 %2841 }
 0x46a   : > { %v2844_v11 = vunpack.i.h.bf16 %v2842_v10  ;;  %v2843_v15 = vunpack.i.l.bf16 %v2842_v10 }
 0x46c   : > { %v1180_v61 = vsel %vm671_vm12, %v2843_v15, %v2844_v11  ;;  %v1181_v12 = vsel %vm671_vm12, %v2844_v11, %v1179_v54 }
 0x46d   : > { %v2895_v23 = vpack.i.bf16 %v1181_v12, %v1180_v61 }
 0x46f   : > { %2886 = vrot.lane.b32.xlu0 %v2885_v18, %s3367_s20  ;;  %2896 = vrot.lane.b32.xlu2 %v2895_v23, %s3367_s20 }
 0x471   : > { %v2847_v57 = vpop.permute.xlu0 %2846  ;;  %v2857_v58 = vpop.permute.xlu1 %2856 }
 0x472   : > { %v2849_v27 = vunpack.i.h.bf16 %v2847_v57  ;;  %v2859_v13 = vunpack.i.h.bf16 %v2857_v58  ;;  %v2858_v31 = vunpack.i.l.bf16 %v2857_v58  ;;  %v2848_v22 = vunpack.i.l.bf16 %v2847_v57 }
 0x474   : > { %v1165_v28 = vsel %vm654_vm15, %v2849_v27, %v1163_v4  ;;  %v1142_v39 = vsel %vm575_vm8, %v2858_v31, %v2859_v13  ;;  %v1143_v53 = vsel %vm575_vm8, %v2859_v13, %v1141_v14  ;;  %v1164_v2 = vsel %vm654_vm15, %v2848_v22, %v2849_v27 }
 0x475   : > { %v2905_v36 = vpack.i.bf16 %v1163_v4, %v1165_v28  ;;  %v2910_v54 = vpack.i.bf16 %v1141_v14, %v1143_v53  ;;  %v2890_v4 = vpack.i.bf16 %v2843_v15, %v1192_v1  ;;  %v2900_v40 = vpack.i.bf16 %v1164_v2, %v2829_v48 }
 0x477   : > { %2906 = vrot.lane.b32.xlu2 %v2905_v36, %s3367_s20 }
 0x479   : > { %v1152_v41 = vpop.permute.xlu0 %1151 }
 0x47a   : > { %v2870_v42 = vpack.i.bf16 %v1142_v39, %v1152_v41  ;;  %v1154_v49 = vsel %vm642_vm14, %v2854_v21, %v1152_v41 }
 0x47b   : > { %v2915_v44 = vpack.i.bf16 %v1154_v49, %v1153_v16 }
 0x47c   : > { %2871 = vrot.lane.b32.xlu1 %v2870_v42, %s3367_s20 }
 0x47d   : > { %2916 = vrot.lane.b32.xlu0 %v2915_v44, %s3367_s20 }
 0x47f   : > { %2911 = vrot.lane.b32.xlu2 %v2910_v54, %s3367_s20 }
 0x484   : > { %2881 = vrot.lane.b32.xlu1 %v2880_v60, %s3367_s20 }
 0x485   : > { %2921 = vrot.lane.b32.xlu0 %v2920_v62, %s3367_s20 }
 0x487   : > { %1219 = vperm.xlu2 %2714, %v1216_v63  }
 0x48c   : > { %2891 = vrot.lane.b32.xlu1 %v2890_v4, %s3367_s20 }
 0x48d   : > { %1455 = vrot.lane.b32.xlu0 %v3366_v5, %s3372_s29 }
 0x48f   : > { %1444 = vrot.lane.b32.xlu2 %v3520_v34, %s3376_s21 }
 0x494   : > { %2901 = vrot.lane.b32.xlu1 %v2900_v40, %s3367_s20 }
 0x49c   : > { %1229 = vrot.lane.b32.xlu1 %v1114_v51, %s3367_s20 }
 0x4a4   : > { %1466 = vrot.lane.b32.xlu1 %v3496_v19, %s3374_s16 }
 0x4a7   : > { %v2862_v48 = vpop.permute.xlu2 %2861 }
 0x4a8   : > { %v2864_v7 = vunpack.i.h.bf16 %v2862_v48  ;;  %v2863_v12 = vunpack.i.l.bf16 %v2862_v48 }
 0x4aa   : > { %v1294_v31 = vsel %vm614_vm4, %v2863_v12, %v2864_v7 }
 0x4ac   : > { %1433 = vrot.lane.b32.xlu1 %v3511_v29, %s3375_s17 }
 0x4c7   : > { %v2867_v59 = vpop.permute.xlu0 %2866 }
 0x4c8   : > { %v2869_v21 = vunpack.i.h.bf16 %v2867_v59  ;;  %v2868_v25 = vunpack.i.l.bf16 %v2867_v59 }
 0x4c9   : > { %v2897_v15 = vpop.permute.xlu2 %2896 }
 0x4ca   : > { %v2899_v41 = vunpack.i.h.bf16 %v2897_v15  ;;  %v2898_v42 = vunpack.i.l.bf16 %v2897_v15  ;;  %v1287_v54 = vsel %vm614_vm4, %v2868_v25, %v2869_v21 }
 0x4cc   : > { %v1290_v55 = vsel %vm614_vm4, %v2898_v42, %v2899_v41 }
 0x4d1   : > { %v2907_v36 = vpop.permute.xlu2 %2906 }
 0x4d2   : > { %v2909_v56 = vunpack.i.h.bf16 %v2907_v36  ;;  %v2908_v60 = vunpack.i.l.bf16 %v2907_v36 }
 0x4d9   : > { %v2877_v0 = vpop.permute.xlu0 %2876  ;;  %v2912_v63 = vpop.permute.xlu2 %2911 }
 0x4da   : > { %v2879_v10 = vunpack.i.h.bf16 %v2877_v0  ;;  %v2878_v6 = vunpack.i.l.bf16 %v2877_v0  ;;  %v2913_v48 = vunpack.i.l.bf16 %v2912_v63 }
 0x4dc   : > { %v1295_v47 = vsel %vm614_vm4, %v2878_v6, %v2879_v10  ;;  %v2914_v6 = vunpack.i.h.bf16 %v2912_v63 }
 0x4dd   : > { %1325 = vmatpush.msra.mxu0 %v1295_v47  ;;  %v1286_v47 = vsel %vm614_vm4, %v2908_v60, %v2909_v56 }
 0x4e1   : > { %v2887_v61 = vpop.permute.xlu0 %2886 }
 0x4e2   : > { %v2889_v23 = vunpack.i.h.bf16 %v2887_v61  ;;  %v2888_v24 = vunpack.i.l.bf16 %v2887_v61 }
 0x4e4   : > { %v1291_v13 = vsel %vm614_vm4, %v2888_v24, %v2889_v23 }
 0x4ee   : > { %v2872_v11 = vpop.permute.xlu1 %2871 }
 0x4ef   : > { %v2917_v14 = vpop.permute.xlu0 %2916  ;;  %v2874_v51 = vunpack.i.h.bf16 %v2872_v11  ;;  %v2873_v59 = vunpack.i.l.bf16 %v2872_v11 }
 0x4f0   : > { %v2919_v1 = vunpack.i.h.bf16 %v2917_v14  ;;  %v2918_v4 = vunpack.i.l.bf16 %v2917_v14 }
 0x4f2   : > { %v1283_v7 = vsel %vm614_vm4, %v2918_v4, %v2919_v1  ;;  %v1284_v11 = vsel %vm614_vm4, %v2919_v1, %v2873_v59 }
 0x4f6   : > { %v2882_v18 = vpop.permute.xlu1 %2881 }
 0x4f7   : > { %v2884_v57 = vunpack.i.h.bf16 %v2882_v18  ;;  %v2883_v58 = vunpack.i.l.bf16 %v2882_v18  ;;  %v2922_v40 = vpop.permute.xlu0 %2921 }
 0x4f8   : > { %v2924_v15 = vunpack.i.h.bf16 %v2922_v40  ;;  %v2923_v61 = vunpack.i.l.bf16 %v2922_v40 }
 0x4f9   : > { %v1293_v27 = vsel %vm614_vm4, %v2884_v57, %v2863_v12  ;;  %v1296_v28 = vsel %vm614_vm4, %v2879_v10, %v2883_v58  ;;  %v1281_v12 = vsel %vm614_vm4, %v2874_v51, %v2913_v48  ;;  %v1282_v57 = vsel %vm614_vm4, %v2913_v48, %v2914_v6 }
 0x4fa   : > { %1326 = vmatpush.msra.mxu0 %v1293_v27  ;;  %1345 = vmatpush.msra.mxu1 %v1296_v28  ;;  %v1279_v24 = vsel %vm614_vm4, %v2923_v61, %v2924_v15  ;;  %v1220_v27 = vpop.permute.xlu2 %1219 }
 0x4fc   : > { %1327 = vmatpush.msra.mxu0 %v1291_v13  ;;  %1346 = vmatpush.msra.mxu1 %v1294_v31 }
 0x4fe   : > { %v2892_v39 = vpop.permute.xlu1 %2891 }
 0x4ff   : > { %v2894_v16 = vunpack.i.h.bf16 %v2892_v39  ;;  %v2893_v49 = vunpack.i.l.bf16 %v2892_v39  ;;  %v1456_v51 = vpop.permute.xlu0 %1455 }
 0x501   : > { %v1289_v53 = vsel %vm614_vm4, %v2894_v16, %v2898_v42  ;;  %v1292_v44 = vsel %vm614_vm4, %v2889_v23, %v2893_v49  ;;  %v1215_v23 = vld [vmem:[%s4415_s5] sm:$0xff] }
 0x502   : > { %1328 = vmatpush.msra.mxu0 %v1289_v53  ;;  %1347 = vmatpush.msra.mxu1 %v1292_v44 }
 0x504   : > { %1329 = vmatpush.msra.mxu0 %v1287_v54  ;;  %1348 = vmatpush.msra.mxu1 %v1290_v55 }
 0x506   : > { %v2902_v62 = vpop.permute.xlu1 %2901 }
 0x507   : > { %v2904_v22 = vunpack.i.h.bf16 %v2902_v62  ;;  %v2903_v2 = vunpack.i.l.bf16 %v2902_v62 }
 0x509   : > { %v1285_v0 = vsel %vm614_vm4, %v2904_v22, %v2908_v60  ;;  %v1288_v10 = vsel %vm614_vm4, %v2869_v21, %v2903_v2  ;;  %v3951_v2 = vpop.permute.xlu2 %1444 }
 0x50a   : > { %1330 = vmatpush.msra.mxu0 %v1285_v0  ;;  %1349 = vmatpush.msra.mxu1 %v1288_v10 }
 0x50c   : > { %1331 = vmatpush.msra.mxu0 %v1283_v7  ;;  %1350 = vmatpush.msra.mxu1 %v1286_v47 }
 0x50e   : > { %v1230_v18 = vpop.permute.xlu1 %1229  ;;  %1332 = vmatpush.msra.mxu0 %v1281_v12  ;;  %1351 = vmatpush.msra.mxu1 %v1284_v11 }
 0x50f   : > { %v1280_v58 = vsel %vm614_vm4, %v2924_v15, %v1230_v18 }
 0x510   : > { %1333 = vmatpush.msra.mxu0 %v1279_v24  ;;  %1352 = vmatpush.msra.mxu1 %v1282_v57 }
 0x511   : > { %2541 = vmatmul.msk.f32.vlgmr.msra.gmra.mxu0 %vm810_vm0, %v1215_v23 }
 0x512   : > { %1353 = vmatpush.msra.mxu1 %v1280_v58 }
 0x513   : > { %2542 = vmatmul.msk.f32.vlgmr.msra.gmra.mxu1 %vm810_vm0, %v1215_v23 }
 0x516   : > { %v1467_v48 = vpop.permute.xlu1 %1466 }
 0x51e   : > { %v1434_v18 = vpop.permute.xlu1 %1433 }
 0x58e   : > { %v1335_v28 = vpop.f32.mrf.mxu0 }
 0x58f   : > { %v1336_v13 = vadd.f32 %v1335_v28, %v1220_v27 }
 0x590   : > { %v1355_v31 = vpop.f32.mrf.mxu1 }
 0x591   : > { %v1358_v36 = vmul.f32 0.15, %v1336_v13  ;;  %v1356_v21 = vadd.f32 %v1355_v31, %v1220_v27 }
 0x593   : > { %v3908_v25 = vadd.f32 %v1358_v36, %v3665_v43  ;;  %v1359_v14 = vmul.f32 0.15, %v1356_v21 }
 0x595   : > { %v3911_v39 = vadd.f32 %v1359_v14, %v3667_v45  ;;  %v1385_v41 = vmul.f32 %v3494_v17, %v3908_v25  ;;  %v1382_v49 = vmul.f32 %v3515_v32, %v3908_v25  ;;  %v1379_v54 = vmul.f32 %v3513_v30, %v3908_v25 }
 0x596   : > { %v1371_v60 = vmul.f32 %v3908_v25, %v3518_v33  ;;  %v1374_v62 = vmul.f32 %v3908_v25, %v3554_v50  ;;  %v2960_v1 = vpack.i.bf16 %v3908_v25, %v3366_v5 }
 0x597   : > { %v2925_v42 = vpack.i.bf16 %v3911_v39, %v3908_v25  ;;  %v1386_v16 = vmul.f32 %v3911_v39, %v3500_v20  ;;  %v1383_v43 = vmul.f32 %v3911_v39, %v3523_v35  ;;  %v1380_v44 = vmul.f32 %v3911_v39, %v3528_v37 }
 0x598   : > { %v1375_v55 = vmul.f32 %v3548_v46, %v3911_v39  ;;  %v2955_v63 = vpack.i.bf16 %v1371_v60, %v3530_v38  ;;  %v2950_v4 = vpack.i.bf16 %v1374_v62, %v3558_v52  ;;  %v1372_v22 = vmul.f32 %v3508_v26, %v3911_v39 }
 0x599   : > { %2926 = vrot.lane.b32.xlu2 %v2925_v42, %s3372_s29  ;;  %v2935_v53 = vpack.i.bf16 %v1386_v16, %v1385_v41  ;;  %v2940_v45 = vpack.i.bf16 %v1383_v43, %v1382_v49  ;;  %v2945_v56 = vpack.i.bf16 %v1380_v44, %v1379_v54 }
 0x59b   : > { %2936 = vrot.lane.b32.xlu0 %v2935_v53, %s3374_s16  ;;  %2941 = vrot.lane.b32.xlu1 %v2940_v45, %s3376_s21 }
 0x5a1   : > { %2931 = vrot.lane.b32.xlu2 %v2925_v42, %s3373_s30 }
 0x5a3   : > { %1417 = vrot.lane.b32.xlu1 %v1375_v55, %s3378_s23  ;;  %2946 = vrot.lane.b32.xlu0 %v2945_v56, %s3375_s17 }
 0x5a9   : > { %2956 = vrot.lane.b32.xlu2 %v2955_v63, %s3377_s22 }
 0x5ab   : > { %2961 = vrot.lane.b32.xlu1 %v2960_v1, %s3371_s28  ;;  %2951 = vrot.lane.b32.xlu0 %v2950_v4, %s3378_s23 }
 0x5b1   : > { %1395 = vrot.lane.b32.xlu2 %v3911_v39, %s3371_s28 }
 0x5b3   : > { %1406 = vrot.lane.b32.xlu0 %v1372_v22, %s3377_s22 }
 0x5f3   : > { %v2927_v40 = vpop.permute.xlu2 %2926 }
 0x5f4   : > { %v2929_v59 = vunpack.i.h.bf16 %v2927_v40  ;;  %v2928_v0 = vunpack.i.l.bf16 %v2927_v40 }
 0x5f6   : > { %v1457_v10 = vsel %vm695_vm10, %v2928_v0, %v2929_v59  ;;  %v1458_v6 = vsel %vm695_vm10, %v2929_v59, %v1456_v51 }
 0x5f7   : > { %v2965_v47 = vpack.i.bf16 %v1458_v6, %v1457_v10 }
 0x5f9   : > { %2966 = vrot.lane.b32.xlu2 %v2965_v47, %s3367_s20 }
 0x5fb   : > { %v3956_v15 = vpop.permute.xlu2 %2931 }
 0x5fc   : > { %v2934_v61 = vunpack.i.h.bf16 %v3956_v15  ;;  %v2933_v7 = vunpack.i.l.bf16 %v3956_v15 }
 0x5fe   : > { %v1425_v12 = vsel %vm549_vm9, %v2933_v7, %v2934_v61 }
 0x5ff   : > { %v2970_v11 = vpack.i.bf16 %v1425_v12, %v2933_v7 }
 0x601   : > { %2971 = vrot.lane.b32.xlu0 %v2970_v11, %s3367_s20 }
 0x603   : > { %v2957_v45 = vpop.permute.xlu2 %2956 }
 0x604   : > { %v2959_v1 = vunpack.i.h.bf16 %v2957_v45  ;;  %v2958_v4 = vunpack.i.l.bf16 %v2957_v45 }
 0x606   : > { %v1408_v10 = vsel %vm642_vm14, %v2958_v4, %v2959_v1 }
 0x60b   : > { %v1396_v22 = vpop.permute.xlu2 %1395 }
 0x60d   : > { %v2937_v23 = vpop.permute.xlu0 %2936  ;;  %v2942_v24 = vpop.permute.xlu1 %2941 }
 0x60e   : > { %v2939_v57 = vunpack.i.h.bf16 %v2937_v23  ;;  %v2938_v58 = vunpack.i.l.bf16 %v2937_v23  ;;  %v2944_v13 = vunpack.i.h.bf16 %v2942_v24  ;;  %v2943_v31 = vunpack.i.l.bf16 %v2942_v24 }
 0x610   : > { %v1468_v27 = vsel %vm707_vm11, %v2938_v58, %v2939_v57  ;;  %v1446_v14 = vsel %vm683_vm13, %v2943_v31, %v2944_v13  ;;  %v1469_v11 = vsel %vm707_vm11, %v2939_v57, %v1467_v48 }
 0x611   : > { %v2980_v28 = vpack.i.bf16 %v1468_v27, %v2938_v58  ;;  %v2990_v43 = vpack.i.bf16 %v1446_v14, %v2943_v31  ;;  %v2985_v23 = vpack.i.bf16 %v2928_v0, %v1469_v11  ;;  %v1471_v58 = vld [vmem:[%s4418_s8] sm:$0xff]  ;;  %v1447_v27 = vsel %vm683_vm13, %v2944_v13, %v3951_v2 }
 0x612   : > { %v1369_v2 = vmul.f32 %v3606_v3, %v3911_v39 }
 0x613   : > { %2981 = vrot.lane.b32.xlu0 %v2980_v28, %s3367_s20 }
 0x615   : > { %v1418_v36 = vpop.permute.xlu1 %1417  ;;  %v2947_v21 = vpop.permute.xlu0 %2946 }
 0x616   : > { %v2949_v41 = vunpack.i.h.bf16 %v2947_v21  ;;  %v2948_v42 = vunpack.i.l.bf16 %v2947_v21 }
 0x618   : > { %v1435_v16 = vsel %vm671_vm12, %v2948_v42, %v2949_v41  ;;  %v1436_v49 = vsel %vm671_vm12, %v2949_v41, %v1434_v18  ;;  %v1368_v18 = vmul.f32 %v3908_v25, %v3610_v8  ;;  %v2995_v28 = vpack.i.bf16 %v2948_v42, %v1447_v27 }
 0x619   : > { %v3000_v53 = vpack.i.bf16 %v1436_v49, %v1435_v16 }
 0x61a   : > { %v3025_v24 = vpack.i.bf16 %v1368_v18, %v3612_v9 }
 0x61b   : > { %2991 = vrot.lane.b32.xlu0 %v2990_v43, %s3367_s20  ;;  %3001 = vrot.lane.b32.xlu2 %v3000_v53, %s3367_s20 }
 0x61d   : > { %v2952_v44 = vpop.permute.xlu0 %2951  ;;  %v2962_v54 = vpop.permute.xlu1 %2961 }
 0x61e   : > { %v2954_v55 = vunpack.i.h.bf16 %v2952_v44  ;;  %v2964_v60 = vunpack.i.h.bf16 %v2962_v54  ;;  %v2963_v62 = vunpack.i.l.bf16 %v2962_v54  ;;  %v2953_v48 = vunpack.i.l.bf16 %v2952_v44 }
 0x620   : > { %v1420_v56 = vsel %vm654_vm15, %v2954_v55, %v1418_v36  ;;  %v1397_v40 = vsel %vm575_vm8, %v2963_v62, %v2964_v60  ;;  %v1398_v47 = vsel %vm575_vm8, %v2964_v60, %v1396_v22  ;;  %v1419_v0 = vsel %vm654_vm15, %v2953_v48, %v2954_v55 }
 0x621   : > { %v3010_v63 = vpack.i.bf16 %v1418_v36, %v1420_v56  ;;  %v3015_v12 = vpack.i.bf16 %v1396_v22, %v1398_v47  ;;  %v3005_v57 = vpack.i.bf16 %v1419_v0, %v2934_v61 }
 0x623   : > { %3011 = vrot.lane.b32.xlu2 %v3010_v63, %s3367_s20 }
 0x625   : > { %v1407_v51 = vpop.permute.xlu0 %1406 }
 0x626   : > { %v2975_v59 = vpack.i.bf16 %v1397_v40, %v1407_v51  ;;  %v1409_v6 = vsel %vm642_vm14, %v2959_v1, %v1407_v51 }
 0x627   : > { %v3020_v7 = vpack.i.bf16 %v1409_v6, %v1408_v10 }
 0x628   : > { %2976 = vrot.lane.b32.xlu1 %v2975_v59, %s3367_s20 }
 0x629   : > { %3021 = vrot.lane.b32.xlu0 %v3020_v7, %s3367_s20 }
 0x62b   : > { %3016 = vrot.lane.b32.xlu2 %v3015_v12, %s3367_s20 }
 0x630   : > { %2986 = vrot.lane.b32.xlu1 %v2985_v23, %s3367_s20 }
 0x631   : > { %3026 = vrot.lane.b32.xlu0 %v3025_v24, %s3367_s20 }
 0x633   : > { %1474 = vperm.xlu2 %2714, %v1471_v58  }
 0x638   : > { %2996 = vrot.lane.b32.xlu1 %v2995_v28, %s3367_s20 }
 0x639   : > { %1708 = vrot.lane.b32.xlu0 %v3366_v5, %s3372_s29 }
 0x63b   : > { %1697 = vrot.lane.b32.xlu2 %v3520_v34, %s3376_s21 }
 0x640   : > { %3006 = vrot.lane.b32.xlu1 %v3005_v57, %s3367_s20 }
 0x648   : > { %1484 = vrot.lane.b32.xlu1 %v1369_v2, %s3367_s20 }
 0x650   : > { %1719 = vrot.lane.b32.xlu1 %v3496_v19, %s3374_s16 }
 0x653   : > { %v2967_v61 = vpop.permute.xlu2 %2966 }
 0x654   : > { %v2969_v16 = vunpack.i.h.bf16 %v2967_v61  ;;  %v2968_v49 = vunpack.i.l.bf16 %v2967_v61 }
 0x656   : > { %v1549_v62 = vsel %vm614_vm4, %v2968_v49, %v2969_v16 }
 0x658   : > { %1686 = vrot.lane.b32.xlu1 %v3511_v29, %s3375_s17 }
 0x673   : > { %v2972_v13 = vpop.permute.xlu0 %2971 }
 0x674   : > { %v2974_v1 = vunpack.i.h.bf16 %v2972_v13  ;;  %v2973_v4 = vunpack.i.l.bf16 %v2972_v13 }
 0x675   : > { %v3002_v41 = vpop.permute.xlu2 %3001 }
 0x676   : > { %v3004_v51 = vunpack.i.h.bf16 %v3002_v41  ;;  %v3003_v59 = vunpack.i.l.bf16 %v3002_v41  ;;  %v1542_v12 = vsel %vm614_vm4, %v2973_v4, %v2974_v1 }
 0x678   : > { %v1545_v11 = vsel %vm614_vm4, %v3003_v59, %v3004_v51 }
 0x67d   : > { %v3012_v63 = vpop.permute.xlu2 %3011 }
 0x67e   : > { %v3014_v18 = vunpack.i.h.bf16 %v3012_v63  ;;  %v3013_v23 = vunpack.i.l.bf16 %v3012_v63 }
 0x685   : > { %v2982_v31 = vpop.permute.xlu0 %2981  ;;  %v3017_v58 = vpop.permute.xlu2 %3016 }
 0x686   : > { %v2984_v36 = vunpack.i.h.bf16 %v2982_v31  ;;  %v2983_v21 = vunpack.i.l.bf16 %v2982_v31  ;;  %v3018_v61 = vunpack.i.l.bf16 %v3017_v58 }
 0x688   : > { %v1550_v15 = vsel %vm614_vm4, %v2983_v21, %v2984_v36  ;;  %v3019_v21 = vunpack.i.h.bf16 %v3017_v58 }
 0x689   : > { %1580 = vmatpush.msra.mxu2 %v1550_v15  ;;  %v1541_v15 = vsel %vm614_vm4, %v3013_v23, %v3014_v18 }
 0x68d   : > { %v2992_v42 = vpop.permute.xlu0 %2991 }
 0x68e   : > { %v2994_v53 = vunpack.i.h.bf16 %v2992_v42  ;;  %v2993_v45 = vunpack.i.l.bf16 %v2992_v42 }
 0x690   : > { %v1546_v60 = vsel %vm614_vm4, %v2993_v45, %v2994_v53 }
 0x69a   : > { %v2977_v14 = vpop.permute.xlu1 %2976 }
 0x69b   : > { %v3022_v22 = vpop.permute.xlu0 %3021  ;;  %v2979_v2 = vunpack.i.h.bf16 %v2977_v14  ;;  %v2978_v13 = vunpack.i.l.bf16 %v2977_v14 }
 0x69c   : > { %v3024_v27 = vunpack.i.h.bf16 %v3022_v22  ;;  %v3023_v28 = vunpack.i.l.bf16 %v3022_v22 }
 0x69e   : > { %v1538_v16 = vsel %vm614_vm4, %v3023_v28, %v3024_v27  ;;  %v1539_v14 = vsel %vm614_vm4, %v3024_v27, %v2978_v13 }
 0x6a2   : > { %v2987_v43 = vpop.permute.xlu1 %2986 }
 0x6a3   : > { %v2989_v44 = vunpack.i.h.bf16 %v2987_v43  ;;  %v2988_v54 = vunpack.i.l.bf16 %v2987_v43  ;;  %v3027_v57 = vpop.permute.xlu0 %3026 }
 0x6a4   : > { %v3029_v41 = vunpack.i.h.bf16 %v3027_v57  ;;  %v3028_v42 = vunpack.i.l.bf16 %v3027_v57 }
 0x6a5   : > { %v1548_v55 = vsel %vm614_vm4, %v2989_v44, %v2968_v49  ;;  %v1551_v56 = vsel %vm614_vm4, %v2984_v36, %v2988_v54  ;;  %v1536_v49 = vsel %vm614_vm4, %v2979_v2, %v3018_v61  ;;  %v1537_v44 = vsel %vm614_vm4, %v3018_v61, %v3019_v21 }
 0x6a6   : > { %1581 = vmatpush.msra.mxu2 %v1548_v55  ;;  %1600 = vmatpush.msra.mxu3 %v1551_v56  ;;  %v1534_v45 = vsel %vm614_vm4, %v3028_v42, %v3029_v41  ;;  %v1475_v55 = vpop.permute.xlu2 %1474 }
 0x6a8   : > { %1582 = vmatpush.msra.mxu2 %v1546_v60  ;;  %1601 = vmatpush.msra.mxu3 %v1549_v62 }
 0x6aa   : > { %v2997_v40 = vpop.permute.xlu1 %2996 }
 0x6ab   : > { %v2999_v10 = vunpack.i.h.bf16 %v2997_v40  ;;  %v2998_v6 = vunpack.i.l.bf16 %v2997_v40  ;;  %v1709_v2 = vpop.permute.xlu0 %1708 }
 0x6ad   : > { %v1544_v47 = vsel %vm614_vm4, %v2999_v10, %v3003_v59  ;;  %v1547_v7 = vsel %vm614_vm4, %v2994_v53, %v2998_v6  ;;  %v1470_v53 = vld [vmem:[%s4417_s7] sm:$0xff] }
 0x6ae   : > { %1583 = vmatpush.msra.mxu2 %v1544_v47  ;;  %1602 = vmatpush.msra.mxu3 %v1547_v7 }
 0x6b0   : > { %1584 = vmatpush.msra.mxu2 %v1542_v12  ;;  %1603 = vmatpush.msra.mxu3 %v1545_v11 }
 0x6b2   : > { %v3007_v24 = vpop.permute.xlu1 %3006 }
 0x6b3   : > { %v3009_v48 = vunpack.i.h.bf16 %v3007_v24  ;;  %v3008_v0 = vunpack.i.l.bf16 %v3007_v24 }
 0x6b5   : > { %v1540_v31 = vsel %vm614_vm4, %v3009_v48, %v3013_v23  ;;  %v1543_v36 = vsel %vm614_vm4, %v2974_v1, %v3008_v0  ;;  %v4072_v0 = vpop.permute.xlu2 %1697 }
 0x6b6   : > { %1585 = vmatpush.msra.mxu2 %v1540_v31  ;;  %1604 = vmatpush.msra.mxu3 %v1543_v36 }
 0x6b8   : > { %1586 = vmatpush.msra.mxu2 %v1538_v16  ;;  %1605 = vmatpush.msra.mxu3 %v1541_v15 }
 0x6ba   : > { %v1485_v43 = vpop.permute.xlu1 %1484  ;;  %1587 = vmatpush.msra.mxu2 %v1536_v49  ;;  %1606 = vmatpush.msra.mxu3 %v1539_v14 }
 0x6bb   : > { %v1535_v54 = vsel %vm614_vm4, %v3029_v41, %v1485_v43 }
 0x6bc   : > { %1588 = vmatpush.msra.mxu2 %v1534_v45  ;;  %1607 = vmatpush.msra.mxu3 %v1537_v44 }
 0x6bd   : > { %2543 = vmatmul.msk.f32.vlgmr.msra.gmra.mxu2 %vm810_vm0, %v1470_v53 }
 0x6be   : > { %1608 = vmatpush.msra.mxu3 %v1535_v54 }
 0x6bf   : > { %2544 = vmatmul.msk.f32.vlgmr.msra.gmra.mxu3 %vm810_vm0, %v1470_v53 }
 0x6c2   : > { %v1720_v61 = vpop.permute.xlu1 %1719 }
 0x6ca   : > { %v1687_v43 = vpop.permute.xlu1 %1686 }
 0x740   : > { %v1590_v56 = vpop.f32.mrf.mxu2 }
 0x741   : > { %v1591_v60 = vadd.f32 %v1590_v56, %v1475_v55 }
 0x742   : > { %v1610_v62 = vpop.f32.mrf.mxu3 }
 0x743   : > { %v4030_v63 = vmax.f32 %v1591_v60, 0.0  ;;  %v1611_v1 = vadd.f32 %v1610_v62, %v1475_v55 }
 0x745   : > { %v4032_v4 = vmax.f32 %v1611_v1, 0.0  ;;  %v1638_v22 = vmul.f32 %v3494_v17, %v4030_v63  ;;  %v1635_v59 = vmul.f32 %v3515_v32, %v4030_v63  ;;  %v1632_v12 = vmul.f32 %v3513_v30, %v4030_v63 }
 0x746   : > { %v1624_v23 = vmul.f32 %v4030_v63, %v3518_v33  ;;  %v1627_v24 = vmul.f32 %v4030_v63, %v3554_v50  ;;  %v3065_v27 = vpack.i.bf16 %v4030_v63, %v3366_v5 }
 0x747   : > { %v3030_v40 = vpack.i.bf16 %v4032_v4, %v4030_v63  ;;  %v1639_v51 = vmul.f32 %v4032_v4, %v3500_v20  ;;  %v1636_v10 = vmul.f32 %v4032_v4, %v3523_v35  ;;  %v1633_v7 = vmul.f32 %v4032_v4, %v3528_v37 }
 0x748   : > { %v1628_v11 = vmul.f32 %v3548_v46, %v4032_v4  ;;  %v3060_v58 = vpack.i.bf16 %v1624_v23, %v3530_v38  ;;  %v3055_v28 = vpack.i.bf16 %v1627_v24, %v3558_v52  ;;  %v1625_v48 = vmul.f32 %v3508_v26, %v4032_v4 }
 0x749   : > { %3031 = vrot.lane.b32.xlu2 %v3030_v40, %s3372_s29  ;;  %v3040_v6 = vpack.i.bf16 %v1639_v51, %v1638_v22  ;;  %v3045_v47 = vpack.i.bf16 %v1636_v10, %v1635_v59  ;;  %v3050_v18 = vpack.i.bf16 %v1633_v7, %v1632_v12 }
 0x74b   : > { %3041 = vrot.lane.b32.xlu0 %v3040_v6, %s3374_s16  ;;  %3046 = vrot.lane.b32.xlu1 %v3045_v47, %s3376_s21 }
 0x751   : > { %3036 = vrot.lane.b32.xlu2 %v3030_v40, %s3373_s30 }
 0x753   : > { %1670 = vrot.lane.b32.xlu1 %v1628_v11, %s3378_s23  ;;  %3051 = vrot.lane.b32.xlu0 %v3050_v18, %s3375_s17 }
 0x759   : > { %3061 = vrot.lane.b32.xlu2 %v3060_v58, %s3377_s22 }
 0x75b   : > { %3066 = vrot.lane.b32.xlu1 %v3065_v27, %s3371_s28  ;;  %3056 = vrot.lane.b32.xlu0 %v3055_v28, %s3378_s23 }
 0x761   : > { %1648 = vrot.lane.b32.xlu2 %v4032_v4, %s3371_s28 }
 0x763   : > { %1659 = vrot.lane.b32.xlu0 %v1625_v48, %s3377_s22 }
 0x7a3   : > { %v3032_v57 = vpop.permute.xlu2 %3031 }
 0x7a4   : > { %v3034_v13 = vunpack.i.h.bf16 %v3032_v57  ;;  %v3033_v31 = vunpack.i.l.bf16 %v3032_v57 }
 0x7a6   : > { %v1710_v36 = vsel %vm695_vm10, %v3033_v31, %v3034_v13  ;;  %v1711_v21 = vsel %vm695_vm10, %v3034_v13, %v1709_v2 }
 0x7a7   : > { %v3070_v15 = vpack.i.bf16 %v1711_v21, %v1710_v36 }
 0x7a9   : > { %3071 = vrot.lane.b32.xlu2 %v3070_v15, %s3367_s20 }
 0x7ab   : > { %v4077_v41 = vpop.permute.xlu2 %3036 }
 0x7ac   : > { %v3039_v42 = vunpack.i.h.bf16 %v4077_v41  ;;  %v3038_v16 = vunpack.i.l.bf16 %v4077_v41 }
 0x7ae   : > { %v1678_v49 = vsel %vm549_vm9, %v3038_v16, %v3039_v42 }
 0x7af   : > { %v3075_v14 = vpack.i.bf16 %v1678_v49, %v3038_v16 }
 0x7b1   : > { %3076 = vrot.lane.b32.xlu0 %v3075_v14, %s3367_s20 }
 0x7b3   : > { %v3062_v12 = vpop.permute.xlu2 %3061 }
 0x7b4   : > { %v3064_v48 = vunpack.i.h.bf16 %v3062_v12  ;;  %v3063_v57 = vunpack.i.l.bf16 %v3062_v12 }
 0x7b6   : > { %v1661_v16 = vsel %vm642_vm14, %v3063_v57, %v3064_v48 }
 0x7bb   : > { %v1649_v2 = vpop.permute.xlu2 %1648 }
 0x7bd   : > { %v3042_v53 = vpop.permute.xlu0 %3041  ;;  %v3047_v45 = vpop.permute.xlu1 %3046 }
 0x7be   : > { %v3044_v44 = vunpack.i.h.bf16 %v3042_v53  ;;  %v3043_v54 = vunpack.i.l.bf16 %v3042_v53  ;;  %v3049_v60 = vunpack.i.h.bf16 %v3047_v45  ;;  %v3048_v62 = vunpack.i.l.bf16 %v3047_v45 }
 0x7bf   : > { %v1621_v45 = vmul.f32 %v4030_v63, %v3610_v8 }
 0x7c0   : > { %v1721_v55 = vsel %vm707_vm11, %v3043_v54, %v3044_v44  ;;  %v1699_v40 = vsel %vm683_vm13, %v3048_v62, %v3049_v60  ;;  %v1722_v53 = vsel %vm707_vm11, %v3044_v44, %v1720_v61 }
 0x7c1   : > { %v3085_v56 = vpack.i.bf16 %v1721_v55, %v3043_v54  ;;  %v3095_v47 = vpack.i.bf16 %v1699_v40, %v3048_v62  ;;  %v3090_v54 = vpack.i.bf16 %v3033_v31, %v1722_v53  ;;  %v3130_v55 = vpack.i.bf16 %v1621_v45, %v3612_v9 }
 0x7c2   : > { %v1700_v62 = vsel %vm683_vm13, %v3049_v60, %v4072_v0  ;;  %v1622_v0 = vmul.f32 %v3606_v3, %v4032_v4 }
 0x7c3   : > { %3086 = vrot.lane.b32.xlu0 %v3085_v56, %s3367_s20  ;;  %v1724_v56 = vld [vmem:[%s4420_s10] sm:$0xff] }
 0x7c5   : > { %v1671_v1 = vpop.permute.xlu1 %1670  ;;  %v3052_v22 = vpop.permute.xlu0 %3051 }
 0x7c6   : > { %v3054_v51 = vunpack.i.h.bf16 %v3052_v22  ;;  %v3053_v59 = vunpack.i.l.bf16 %v3052_v22 }
 0x7c8   : > { %v1688_v10 = vsel %vm671_vm12, %v3053_v59, %v3054_v51  ;;  %v1689_v6 = vsel %vm671_vm12, %v3054_v51, %v1687_v43 }
 0x7c9   : > { %v3105_v7 = vpack.i.bf16 %v1689_v6, %v1688_v10 }
 0x7cb   : > { %3096 = vrot.lane.b32.xlu0 %v3095_v47, %s3367_s20  ;;  %3106 = vrot.lane.b32.xlu2 %v3105_v7, %s3367_s20 }
 0x7cd   : > { %v3057_v11 = vpop.permute.xlu0 %3056  ;;  %v3067_v18 = vpop.permute.xlu1 %3066 }
 0x7ce   : > { %v3059_v23 = vunpack.i.h.bf16 %v3057_v11  ;;  %v3069_v58 = vunpack.i.h.bf16 %v3067_v18  ;;  %v3068_v27 = vunpack.i.l.bf16 %v3067_v18  ;;  %v3058_v61 = vunpack.i.l.bf16 %v3057_v11 }
 0x7d0   : > { %v1673_v24 = vsel %vm654_vm15, %v3059_v23, %v1671_v1  ;;  %v1650_v13 = vsel %vm575_vm8, %v3068_v27, %v3069_v58  ;;  %v1651_v21 = vsel %vm575_vm8, %v3069_v58, %v1649_v2  ;;  %v1672_v63 = vsel %vm654_vm15, %v3058_v61, %v3059_v23 }
 0x7d1   : > { %v3115_v28 = vpack.i.bf16 %v1671_v1, %v1673_v24  ;;  %v3120_v43 = vpack.i.bf16 %v1649_v2, %v1651_v21  ;;  %v3100_v1 = vpack.i.bf16 %v3053_v59, %v1700_v62  ;;  %v3110_v31 = vpack.i.bf16 %v1672_v63, %v3039_v42 }
 0x7d3   : > { %3116 = vrot.lane.b32.xlu2 %v3115_v28, %s3367_s20 }
 0x7d5   : > { %v1660_v36 = vpop.permute.xlu0 %1659 }
 0x7d6   : > { %v3080_v15 = vpack.i.bf16 %v1650_v13, %v1660_v36  ;;  %v1662_v49 = vsel %vm642_vm14, %v3064_v48, %v1660_v36 }
 0x7d7   : > { %v3125_v14 = vpack.i.bf16 %v1662_v49, %v1661_v16 }
 0x7d8   : > { %3081 = vrot.lane.b32.xlu1 %v3080_v15, %s3367_s20 }
 0x7d9   : > { %3126 = vrot.lane.b32.xlu0 %v3125_v14, %s3367_s20 }
 0x7db   : > { %3121 = vrot.lane.b32.xlu2 %v3120_v43, %s3367_s20 }
 0x7e0   : > { %3091 = vrot.lane.b32.xlu1 %v3090_v54, %s3367_s20 }
 0x7e1   : > { %3131 = vrot.lane.b32.xlu0 %v3130_v55, %s3367_s20 }
 0x7e3   : > { %1727 = vperm.xlu2 %2714, %v1724_v56  }
 0x7e8   : > { %3101 = vrot.lane.b32.xlu1 %v3100_v1, %s3367_s20 }
 0x7e9   : > { %1963 = vrot.lane.b32.xlu0 %v3366_v5, %s3372_s29 }
 0x7eb   : > { %1952 = vrot.lane.b32.xlu2 %v3520_v34, %s3376_s21 }
 0x7f0   : > { %3111 = vrot.lane.b32.xlu1 %v3110_v31, %s3367_s20 }
 0x7f8   : > { %1737 = vrot.lane.b32.xlu1 %v1622_v0, %s3367_s20 }
 0x800   : > { %1974 = vrot.lane.b32.xlu1 %v3496_v19, %s3374_s16 }
 0x803   : > { %v3072_v42 = vpop.permute.xlu2 %3071 }
 0x804   : > { %v3074_v4 = vunpack.i.h.bf16 %v3072_v42  ;;  %v3073_v6 = vunpack.i.l.bf16 %v3072_v42 }
 0x806   : > { %v1802_v27 = vsel %vm614_vm4, %v3073_v6, %v3074_v4 }
 0x808   : > { %1941 = vrot.lane.b32.xlu1 %v3511_v29, %s3375_s17 }
 0x823   : > { %v3077_v44 = vpop.permute.xlu0 %3076 }
 0x824   : > { %v3079_v48 = vunpack.i.h.bf16 %v3077_v44  ;;  %v3078_v57 = vunpack.i.l.bf16 %v3077_v44 }
 0x825   : > { %v3107_v59 = vpop.permute.xlu2 %3106 }
 0x826   : > { %v3109_v36 = vunpack.i.h.bf16 %v3107_v59  ;;  %v3108_v21 = vunpack.i.l.bf16 %v3107_v59  ;;  %v1795_v43 = vsel %vm614_vm4, %v3078_v57, %v3079_v48 }
 0x828   : > { %v1798_v53 = vsel %vm614_vm4, %v3108_v21, %v3109_v36 }
 0x82d   : > { %v3117_v28 = vpop.permute.xlu2 %3116 }
 0x82e   : > { %v3119_v45 = vunpack.i.h.bf16 %v3117_v28  ;;  %v3118_v54 = vunpack.i.l.bf16 %v3117_v28 }
 0x835   : > { %v3087_v60 = vpop.permute.xlu0 %3086  ;;  %v3122_v56 = vpop.permute.xlu2 %3121 }
 0x836   : > { %v3089_v22 = vunpack.i.h.bf16 %v3087_v60  ;;  %v3088_v40 = vunpack.i.l.bf16 %v3087_v60  ;;  %v3123_v42 = vunpack.i.l.bf16 %v3122_v56 }
 0x838   : > { %v1803_v41 = vsel %vm614_vm4, %v3088_v40, %v3089_v22  ;;  %v3124_v40 = vunpack.i.h.bf16 %v3122_v56 }
 0x839   : > { %1833 = vmatpush.msrb.mxu0 %v1803_v41  ;;  %v1794_v41 = vsel %vm614_vm4, %v3118_v54, %v3119_v45 }
 0x83d   : > { %v3097_v10 = vpop.permute.xlu0 %3096 }
 0x83e   : > { %v3099_v7 = vunpack.i.h.bf16 %v3097_v10  ;;  %v3098_v12 = vunpack.i.l.bf16 %v3097_v10 }
 0x840   : > { %v1799_v58 = vsel %vm614_vm4, %v3098_v12, %v3099_v7 }
 0x84a   : > { %v3082_v51 = vpop.permute.xlu1 %3081 }
 0x84b   : > { %v3127_v2 = vpop.permute.xlu0 %3126  ;;  %v3084_v0 = vunpack.i.h.bf16 %v3082_v51  ;;  %v3083_v44 = vunpack.i.l.bf16 %v3082_v51 }
 0x84c   : > { %v3129_v62 = vunpack.i.h.bf16 %v3127_v2  ;;  %v3128_v1 = vunpack.i.l.bf16 %v3127_v2 }
 0x84e   : > { %v1791_v4 = vsel %vm614_vm4, %v3128_v1, %v3129_v62  ;;  %v1792_v51 = vsel %vm614_vm4, %v3129_v62, %v3083_v44 }
 0x852   : > { %v3092_v47 = vpop.permute.xlu1 %3091 }
 0x853   : > { %v3094_v11 = vunpack.i.h.bf16 %v3092_v47  ;;  %v3093_v18 = vunpack.i.l.bf16 %v3092_v47  ;;  %v3132_v31 = vpop.permute.xlu0 %3131 }
 0x854   : > { %v3134_v59 = vunpack.i.h.bf16 %v3132_v31  ;;  %v3133_v10 = vunpack.i.l.bf16 %v3132_v31 }
 0x855   : > { %v1801_v23 = vsel %vm614_vm4, %v3094_v11, %v3073_v6  ;;  %v1804_v24 = vsel %vm614_vm4, %v3089_v22, %v3093_v18  ;;  %v1789_v6 = vsel %vm614_vm4, %v3084_v0, %v3123_v42  ;;  %v1790_v11 = vsel %vm614_vm4, %v3123_v42, %v3124_v40 }
 0x856   : > { %1834 = vmatpush.msrb.mxu0 %v1801_v23  ;;  %1853 = vmatpush.msrb.mxu1 %v1804_v24  ;;  %v1787_v12 = vsel %vm614_vm4, %v3133_v10, %v3134_v59  ;;  %v1728_v23 = vpop.permute.xlu2 %1727 }
 0x858   : > { %1835 = vmatpush.msrb.mxu0 %v1799_v58  ;;  %1854 = vmatpush.msrb.mxu1 %v1802_v27 }
 0x85a   : > { %v3102_v13 = vpop.permute.xlu1 %3101 }
 0x85b   : > { %v3104_v15 = vunpack.i.h.bf16 %v3102_v13  ;;  %v3103_v16 = vunpack.i.l.bf16 %v3102_v13  ;;  %v1964_v0 = vpop.permute.xlu0 %1963 }
 0x85d   : > { %v1797_v49 = vsel %vm614_vm4, %v3104_v15, %v3108_v21  ;;  %v1800_v14 = vsel %vm614_vm4, %v3099_v7, %v3103_v16  ;;  %v1723_v7 = vld [vmem:[%s4419_s9] sm:$0xff] }
 0x85e   : > { %1836 = vmatpush.msrb.mxu0 %v1797_v49  ;;  %1855 = vmatpush.msrb.mxu1 %v1800_v14 }
 0x860   : > { %1837 = vmatpush.msrb.mxu0 %v1795_v43  ;;  %1856 = vmatpush.msrb.mxu1 %v1798_v53 }
 0x862   : > { %v3112_v55 = vpop.permute.xlu1 %3111 }
 0x863   : > { %v3114_v61 = vunpack.i.h.bf16 %v3112_v55  ;;  %v3113_v63 = vunpack.i.l.bf16 %v3112_v55 }
 0x865   : > { %v1793_v60 = vsel %vm614_vm4, %v3114_v61, %v3118_v54  ;;  %v1796_v22 = vsel %vm614_vm4, %v3079_v48, %v3113_v63  ;;  %v4195_v63 = vpop.permute.xlu2 %1952 }
 0x866   : > { %1838 = vmatpush.msrb.mxu0 %v1793_v60  ;;  %1857 = vmatpush.msrb.mxu1 %v1796_v22 }
 0x868   : > { %1839 = vmatpush.msrb.mxu0 %v1791_v4  ;;  %1858 = vmatpush.msrb.mxu1 %v1794_v41 }
 0x86a   : > { %v1738_v47 = vpop.permute.xlu1 %1737  ;;  %1840 = vmatpush.msrb.mxu0 %v1789_v6  ;;  %1859 = vmatpush.msrb.mxu1 %v1792_v51 }
 0x86b   : > { %v1788_v18 = vsel %vm614_vm4, %v3134_v59, %v1738_v47 }
 0x86c   : > { %1841 = vmatpush.msrb.mxu0 %v1787_v12  ;;  %1860 = vmatpush.msrb.mxu1 %v1790_v11 }
 0x86d   : > { %2545 = vmatmul.msk.f32.vlgmr.msrb.gmra.mxu0 %vm810_vm0, %v1723_v7 }
 0x86e   : > { %1861 = vmatpush.msrb.mxu1 %v1788_v18 }
 0x86f   : > { %2546 = vmatmul.msk.f32.vlgmr.msrb.gmra.mxu1 %vm810_vm0, %v1723_v7 }
 0x872   : > { %v1975_v42 = vpop.permute.xlu1 %1974 }
 0x87a   : > { %v1942_v47 = vpop.permute.xlu1 %1941 }
 0x8ea   : > { %v1843_v24 = vpop.f32.mrf.mxu0 }
 0x8eb   : > { %v1844_v58 = vadd.f32 %v1843_v24, %v1728_v23 }
 0x8ec   : > { %v1863_v27 = vpop.f32.mrf.mxu1 }
 0x8ed   : > { %v1866_v28 = vmul.f32 0.15, %v1844_v58  ;;  %v1864_v48 = vadd.f32 %v1863_v27, %v1728_v23 }
 0x8ef   : > { %v4152_v57 = vadd.f32 %v1866_v28, %v3908_v25  ;;  %v1867_v2 = vmul.f32 0.15, %v1864_v48 }
 0x8f1   : > { %v4155_v13 = vadd.f32 %v1867_v2, %v3911_v39  ;;  %v1893_v36 = vmul.f32 %v3494_v17, %v4152_v57  ;;  %v1890_v16 = vmul.f32 %v3515_v32, %v4152_v57  ;;  %v1887_v43 = vmul.f32 %v3513_v30, %v4152_v57 }
 0x8f2   : > { %v1879_v54 = vmul.f32 %v4152_v57, %v3518_v33  ;;  %v1882_v55 = vmul.f32 %v4152_v57, %v3554_v50  ;;  %v3170_v62 = vpack.i.bf16 %v4152_v57, %v3366_v5 }
 0x8f3   : > { %v3135_v21 = vpack.i.bf16 %v4155_v13, %v4152_v57  ;;  %v1894_v15 = vmul.f32 %v4155_v13, %v3500_v20  ;;  %v1891_v25 = vmul.f32 %v4155_v13, %v3523_v35  ;;  %v1888_v14 = vmul.f32 %v4155_v13, %v3528_v37 }
 0x8f4   : > { %v1883_v53 = vmul.f32 %v3548_v46, %v4155_v13  ;;  %v3165_v56 = vpack.i.bf16 %v1879_v54, %v3530_v38  ;;  %v3160_v1 = vpack.i.bf16 %v1882_v55, %v3558_v52  ;;  %v1880_v61 = vmul.f32 %v3508_v26, %v4155_v13 }
 0x8f5   : > { %3136 = vrot.lane.b32.xlu2 %v3135_v21, %s3372_s29  ;;  %v3145_v49 = vpack.i.bf16 %v1894_v15, %v1893_v36  ;;  %v3150_v39 = vpack.i.bf16 %v1891_v25, %v1890_v16  ;;  %v3155_v45 = vpack.i.bf16 %v1888_v14, %v1887_v43 }
 0x8f7   : > { %3146 = vrot.lane.b32.xlu0 %v3145_v49, %s3374_s16  ;;  %3151 = vrot.lane.b32.xlu1 %v3150_v39, %s3376_s21 }
 0x8fd   : > { %3141 = vrot.lane.b32.xlu2 %v3135_v21, %s3373_s30 }
 0x8ff   : > { %1925 = vrot.lane.b32.xlu1 %v1883_v53, %s3378_s23  ;;  %3156 = vrot.lane.b32.xlu0 %v3155_v45, %s3375_s17 }
 0x905   : > { %3166 = vrot.lane.b32.xlu2 %v3165_v56, %s3377_s22 }
 0x907   : > { %3171 = vrot.lane.b32.xlu1 %v3170_v62, %s3371_s28  ;;  %3161 = vrot.lane.b32.xlu0 %v3160_v1, %s3378_s23 }
 0x90d   : > { %1903 = vrot.lane.b32.xlu2 %v4155_v13, %s3371_s28 }
 0x90f   : > { %1914 = vrot.lane.b32.xlu0 %v1880_v61, %s3377_s22 }
 0x94f   : > { %v3137_v31 = vpop.permute.xlu2 %3136 }
 0x950   : > { %v3139_v44 = vunpack.i.h.bf16 %v3137_v31  ;;  %v3138_v60 = vunpack.i.l.bf16 %v3137_v31 }
 0x952   : > { %v1965_v22 = vsel %vm695_vm10, %v3138_v60, %v3139_v44  ;;  %v1966_v40 = vsel %vm695_vm10, %v3139_v44, %v1964_v0 }
 0x953   : > { %v3175_v41 = vpack.i.bf16 %v1966_v40, %v1965_v22 }
 0x955   : > { %3176 = vrot.lane.b32.xlu2 %v3175_v41, %s3367_s20 }
 0x957   : > { %v4200_v59 = vpop.permute.xlu2 %3141 }
 0x958   : > { %v3144_v10 = vunpack.i.h.bf16 %v4200_v59  ;;  %v3143_v4 = vunpack.i.l.bf16 %v4200_v59 }
 0x95a   : > { %v1933_v6 = vsel %vm549_vm9, %v3143_v4, %v3144_v10 }
 0x95b   : > { %v3180_v51 = vpack.i.bf16 %v1933_v6, %v3143_v4 }
 0x95d   : > { %3181 = vrot.lane.b32.xlu0 %v3180_v51, %s3367_s20 }
 0x95f   : > { %v3167_v39 = vpop.permute.xlu2 %3166 }
 0x960   : > { %v3169_v62 = vunpack.i.h.bf16 %v3167_v39  ;;  %v3168_v1 = vunpack.i.l.bf16 %v3167_v39 }
 0x962   : > { %v1916_v40 = vsel %vm642_vm14, %v3168_v1, %v3169_v62 }
 0x967   : > { %v1904_v61 = vpop.permute.xlu2 %1903 }
 0x969   : > { %v3147_v7 = vpop.permute.xlu0 %3146  ;;  %v3152_v12 = vpop.permute.xlu1 %3151 }
 0x96a   : > { %v3149_v11 = vunpack.i.h.bf16 %v3147_v7  ;;  %v3148_v18 = vunpack.i.l.bf16 %v3147_v7  ;;  %v3154_v58 = vunpack.i.h.bf16 %v3152_v12  ;;  %v3153_v27 = vunpack.i.l.bf16 %v3152_v12 }
 0x96c   : > { %v1976_v23 = vsel %vm707_vm11, %v3148_v18, %v3149_v11  ;;  %v1954_v2 = vsel %vm683_vm13, %v3153_v27, %v3154_v58  ;;  %v1977_v51 = vsel %vm707_vm11, %v3149_v11, %v1975_v42  ;;  %v1955_v42 = vsel %vm683_vm13, %v3154_v58, %v4195_v63 }
 0x96d   : > { %v3190_v24 = vpack.i.bf16 %v1976_v23, %v3148_v18  ;;  %v3200_v25 = vpack.i.bf16 %v1954_v2, %v3153_v27  ;;  %v3195_v7 = vpack.i.bf16 %v3138_v60, %v1977_v51  ;;  %v1979_v18 = vld [vmem:[%s4422_s12] sm:$0xff]  ;;  %v1877_v63 = vmul.f32 %v3606_v3, %v4155_v13 }
 0x96f   : > { %3191 = vrot.lane.b32.xlu0 %v3190_v24, %s3367_s20 }
 0x971   : > { %v1926_v28 = vpop.permute.xlu1 %1925  ;;  %v3157_v48 = vpop.permute.xlu0 %3156 }
 0x972   : > { %v3159_v36 = vunpack.i.h.bf16 %v3157_v48  ;;  %v3158_v21 = vunpack.i.l.bf16 %v3157_v48 }
 0x974   : > { %v1944_v15 = vsel %vm671_vm12, %v3159_v36, %v1942_v47  ;;  %v1943_v16 = vsel %vm671_vm12, %v3158_v21, %v3159_v36  ;;  %v1876_v47 = vmul.f32 %v4152_v57, %v3610_v8  ;;  %v3205_v11 = vpack.i.bf16 %v3158_v21, %v1955_v42 }
 0x975   : > { %v3210_v49 = vpack.i.bf16 %v1944_v15, %v1943_v16 }
 0x976   : > { %v3235_v12 = vpack.i.bf16 %v1876_v47, %v3612_v9 }
 0x977   : > { %3201 = vrot.lane.b32.xlu0 %v3200_v25, %s3367_s20  ;;  %3211 = vrot.lane.b32.xlu2 %v3210_v49, %s3367_s20 }
 0x979   : > { %v3162_v14 = vpop.permute.xlu0 %3161  ;;  %v3172_v43 = vpop.permute.xlu1 %3171 }
 0x97a   : > { %v3164_v53 = vunpack.i.h.bf16 %v3162_v14  ;;  %v3174_v54 = vunpack.i.h.bf16 %v3172_v43  ;;  %v3173_v55 = vunpack.i.l.bf16 %v3172_v43  ;;  %v3163_v23 = vunpack.i.l.bf16 %v3162_v14 }
 0x97c   : > { %v1928_v45 = vsel %vm654_vm15, %v3164_v53, %v1926_v28  ;;  %v1905_v31 = vsel %vm575_vm8, %v3173_v55, %v3174_v54  ;;  %v1906_v44 = vsel %vm575_vm8, %v3174_v54, %v1904_v61  ;;  %v1927_v57 = vsel %vm654_vm15, %v3163_v23, %v3164_v53 }
 0x97d   : > { %v3220_v56 = vpack.i.bf16 %v1926_v28, %v1928_v45  ;;  %v3225_v6 = vpack.i.bf16 %v1904_v61, %v1906_v44  ;;  %v3215_v60 = vpack.i.bf16 %v1927_v57, %v3144_v10 }
 0x97f   : > { %3221 = vrot.lane.b32.xlu2 %v3220_v56, %s3367_s20 }
 0x981   : > { %v1915_v0 = vpop.permute.xlu0 %1914 }
 0x982   : > { %v3185_v22 = vpack.i.bf16 %v1905_v31, %v1915_v0  ;;  %v1917_v41 = vsel %vm642_vm14, %v3169_v62, %v1915_v0 }
 0x983   : > { %v3230_v4 = vpack.i.bf16 %v1917_v41, %v1916_v40 }
 0x984   : > { %3186 = vrot.lane.b32.xlu1 %v3185_v22, %s3367_s20 }
 0x985   : > { %3231 = vrot.lane.b32.xlu0 %v3230_v4, %s3367_s20 }
 0x987   : > { %3226 = vrot.lane.b32.xlu2 %v3225_v6, %s3367_s20 }
 0x98c   : > { %3196 = vrot.lane.b32.xlu1 %v3195_v7, %s3367_s20 }
 0x98d   : > { %3236 = vrot.lane.b32.xlu0 %v3235_v12, %s3367_s20 }
 0x98f   : > { %1982 = vperm.xlu2 %2714, %v1979_v18  }
 0x994   : > { %3206 = vrot.lane.b32.xlu1 %v3205_v11, %s3367_s20 }
 0x995   : > { %2214 = vrot.lane.b32.xlu0 %v3366_v5, %s3372_s29 }
 0x997   : > { %2203 = vrot.lane.b32.xlu2 %v3520_v34, %s3376_s21 }
 0x99c   : > { %3216 = vrot.lane.b32.xlu1 %v3215_v60, %s3367_s20 }
 0x9a4   : > { %1992 = vrot.lane.b32.xlu1 %v1877_v63, %s3367_s20 }
 0x9ac   : > { %2225 = vrot.lane.b32.xlu1 %v3496_v19, %s3374_s16 }
 0x9af   : > { %v3177_v10 = vpop.permute.xlu2 %3176 }
 0x9b0   : > { %v3179_v13 = vunpack.i.h.bf16 %v3177_v10  ;;  %v3178_v36 = vunpack.i.l.bf16 %v3177_v10 }
 0x9b2   : > { %v2057_v14 = vsel %vm614_vm4, %v3178_v36, %v3179_v13 }
 0x9b4   : > { %2192 = vrot.lane.b32.xlu1 %v3511_v29, %s3375_s17 }
 0x9cf   : > { %v3182_v24 = vpop.permute.xlu0 %3181 }
 0x9d0   : > { %v3184_v53 = vunpack.i.h.bf16 %v3182_v24  ;;  %v3183_v45 = vunpack.i.l.bf16 %v3182_v24 }
 0x9d1   : > { %v3212_v48 = vpop.permute.xlu2 %3211 }
 0x9d2   : > { %v3214_v56 = vunpack.i.h.bf16 %v3212_v48  ;;  %v3213_v62 = vunpack.i.l.bf16 %v3212_v48  ;;  %v2050_v44 = vsel %vm614_vm4, %v3183_v45, %v3184_v53  ;;  %v1978_v48 = vld [vmem:[%s4421_s11] sm:$0xff] }
 0x9d4   : > { %v2053_v22 = vsel %vm614_vm4, %v3213_v62, %v3214_v56 }
 0x9d9   : > { %v3222_v43 = vpop.permute.xlu2 %3221 }
 0x9da   : > { %v3224_v40 = vunpack.i.h.bf16 %v3222_v43  ;;  %v3223_v41 = vunpack.i.l.bf16 %v3222_v43 }
 0x9dc   : > { %v2049_v63 = vsel %vm614_vm4, %v3223_v41, %v3224_v40 }
 0x9e1   : > { %v3192_v58 = vpop.permute.xlu0 %3191  ;;  %v3227_v6 = vpop.permute.xlu2 %3226 }
 0x9e2   : > { %v3194_v27 = vunpack.i.h.bf16 %v3192_v58  ;;  %v3193_v34 = vunpack.i.l.bf16 %v3192_v58  ;;  %v3229_v60 = vunpack.i.h.bf16 %v3227_v6  ;;  %v3228_v24 = vunpack.i.l.bf16 %v3227_v6 }
 0x9e4   : > { %v2058_v59 = vsel %vm614_vm4, %v3193_v34, %v3194_v27  ;;  %v2045_v13 = vsel %vm614_vm4, %v3228_v24, %v3229_v60 }
 0x9e5   : > { %2088 = vmatpush.msrb.mxu2 %v2058_v59 }
 0x9e9   : > { %v3202_v2 = vpop.permute.xlu0 %3201 }
 0x9ea   : > { %v3204_v15 = vunpack.i.h.bf16 %v3202_v2  ;;  %v3203_v16 = vunpack.i.l.bf16 %v3202_v2 }
 0x9ec   : > { %v2054_v39 = vsel %vm614_vm4, %v3203_v16, %v3204_v15 }
 0x9f6   : > { %v3187_v28 = vpop.permute.xlu1 %3186 }
 0x9f7   : > { %v3232_v54 = vpop.permute.xlu0 %3231  ;;  %v3189_v42 = vunpack.i.h.bf16 %v3187_v28  ;;  %v3188_v11 = vunpack.i.l.bf16 %v3187_v28 }
 0x9f8   : > { %v3234_v51 = vunpack.i.h.bf16 %v3232_v54  ;;  %v3233_v47 = vunpack.i.l.bf16 %v3232_v54 }
 0x9f9   : > { %v2044_v59 = vsel %vm614_vm4, %v3189_v42, %v3228_v24 }
 0x9fa   : > { %v2046_v34 = vsel %vm614_vm4, %v3233_v47, %v3234_v51  ;;  %v2047_v10 = vsel %vm614_vm4, %v3234_v51, %v3188_v11 }
 0x9fe   : > { %v3197_v21 = vpop.permute.xlu1 %3196 }
 0x9ff   : > { %v3199_v19 = vunpack.i.h.bf16 %v3197_v21  ;;  %v3198_v25 = vunpack.i.l.bf16 %v3197_v21  ;;  %v3237_v18 = vpop.permute.xlu0 %3236  ;;  %v1983_v21 = vpop.permute.xlu2 %1982 }
 0xa00   : > { %v3239_v58 = vunpack.i.h.bf16 %v3237_v18 }
 0xa01   : > { %v2056_v29 = vsel %vm614_vm4, %v3199_v19, %v3178_v36  ;;  %v2059_v49 = vsel %vm614_vm4, %v3194_v27, %v3198_v25  ;;  %v3238_v27 = vunpack.i.l.bf16 %v3237_v18 }
 0xa02   : > { %2089 = vmatpush.msrb.mxu2 %v2056_v29  ;;  %2108 = vmatpush.msrb.mxu3 %v2059_v49 }
 0xa03   : > { %v2042_v2 = vsel %vm614_vm4, %v3238_v27, %v3239_v58 }
 0xa04   : > { %2090 = vmatpush.msrb.mxu2 %v2054_v39  ;;  %2109 = vmatpush.msrb.mxu3 %v2057_v14 }
 0xa06   : > { %v3207_v55 = vpop.permute.xlu1 %3206 }
 0xa07   : > { %v3209_v1 = vunpack.i.h.bf16 %v3207_v55  ;;  %v3208_v61 = vunpack.i.l.bf16 %v3207_v55  ;;  %v2215_v56 = vpop.permute.xlu0 %2214 }
 0xa09   : > { %v2052_v31 = vsel %vm614_vm4, %v3209_v1, %v3213_v62  ;;  %v2055_v0 = vsel %vm614_vm4, %v3204_v15, %v3208_v61 }
 0xa0a   : > { %2091 = vmatpush.msrb.mxu2 %v2052_v31  ;;  %2110 = vmatpush.msrb.mxu3 %v2055_v0 }
 0xa0c   : > { %2092 = vmatpush.msrb.mxu2 %v2050_v44  ;;  %2111 = vmatpush.msrb.mxu3 %v2053_v22 }
 0xa0e   : > { %v3217_v4 = vpop.permute.xlu1 %3216 }
 0xa0f   : > { %v3219_v7 = vunpack.i.h.bf16 %v3217_v4  ;;  %v3218_v12 = vunpack.i.l.bf16 %v3217_v4 }
 0xa11   : > { %v2048_v23 = vsel %vm614_vm4, %v3219_v7, %v3223_v41  ;;  %v2051_v57 = vsel %vm614_vm4, %v3184_v53, %v3218_v12 }
 0xa12   : > { %2093 = vmatpush.msrb.mxu2 %v2048_v23  ;;  %2112 = vmatpush.msrb.mxu3 %v2051_v57 }
 0xa14   : > { %2094 = vmatpush.msrb.mxu2 %v2046_v34  ;;  %2113 = vmatpush.msrb.mxu3 %v2049_v63 }
 0xa16   : > { %v1993_v28 = vpop.permute.xlu1 %1992  ;;  %2095 = vmatpush.msrb.mxu2 %v2044_v59  ;;  %2114 = vmatpush.msrb.mxu3 %v2047_v10 }
 0xa17   : > { %v2043_v36 = vsel %vm614_vm4, %v3239_v58, %v1993_v28 }
 0xa18   : > { %2096 = vmatpush.msrb.mxu2 %v2042_v2  ;;  %2115 = vmatpush.msrb.mxu3 %v2045_v13 }
 0xa19   : > { %2547 = vmatmul.msk.f32.vlgmr.msrb.gmra.mxu2 %vm810_vm0, %v1978_v48 }
 0xa1a   : > { %2116 = vmatpush.msrb.mxu3 %v2043_v36 }
 0xa1b   : > { %2548 = vmatmul.msk.f32.vlgmr.msrb.gmra.mxu3 %vm810_vm0, %v1978_v48 }
 0xa1e   : > { %v2226_v31 = vpop.permute.xlu1 %2225 }
 0xa26   : > { %v2193_v41 = vpop.permute.xlu1 %2192 }
 0xa9c   : > { %v2098_v15 = vpop.f32.mrf.mxu2 }
 0xa9d   : > { %v4274_v16 = vadd.f32 %v2098_v15, %v1983_v21 }
 0xa9e   : > { %v2118_v19 = vpop.f32.mrf.mxu3 }
 0xa9f   : > { %v4276_v25 = vadd.f32 %v2118_v19, %v1983_v21  ;;  %v2144_v29 = vmul.f32 %v3494_v17, %v4274_v16  ;;  %v2141_v14 = vmul.f32 %v3515_v32, %v4274_v16  ;;  %v2130_v54 = vmul.f32 %v4274_v16, %v3518_v33 }
 0xaa0   : > { %v2133_v55 = vmul.f32 %v4274_v16, %v3554_v50 }
 0xaa1   : > { %v3240_v49 = vpack.i.bf16 %v4276_v25, %v4274_v16  ;;  %v2145_v39 = vmul.f32 %v4276_v25, %v3500_v20  ;;  %v2142_v43 = vmul.f32 %v4276_v25, %v3523_v35  ;;  %v2139_v17 = vmul.f32 %v4276_v25, %v3528_v37 }
 0xaa2   : > { %v2138_v20 = vmul.f32 %v3513_v30, %v4274_v16  ;;  %v2134_v32 = vmul.f32 %v3548_v46, %v4276_v25  ;;  %v3270_v37 = vpack.i.bf16 %v2130_v54, %v3530_v38  ;;  %v3275_v30 = vpack.i.bf16 %v4274_v16, %v3366_v5  ;;  %v4316_v38 = vpop.permute.xlu2 %2203 }
 0xaa3   : > { %3241 = vrot.lane.b32.xlu2 %v3240_v49, %s3372_s29  ;;  %v3250_v53 = vpack.i.bf16 %v2145_v39, %v2144_v29  ;;  %v3255_v45 = vpack.i.bf16 %v2142_v43, %v2141_v14  ;;  %v3265_v46 = vpack.i.bf16 %v2133_v55, %v3558_v52  ;;  %v2131_v33 = vmul.f32 %v3508_v26, %v4276_v25 }
 0xaa4   : > { %v3260_v35 = vpack.i.bf16 %v2139_v17, %v2138_v20 }
 0xaa5   : > { %3251 = vrot.lane.b32.xlu0 %v3250_v53, %s3374_s16  ;;  %3256 = vrot.lane.b32.xlu1 %v3255_v45, %s3376_s21 }
 0xaab   : > { %3246 = vrot.lane.b32.xlu2 %v3240_v49, %s3373_s30 }
 0xaad   : > { %2176 = vrot.lane.b32.xlu1 %v2134_v32, %s3378_s23  ;;  %3261 = vrot.lane.b32.xlu0 %v3260_v35, %s3375_s17  ;;  %v2127_v35 = vmul.f32 %v4274_v16, %v3610_v8  ;;  %v2128_v16 = vmul.f32 %v3606_v3, %v4276_v25 }
 0xaaf   : > { %v3340_v55 = vpack.i.bf16 %v2127_v35, %v3612_v9 }
 0xab3   : > { %3271 = vrot.lane.b32.xlu2 %v3270_v37, %s3377_s22  ;;  %v2232_v37 = vld [vmem:[%s4424_s14 + $0x8] sm:$0x3] }
 0xab5   : > { %3276 = vrot.lane.b32.xlu1 %v3275_v30, %s3371_s28  ;;  %3266 = vrot.lane.b32.xlu0 %v3265_v46, %s3378_s23  ;;  %s2556_s23 = sshll.u32 %s4427_s19, 5 }
 0xab6   : > { %s494_s26 = scalar_lea.vmem %s4425_s15, %s2556_s23 }
 0xabb   : > { %2154 = vrot.lane.b32.xlu2 %v4276_v25, %s3371_s28 }
 0xabd   : > { %2165 = vrot.lane.b32.xlu0 %v2131_v33, %s3377_s22 }
 0xafd   : > { %v3242_v50 = vpop.permute.xlu2 %3241 }
 0xafe   : > { %v3244_v62 = vunpack.i.h.bf16 %v3242_v50  ;;  %v3243_v5 = vunpack.i.l.bf16 %v3242_v50 }
 0xb00   : > { %v2216_v52 = vsel %vm695_vm10, %v3243_v5, %v3244_v62  ;;  %v2217_v1 = vsel %vm695_vm10, %v3244_v62, %v2215_v56 }
 0xb01   : > { %v3280_v61 = vpack.i.bf16 %v2217_v1, %v2216_v52 }
 0xb03   : > { %3281 = vrot.lane.b32.xlu2 %v3280_v61, %s3367_s20 }
 0xb05   : > { %v4321_v0 = vpop.permute.xlu2 %3246 }
 0xb06   : > { %v3249_v26 = vunpack.i.h.bf16 %v4321_v0  ;;  %v3248_v44 = vunpack.i.l.bf16 %v4321_v0 }
 0xb08   : > { %v2184_v22 = vsel %vm549_vm9, %v3248_v44, %v3249_v26 }
 0xb09   : > { %v3285_v40 = vpack.i.bf16 %v2184_v22, %v3248_v44 }
 0xb0b   : > { %3286 = vrot.lane.b32.xlu0 %v3285_v40, %s3367_s20 }
 0xb0d   : > { %v3272_v59 = vpop.permute.xlu2 %3271 }
 0xb0e   : > { %v3274_v15 = vunpack.i.h.bf16 %v3272_v59  ;;  %v3273_v19 = vunpack.i.l.bf16 %v3272_v59 }
 0xb10   : > { %v2167_v53 = vsel %vm642_vm14, %v3273_v19, %v3274_v15 }
 0xb15   : > { %v2155_v29 = vpop.permute.xlu2 %2154 }
 0xb17   : > { %v3252_v4 = vpop.permute.xlu0 %3251  ;;  %v3257_v6 = vpop.permute.xlu1 %3256 }
 0xb18   : > { %v3254_v51 = vunpack.i.h.bf16 %v3252_v4  ;;  %v3253_v47 = vunpack.i.l.bf16 %v3252_v4  ;;  %v3259_v18 = vunpack.i.h.bf16 %v3257_v6  ;;  %v3258_v42 = vunpack.i.l.bf16 %v3257_v6 }
 0xb1a   : > { %v2227_v7 = vsel %vm707_vm11, %v3253_v47, %v3254_v51  ;;  %v2205_v57 = vsel %vm683_vm13, %v3258_v42, %v3259_v18  ;;  %v2228_v32 = vsel %vm707_vm11, %v3254_v51, %v2226_v31  ;;  %v2206_v30 = vsel %vm683_vm13, %v3259_v18, %v4316_v38 }
 0xb1b   : > { %v3295_v12 = vpack.i.bf16 %v2227_v7, %v3253_v47  ;;  %v3305_v27 = vpack.i.bf16 %v2205_v57, %v3258_v42  ;;  %v3300_v54 = vpack.i.bf16 %v3243_v5, %v2228_v32  ;;  %v2231_v47 = vld [vmem:[%s4424_s14] sm:$0xff] }
 0xb1d   : > { %3296 = vrot.lane.b32.xlu0 %v3295_v12, %s3367_s20 }
 0xb1f   : > { %v2177_v11 = vpop.permute.xlu1 %2176  ;;  %v3262_v23 = vpop.permute.xlu0 %3261 }
 0xb20   : > { %v3264_v60 = vunpack.i.h.bf16 %v3262_v23  ;;  %v3263_v63 = vunpack.i.l.bf16 %v3262_v23 }
 0xb22   : > { %v2195_v24 = vsel %vm671_vm12, %v3264_v60, %v2193_v41  ;;  %v2194_v58 = vsel %vm671_vm12, %v3263_v63, %v3264_v60  ;;  %v3310_v46 = vpack.i.bf16 %v3263_v63, %v2206_v30 }
 0xb23   : > { %v3315_v34 = vpack.i.bf16 %v2195_v24, %v2194_v58 }
 0xb25   : > { %3306 = vrot.lane.b32.xlu0 %v3305_v27, %s3367_s20  ;;  %3316 = vrot.lane.b32.xlu2 %v3315_v34, %s3367_s20 }
 0xb27   : > { %v3267_v10 = vpop.permute.xlu0 %3266  ;;  %v3277_v28 = vpop.permute.xlu1 %3276 }
 0xb28   : > { %v3269_v48 = vunpack.i.h.bf16 %v3267_v10  ;;  %v3279_v13 = vunpack.i.h.bf16 %v3277_v28  ;;  %v3278_v36 = vunpack.i.l.bf16 %v3277_v28  ;;  %v3268_v33 = vunpack.i.l.bf16 %v3267_v10 }
 0xb2a   : > { %v2179_v2 = vsel %vm654_vm15, %v3269_v48, %v2177_v11  ;;  %v2156_v49 = vsel %vm575_vm8, %v3278_v36, %v3279_v13  ;;  %v2157_v14 = vsel %vm575_vm8, %v3279_v13, %v2155_v29  ;;  %v2178_v8 = vsel %vm654_vm15, %v3268_v33, %v3269_v48  ;;  %v2230_v33 = vld [vmem:[%s4423_s13 + $0x8] sm:$0x3] }
 0xb2b   : > { %v3325_v21 = vpack.i.bf16 %v2177_v11, %v2179_v2  ;;  %v3330_v20 = vpack.i.bf16 %v2155_v29, %v2157_v14  ;;  %v3320_v9 = vpack.i.bf16 %v2178_v8, %v3249_v26 }
 0xb2d   : > { %3326 = vrot.lane.b32.xlu2 %v3325_v21, %s3367_s20 }
 0xb2f   : > { %v2166_v39 = vpop.permute.xlu0 %2165 }
 0xb30   : > { %v3290_v43 = vpack.i.bf16 %v2156_v49, %v2166_v39  ;;  %v2168_v45 = vsel %vm642_vm14, %v3274_v15, %v2166_v39 }
 0xb31   : > { %v3335_v17 = vpack.i.bf16 %v2168_v45, %v2167_v53 }
 0xb32   : > { %3291 = vrot.lane.b32.xlu1 %v3290_v43, %s3367_s20 }
 0xb33   : > { %3336 = vrot.lane.b32.xlu0 %v3335_v17, %s3367_s20 }
 0xb35   : > { %3331 = vrot.lane.b32.xlu2 %v3330_v20, %s3367_s20 }
 0xb3a   : > { %3301 = vrot.lane.b32.xlu1 %v3300_v54, %s3367_s20 }
 0xb3b   : > { %3341 = vrot.lane.b32.xlu0 %v3340_v55, %s3367_s20  ;;  %v2229_v55 = vld [vmem:[%s4423_s13] sm:$0xff] }
 0xb3d   : > { %2240 = vperm.xlu2 %2714, %v2232_v37  }
 0xb42   : > { %3311 = vrot.lane.b32.xlu1 %v3310_v46, %s3367_s20 }
 0xb43   : > { %2235 = vperm.xlu0 %3345, %v2231_v47  }
 0xb4a   : > { %3321 = vrot.lane.b32.xlu1 %v3320_v9, %s3367_s20 }
 0xb52   : > { %2250 = vrot.lane.b32.xlu1 %v2128_v16, %s3367_s20 }
 0xb5d   : > { %v3282_v52 = vpop.permute.xlu2 %3281 }
 0xb5e   : > { %v3284_v0 = vunpack.i.h.bf16 %v3282_v52  ;;  %v3283_v26 = vunpack.i.l.bf16 %v3282_v52 }
 0xb60   : > { %v2315_v51 = vsel %vm614_vm4, %v3283_v26, %v3284_v0 }
 0xb7d   : > { %v3287_v50 = vpop.permute.xlu0 %3286 }
 0xb7e   : > { %v3289_v12 = vunpack.i.h.bf16 %v3287_v50  ;;  %v3288_v18 = vunpack.i.l.bf16 %v3287_v50 }
 0xb7f   : > { %v3317_v61 = vpop.permute.xlu2 %3316 }
 0xb80   : > { %v3319_v23 = vunpack.i.h.bf16 %v3317_v61  ;;  %v3318_v57 = vunpack.i.l.bf16 %v3317_v61  ;;  %v2308_v27 = vsel %vm614_vm4, %v3288_v18, %v3289_v12 }
 0xb82   : > { %v2311_v34 = vsel %vm614_vm4, %v3318_v57, %v3319_v23 }
 0xb87   : > { %v3327_v7 = vpop.permute.xlu2 %3326 }
 0xb88   : > { %v3329_v59 = vunpack.i.h.bf16 %v3327_v7  ;;  %v3328_v10 = vunpack.i.l.bf16 %v3327_v7 }
 0xb8a   : > { %v2307_v43 = vsel %vm614_vm4, %v3328_v10, %v3329_v59 }
 0xb8f   : > { %v3297_v56 = vpop.permute.xlu0 %3296  ;;  %v3332_v48 = vpop.permute.xlu2 %3331 }
 0xb90   : > { %v3299_v62 = vunpack.i.h.bf16 %v3297_v56  ;;  %v3298_v38 = vunpack.i.l.bf16 %v3297_v56  ;;  %v3334_v14 = vunpack.i.h.bf16 %v3332_v48  ;;  %v3333_v53 = vunpack.i.l.bf16 %v3332_v48 }
 0xb92   : > { %v2316_v5 = vsel %vm614_vm4, %v3298_v38, %v3299_v62  ;;  %v2303_v30 = vsel %vm614_vm4, %v3333_v53, %v3334_v14 }
 0xb93   : > { %2349 = vmatpush.msra.mxu0 %v2316_v5 }
 0xb97   : > { %v3307_v31 = vpop.permute.xlu0 %3306  ;;  %v2241_v50 = vpop.permute.xlu2 %2240 }
 0xb98   : > { %v3309_v22 = vunpack.i.h.bf16 %v3307_v31  ;;  %v3308_v40 = vunpack.i.l.bf16 %v3307_v31 }
 0xb9a   : > { %v2312_v6 = vsel %vm614_vm4, %v3308_v40, %v3309_v22 }
 0xba4   : > { %v4365_v1 = vpop.permute.xlu1 %3291 }
 0xba5   : > { %v3337_v42 = vpop.permute.xlu0 %3336  ;;  %v3294_v19 = vunpack.i.h.bf16 %v4365_v1  ;;  %v3293_v29 = vunpack.i.l.bf16 %v4365_v1 }
 0xba6   : > { %v3339_v2 = vunpack.i.h.bf16 %v3337_v42  ;;  %v3338_v13 = vunpack.i.l.bf16 %v3337_v42 }
 0xba7   : > { %v2302_v32 = vsel %vm614_vm4, %v3294_v19, %v3333_v53 }
 0xba8   : > { %v2304_v20 = vsel %vm614_vm4, %v3338_v13, %v3339_v2  ;;  %v2305_v35 = vsel %vm614_vm4, %v3339_v2, %v3293_v29 }
 0xbac   : > { %v3302_v44 = vpop.permute.xlu1 %3301 }
 0xbad   : > { %v3304_v3 = vunpack.i.h.bf16 %v3302_v44  ;;  %v3303_v25 = vunpack.i.l.bf16 %v3302_v44  ;;  %v3342_v15 = vpop.permute.xlu0 %3341 }
 0xbae   : > { %v3344_v45 = vunpack.i.h.bf16 %v3342_v15  ;;  %v3343_v17 = vunpack.i.l.bf16 %v3342_v15 }
 0xbaf   : > { %v2314_v41 = vsel %vm614_vm4, %v3304_v3, %v3283_v26  ;;  %v2317_v4 = vsel %vm614_vm4, %v3299_v62, %v3303_v25 }
 0xbb0   : > { %2350 = vmatpush.msra.mxu0 %v2314_v41  ;;  %2372 = vmatpush.msra.mxu1 %v2317_v4  ;;  %v2300_v37 = vsel %vm614_vm4, %v3343_v17, %v3344_v45 }
 0xbb2   : > { %2351 = vmatpush.msra.mxu0 %v2312_v6  ;;  %2373 = vmatpush.msra.mxu1 %v2315_v51 }
 0xbb4   : > { %v3312_v11 = vpop.permute.xlu1 %3311 }
 0xbb5   : > { %v3314_v60 = vunpack.i.h.bf16 %v3312_v11  ;;  %v3313_v63 = vunpack.i.l.bf16 %v3312_v11  ;;  %v2236_v16 = vpop.permute.xlu0 %2235 }
 0xbb7   : > { %v2310_v24 = vsel %vm614_vm4, %v3314_v60, %v3318_v57  ;;  %v2313_v58 = vsel %vm614_vm4, %v3309_v22, %v3313_v63 }
 0xbb8   : > { %2352 = vmatpush.msra.mxu0 %v2310_v24  ;;  %2374 = vmatpush.msra.mxu1 %v2313_v58 }
 0xbba   : > { %2353 = vmatpush.msra.mxu0 %v2308_v27  ;;  %2375 = vmatpush.msra.mxu1 %v2311_v34 }
 0xbbc   : > { %v3322_v28 = vpop.permute.xlu1 %3321 }
 0xbbd   : > { %v3324_v36 = vunpack.i.h.bf16 %v3322_v28  ;;  %v3323_v21 = vunpack.i.l.bf16 %v3322_v28 }
 0xbbf   : > { %v2306_v49 = vsel %vm614_vm4, %v3324_v36, %v3328_v10  ;;  %v2309_v39 = vsel %vm614_vm4, %v3289_v12, %v3323_v21 }
 0xbc0   : > { %2354 = vmatpush.msra.mxu0 %v2306_v49  ;;  %2376 = vmatpush.msra.mxu1 %v2309_v39 }
 0xbc2   : > { %2355 = vmatpush.msra.mxu0 %v2304_v20  ;;  %2377 = vmatpush.msra.mxu1 %v2307_v43 }
 0xbc4   : > { %v2251_v54 = vpop.permute.xlu1 %2250  ;;  %2356 = vmatpush.msra.mxu0 %v2302_v32  ;;  %2378 = vmatpush.msra.mxu1 %v2305_v35 }
 0xbc5   : > { %v2301_v46 = vsel %vm614_vm4, %v3344_v45, %v2251_v54 }
 0xbc6   : > { %2357 = vmatpush.msra.mxu0 %v2300_v37  ;;  %2379 = vmatpush.msra.mxu1 %v2303_v30 }
 0xbc7   : > { %2549 = vmatmul.msk.f32.vlgmr.msra.gmra.mxu0 %vm810_vm0, %v2229_v55 }
 0xbc8   : > { %2380 = vmatpush.msra.mxu1 %v2301_v46 }
 0xbc9   : > { %2551 = vmatmul.msk.f32.vlgmr.msra.gmra.mxu1 %vm810_vm0, %v2229_v55 }
 0xbcf   : > { %2550 = vmatmul.msk.f32.gmra.mxu0 %vm810_vm0, %v2230_v33 }
 0xbd1   : > { %2552 = vmatmul.msk.f32.gmra.mxu1 %vm810_vm0, %v2230_v33 }
 0xc44   : > { %v2359_v8 = vpop.f32.mrf.mxu0 }
 0xc45   : > { %v2360_v38 = vadd.f32 %v2359_v8, %v2236_v16 }
 0xc46   : > { %v2382_v9 = vpop.f32.mrf.mxu1 }
 0xc47   : > { %v2383_v61 = vadd.f32 %v2382_v9, %v2236_v16 }
 0xc4c   : > { %v2362_v56 = vpop.f32.mrf.mxu0 }
 0xc4d   : > { %v2363_v62 = vadd.f32 %v2362_v56, %v2241_v50 }
 0xc4e   : > { %v2385_v5 = vpop.f32.mrf.mxu1 }
 0xc4f   : > { %v2389_v52 = vsel %vm2388_vm1, %v2363_v62, -inf  ;;  %v2386_v1 = vadd.f32 %v2385_v5, %v2241_v50 }
 0xc50   : > { %v2390_v31 = vmax.f32 %v2360_v38, %v2389_v52 }
 0xc51   : > { %v2397_v0 = vsel %vm2388_vm1, %v2386_v1, -inf }
 0xc52   : > { %v2391_v26 = vrot.slane %v2390_v31, 4  ;;  %v2398_v44 = vmax.f32 %v2383_v61, %v2397_v0 }
 0xc54   : > { %v2392_v22 = vmax.f32 %v2390_v31, %v2391_v26  ;;  %v2399_v40 = vrot.slane %v2398_v44, 4 }
 0xc56   : > { %v2393_v3 = vrot.slane %v2392_v22, 2  ;;  %v2400_v25 = vmax.f32 %v2398_v44, %v2399_v40 }
 0xc58   : > { %v2394_v41 = vmax.f32 %v2392_v22, %v2393_v3  ;;  %v2401_v4 = vrot.slane %v2400_v25, 2 }
 0xc5a   : > { %v2395_v6 = vrot.slane %v2394_v41, 1  ;;  %v2402_v51 = vmax.f32 %v2400_v25, %v2401_v4 }
 0xc5c   : > { %v2396_v47 = vmax.f32 %v2394_v41, %v2395_v6  ;;  %v2403_v7 = vrot.slane %v2402_v51, 1 }
 0xc5e   : > { %v2405_v12 = vsub.f32 %v2360_v38, %v2396_v47  ;;  %v2407_v18 = vsub.f32 %v2363_v62, %v2396_v47  ;;  %v2404_v42 = vmax.f32 %v2402_v51, %v2403_v7 }
 0xc60   : > { %v2409_v11 = vmul.f32 1.442695, %v2405_v12  ;;  %v2413_v23 = vmul.f32 1.442695, %v2407_v18  ;;  %v2406_v57 = vsub.f32 %v2383_v61, %v2404_v42  ;;  %v2408_v60 = vsub.f32 %v2386_v1, %v2404_v42 }
 0xc62   : > { %3346 = vpow2.f32 %v2409_v11  ;;  %v2411_v63 = vmul.f32 1.442695, %v2406_v57  ;;  %v2415_v24 = vmul.f32 1.442695, %v2408_v60 }
 0xc63   : > { %3348 = vpow2.f32 %v2413_v23 }
 0xc64   : > { %3350 = vpow2.f32 %v2411_v63 }
 0xc65   : > { %3352 = vpow2.f32 %v2415_v24 }
 0xc68   : > { %v3347_v58 = vpop.eup %3346 }
 0xc69   : > { %v3349_v27 = vpop.eup %3348 }
 0xc6a   : > { %v3351_v34 = vpop.eup %3350  ;;  %v2417_v59 = vsel %vm2388_vm1, %v3349_v27, 0.0 }
 0xc6b   : > { %v3353_v10 = vpop.eup %3352  ;;  %v2418_v28 = vadd.f32 %v3347_v58, %v2417_v59 }
 0xc6c   : > { %v2425_v48 = vsel %vm2388_vm1, %v3353_v10, 0.0 }
 0xc6d   : > { %v2419_v2 = vrot.slane %v2418_v28, 4  ;;  %v2426_v13 = vadd.f32 %v3351_v34, %v2425_v48 }
 0xc6f   : > { %v2420_v36 = vadd.f32 %v2419_v2, %v2418_v28  ;;  %v2427_v21 = vrot.slane %v2426_v13, 4 }
 0xc71   : > { %v2421_v15 = vrot.slane %v2420_v36, 2  ;;  %v2428_v19 = vadd.f32 %v2427_v21, %v2426_v13 }
 0xc73   : > { %v2422_v29 = vadd.f32 %v2421_v15, %v2420_v36  ;;  %v2429_v49 = vrot.slane %v2428_v19, 2 }
 0xc75   : > { %v2423_v39 = vrot.slane %v2422_v29, 1  ;;  %v2430_v14 = vadd.f32 %v2429_v49, %v2428_v19 }
 0xc77   : > { %v2424_v43 = vadd.f32 %v2423_v39, %v2422_v29  ;;  %v2431_v53 = vrot.slane %v2430_v14, 1 }
 0xc79   : > { %3354 = vrcp.f32 %v2424_v43  ;;  %v2432_v45 = vadd.f32 %v2431_v53, %v2430_v14  ;;  %v2444_v54 = vand.u32 2147483648, %v2424_v43  ;;  %v2442_v30 = vand.u32 2147483647, %v2424_v43 }
 0xc7a   : > { %vm2438_vm3 = vweird.f32 %v2424_v43 }
 0xc7b   : > { %3356 = vrcp.f32 %v2432_v45  ;;  %v2458_v8 = vand.u32 2147483648, %v2432_v45  ;;  %v2445_v9 = vor.u32 1.1754944e-38, %v2444_v54  ;;  %v2456_v50 = vand.u32 2147483647, %v2432_v45 }
 0xc7c   : > { %vm2443_vm6 = vcmp.eq.f32.partialorder %v2442_v30, 8.507059e+37  ;;  %vm2452_vm7 = vweird.f32 %v2432_v45 }
 0xc7d   : > { %v2459_v1 = vor.u32 1.1754944e-38, %v2458_v8  ;;  %vm2457_vm9 = vcmp.eq.f32.partialorder %v2456_v50, 8.507059e+37 }
 0xc7f   : > { %v3355_v17 = vpop.eup %3354 }
 0xc80   : > { %v2434_v20 = vmul.f32 %v3355_v17, %v2424_v43  ;;  %vm2439_vm2 = vweird.f32 %v3355_v17 }
 0xc81   : > { %v3357_v32 = vpop.eup %3356  ;;  %vm2440_vm4 = vmor %vm2438_vm3, %vm2439_vm2 }
 0xc82   : > { %v2435_v35 = vsub.f32 1.0, %v2434_v20  ;;  %v2448_v55 = vmul.f32 %v3357_v32, %v2432_v45  ;;  %vm2453_vm5 = vweird.f32 %v3357_v32 }
 0xc83   : > { %vm2454_vm8 = vmor %vm2452_vm7, %vm2453_vm5 }
 0xc84   : > { %v2436_v37 = vmul.f32 %v3355_v17, %v2435_v35  ;;  %v2449_v46 = vsub.f32 1.0, %v2448_v55 }
 0xc86   : > { %v2437_v33 = vadd.f32 %v3355_v17, %v2436_v37  ;;  %v2450_v16 = vmul.f32 %v3357_v32, %v2449_v46 }
 0xc88   : > { %v2441_v56 = vsel %vm2440_vm4, %v3355_v17, %v2437_v33  ;;  %v2451_v38 = vadd.f32 %v3357_v32, %v2450_v16 }
 0xc89   : > { %v2446_v62 = vsel %vm2443_vm6, %v2445_v9, %v2441_v56 }
 0xc8a   : > { %v2461_v5 = vmul.f32 %v3347_v58, %v2446_v62  ;;  %v2463_v52 = vmul.f32 %v3349_v27, %v2446_v62  ;;  %v2455_v61 = vsel %vm2454_vm8, %v3357_v32, %v2451_v38 }
 0xc8b   : > { %v2460_v31 = vsel %vm2457_vm9, %v2459_v1, %v2455_v61 }
 0xc8c   : > { %2465 = vst [vmem:[%s494_s26] sm:$0xff] %v2461_v5  ;;  %v2462_v0 = vmul.f32 %v3351_v34, %v2460_v31  ;;  %v2464_v26 = vmul.f32 %v3353_v10, %v2460_v31 }
 0xc8d   : > { %2467 = vst [vmem:[%s494_s26 + $0x10] sm:$0x3] %v2463_v52 }
 0xc8e   : > { %2466 = vst [vmem:[%s494_s26 + $0x8] sm:$0xff] %v2462_v0 }
 0xc8f   : > { %2468 = vst [vmem:[%s494_s26 + $0x18] sm:$0x3] %v2464_v26 }
 0xc90 PF: > { %s25_s18 = sadd.s32 1, %s3364_s18  }
 0xc91   : > { %p22_p4 = scmp.ge.s32.totalorder %s25_s18, 4  }
 0xc93   :  { %24 = sbr.rel (!%p22_p4) target bundleno = 1 (0x1), region = 110 }

</bundles_post_ra>
